<compile_context>
chip_gen: v6e
topology: v6e:2x2x1
jax: 0.10.0
libtpu: 0.0.40
codegen_flags: <defaults>
</compile_context>

<pallas_src>
import math
import functools

import jax
import jax.numpy as jnp
from jax.experimental import pallas as pl
from jax.experimental.pallas import tpu as pltpu

TEMPERATURE = 100.0
SINKHORN_UNROLL = 20


# ---------------------------------------------------------------------------
# Fused kernel: Sinkhorn + weight masking (grid step 0) + time-chunked GRU.
# ---------------------------------------------------------------------------
def gru_kernel(perm_ref, wir_ref, wiz_ref, win_ref, whr_ref, whz_ref, whn_ref,
               x_ref, hs_ref, wi_scr, wh_scr, whn_scr, h_scr, gi_scr):
    """perm_ref, w*_ref: (H, H) raw parameters.
    x_ref: (Tc, B_pad, H) input chunk;  hs_ref: (Tc, B_pad, H) output chunk.
    wi_scr: (H, 3H), wh_scr: (H, 2H), whn_scr: (H, H)  masked stacked weights.
    h_scr: (B_pad, H) carried hidden state;  gi_scr: (Tc, B_pad, 3H)."""
    Tc, B, H = x_ref.shape

    @pl.when(pl.program_id(0) == 0)
    def _():
        # --- PermutationMatrix.forward(): Sinkhorn + permuted lower mask ---
        m = perm_ref[...].astype(jnp.float32)
        m = jnp.exp(TEMPERATURE * (m - jnp.max(m)))
        for _ in range(SINKHORN_UNROLL):   # fully unrolled, one-shot block
            m = m / jnp.sum(m, axis=1, keepdims=True)
            m = m / jnp.sum(m, axis=0, keepdims=True)
        row = jax.lax.broadcasted_iota(jnp.int32, (H, H), 0)
        col = jax.lax.broadcasted_iota(jnp.int32, (H, H), 1)
        upper = (row <= col).astype(jnp.float32)       # tril(ones).T
        # lower = (m @ tril @ m.T).T == m @ triu @ m.T  (final transpose folded)
        lower = jnp.dot(
            jnp.dot(m, upper, preferred_element_type=jnp.float32), m.T,
            preferred_element_type=jnp.float32)

        # --- mask & stack weights lane-dense, resident for all chunks ---
        wi_scr[:, 0:H]     = wir_ref[...] * lower
        wi_scr[:, H:2 * H] = wiz_ref[...] * lower
        wi_scr[:, 2 * H:]  = win_ref[...] * lower
        wh_scr[:, 0:H]     = whr_ref[...] * lower
        wh_scr[:, H:]      = whz_ref[...] * lower
        whn_scr[...]       = whn_ref[...] * lower
        h_scr[...] = jnp.zeros_like(h_scr)

    # Loop-invariant weights (single-buffered VMEM scratch).
    w_i = wi_scr[...]      # [W_ir | W_iz | W_in] * lower   (H, 3H)
    w_h = wh_scr[...]      # [W_hr | W_hz]        * lower   (H, 2H)
    w_hn = whn_scr[...]    # W_hn                 * lower   (H, H)

    # Input projection for the whole chunk in one MXU pass (independent of h,
    # so it is off the serial recurrence path).
    x_all = x_ref[...].reshape(Tc * B, H)
    gi_scr[...] = jnp.dot(
        x_all, w_i, preferred_element_type=jnp.float32).reshape(Tc, B, 3 * H)

    def step(t, h):
        g_i = gi_scr[t]                                                 # (B, 3H)
        g_h = jnp.dot(h, w_h, preferred_element_type=jnp.float32)       # (B, 2H)
        r_t = jax.nn.sigmoid(g_i[:, :H] + g_h[:, :H])
        z_t = jax.nn.sigmoid(g_i[:, H:2 * H] + g_h[:, H:])
        n_t = jnp.tanh(
            g_i[:, 2 * H:]
            + jnp.dot(r_t * h, w_hn, preferred_element_type=jnp.float32))
        h_new = h * z_t + (1.0 - z_t) * n_t
        hs_ref[t] = h_new.astype(hs_ref.dtype)
        return h_new

    h_scr[...] = jax.lax.fori_loop(0, Tc, step, h_scr[...],
                                   unroll=min(Tc, 8))


def _vmem_estimate_bytes(Tc, B_pad, H):
    w_inputs = 7 * 2 * H * H * 4                 # raw params, double-buffered
    io = 2 * 2 * Tc * B_pad * H * 4              # x chunk + hs chunk, double-buffered
    scratch = (6 * H * H + B_pad * H + Tc * B_pad * 3 * H) * 4
    return w_inputs + io + scratch


def permuted_gru_forward(x, params, *, time_chunk=32):
    """x: (T, B, H) float32. Returns (hidden_states (T,B,H), last_states (B,H))."""
    T, B, H = x.shape

    # --- pad batch to a multiple of 8 sublanes; pick / cap the time chunk ---
    B_pad = max(8, ((B + 7) // 8) * 8)
    Tc = max(1, min(time_chunk, T))
    per_step_bytes = B_pad * H * 4 * (2 * 2 + 3)      # x/hs double-buffers + gi scratch
    Tc = max(1, min(Tc, (12 << 20) // per_step_bytes))
    T_pad = ((T + Tc - 1) // Tc) * Tc
    xp = jnp.pad(x, ((0, T_pad - T), (0, B_pad - B), (0, 0)))
    num_chunks = T_pad // Tc

    weight_spec = pl.BlockSpec((H, H), lambda c: (0, 0))
    x_spec = pl.BlockSpec((Tc, B_pad, H), lambda c: (c, 0, 0))

    est = _vmem_estimate_bytes(Tc, B_pad, H)
    vmem_limit = None
    if est > (16 << 20):   # only raise past the conservative default scoped limit
        vmem_limit = int(min(int(est * 1.25) + (4 << 20), 112 << 20))

    hidden_pad = pl.pallas_call(
        gru_kernel,
        out_shape=jax.ShapeDtypeStruct((T_pad, B_pad, H), jnp.float32),
        grid_spec=pltpu.PrefetchScalarGridSpec(
            num_scalar_prefetch=0,
            grid=(num_chunks,),
            in_specs=[
                weight_spec,   # perm_matrix
                weight_spec,   # W_ir
                weight_spec,   # W_iz
                weight_spec,   # W_in
                weight_spec,   # W_hr
                weight_spec,   # W_hz
                weight_spec,   # W_hn
                x_spec,        # x chunk
            ],
            out_specs=pl.BlockSpec((Tc, B_pad, H), lambda c: (c, 0, 0)),
            scratch_shapes=[
                pltpu.VMEM((H, 3 * H), jnp.float32),          # W_i stacked
                pltpu.VMEM((H, 2 * H), jnp.float32),          # W_h stacked
                pltpu.VMEM((H, H), jnp.float32),              # W_hn
                pltpu.VMEM((B_pad, H), jnp.float32),          # hidden carry
                pltpu.VMEM((Tc, B_pad, 3 * H), jnp.float32),  # input projections
            ],
        ),
        compiler_params=pltpu.CompilerParams(
            dimension_semantics=("arbitrary",),   # sequential recurrence
            vmem_limit_bytes=vmem_limit),
    )(params["perm_matrix"], params["W_ir"], params["W_iz"], params["W_in"],
      params["W_hr"], params["W_hz"], params["W_hn"], xp)

    hidden_states = hidden_pad[:T, :B, :]
    # lengths=None => lengths = [T]*B => last_states = hidden_states[T-1]
    last_states = hidden_states[T - 1]
    return hidden_states, last_states


# ---------------------------------------------------------------------------
# Deterministic parameter init (kaiming_uniform_ with a=sqrt(5) on (H,H)
# => Uniform(-1/sqrt(H), 1/sqrt(H)))
# ---------------------------------------------------------------------------
def init_params(key, hidden_size):
    bound = 1.0 / math.sqrt(hidden_size)
    names = ["perm_matrix", "W_ir", "W_hr", "W_iz", "W_hz", "W_in", "W_hn"]
    keys = jax.random.split(key, len(names))
    return {
        n: jax.random.uniform(k, (hidden_size, hidden_size),
                              dtype=jnp.float32, minval=-bound, maxval=bound)
        for n, k in zip(names, keys)
    }


if __name__ == "__main__":
    T, B, H = 8, 2, 32
    key = jax.random.PRNGKey(0)
    pkey, xkey = jax.random.split(key)

    params = init_params(pkey, H)
    x = jax.random.normal(xkey, (T, B, H), dtype=jnp.float32)

    fwd = jax.jit(functools.partial(permuted_gru_forward, params=params))
    hidden_states, last_states = fwd(x)
    jax.block_until_ready((hidden_states, last_states))

    assert hidden_states.shape == (T, B, H)
    assert last_states.shape == (B, H)
    assert bool(jnp.all(jnp.isfinite(hidden_states)))
    assert bool(jnp.all(last_states == hidden_states[T - 1]))
    print("KERNEL_OK")
</pallas_src>

<mosaic_0001>
module attributes {stable_mosaic.version = 11 : i64} {
  func.func @gru_kernel(%arg0: i32, %arg1: memref<32x32xf32, #tpu.memory_space<vmem>>, %arg2: memref<32x32xf32, #tpu.memory_space<vmem>>, %arg3: memref<32x32xf32, #tpu.memory_space<vmem>>, %arg4: memref<32x32xf32, #tpu.memory_space<vmem>>, %arg5: memref<32x32xf32, #tpu.memory_space<vmem>>, %arg6: memref<32x32xf32, #tpu.memory_space<vmem>>, %arg7: memref<32x32xf32, #tpu.memory_space<vmem>>, %arg8: memref<8x8x32xf32, #tpu.memory_space<vmem>>, %arg9: memref<8x8x32xf32, #tpu.memory_space<vmem>>, %arg10: memref<32x96xf32, #tpu.memory_space<vmem>>, %arg11: memref<32x64xf32, #tpu.memory_space<vmem>>, %arg12: memref<32x32xf32, #tpu.memory_space<vmem>>, %arg13: memref<8x32xf32, #tpu.memory_space<vmem>>, %arg14: memref<8x8x96xf32, #tpu.memory_space<vmem>>) attributes {dimension_semantics = [#tpu.dimension_semantics<arbitrary>], iteration_bounds = array<i64: 1>, scalar_prefetch = 0 : i64, scratch_operands = 5 : i64, tpu.core_type = #tpu.core_type<tc>, window_params = [{pipeline_mode = #tpu.pipeline_mode<synchronous>, transform_indices = @transform_0, window_bounds = array<i64: 32, 32>}, {pipeline_mode = #tpu.pipeline_mode<synchronous>, transform_indices = @transform_1, window_bounds = array<i64: 32, 32>}, {pipeline_mode = #tpu.pipeline_mode<synchronous>, transform_indices = @transform_2, window_bounds = array<i64: 32, 32>}, {pipeline_mode = #tpu.pipeline_mode<synchronous>, transform_indices = @transform_3, window_bounds = array<i64: 32, 32>}, {pipeline_mode = #tpu.pipeline_mode<synchronous>, transform_indices = @transform_4, window_bounds = array<i64: 32, 32>}, {pipeline_mode = #tpu.pipeline_mode<synchronous>, transform_indices = @transform_5, window_bounds = array<i64: 32, 32>}, {pipeline_mode = #tpu.pipeline_mode<synchronous>, transform_indices = @transform_6, window_bounds = array<i64: 32, 32>}, {transform_indices = @transform_7, window_bounds = array<i64: 8, 8, 32>}, {transform_indices = @transform_8, window_bounds = array<i64: 8, 8, 32>}]} {
    %c0_i32 = arith.constant 0 : i32
    %0 = arith.cmpi eq, %arg0, %c0_i32 : i32
    %1 = arith.extui %0 : i1 to i32
    %c0_i32_0 = arith.constant 0 : i32
    %2 = arith.cmpi ne, %1, %c0_i32_0 : i32
    scf.if %2 {
      %c0_89 = arith.constant 0 : index
      %c0_90 = arith.constant 0 : index
      %285 = vector.load %arg1[%c0_89, %c0_90] : memref<32x32xf32, #tpu.memory_space<vmem>>, vector<32x32xf32>
      %286 = vector.shape_cast %285 : vector<32x32xf32> to vector<1x32x32xf32>
      %cst_91 = arith.constant dense<0xFF800000> : vector<1xf32>
      %287 = vector.multi_reduction <maximumf>, %286, %cst_91 [1, 2] : vector<1x32x32xf32> to vector<1xf32>
      %288 = vector.shape_cast %287 : vector<1xf32> to vector<1x1x1xf32>
      %289 = vector.extract %288[0, 0, 0] : f32 from vector<1x1x1xf32>
      %290 = vector.broadcast %289 : f32 to vector<32x32xf32>
      %291 = arith.subf %285, %290 : vector<32x32xf32>
      %cst_92 = arith.constant 1.000000e+02 : f32
      %292 = vector.broadcast %cst_92 : f32 to vector<32x32xf32>
      %293 = arith.mulf %292, %291 : vector<32x32xf32>
      %294 = math.exp %293 : vector<32x32xf32>
      %cst_93 = arith.constant dense<0.000000e+00> : vector<32xf32>
      %295 = vector.multi_reduction <add>, %294, %cst_93 [1] : vector<32x32xf32> to vector<32xf32>
      %296 = vector.shape_cast %295 : vector<32xf32> to vector<32x1xf32>
      %297 = vector.broadcast %296 : vector<32x1xf32> to vector<32x32xf32>
      %298 = arith.divf %294, %297 : vector<32x32xf32>
      %cst_94 = arith.constant dense<0.000000e+00> : vector<32xf32>
      %299 = vector.multi_reduction <add>, %298, %cst_94 [0] : vector<32x32xf32> to vector<32xf32>
      %300 = vector.shape_cast %299 : vector<32xf32> to vector<1x32xf32>
      %301 = vector.broadcast %300 : vector<1x32xf32> to vector<32x32xf32>
      %302 = arith.divf %298, %301 : vector<32x32xf32>
      %cst_95 = arith.constant dense<0.000000e+00> : vector<32xf32>
      %303 = vector.multi_reduction <add>, %302, %cst_95 [1] : vector<32x32xf32> to vector<32xf32>
      %304 = vector.shape_cast %303 : vector<32xf32> to vector<32x1xf32>
      %305 = vector.broadcast %304 : vector<32x1xf32> to vector<32x32xf32>
      %306 = arith.divf %302, %305 : vector<32x32xf32>
      %cst_96 = arith.constant dense<0.000000e+00> : vector<32xf32>
      %307 = vector.multi_reduction <add>, %306, %cst_96 [0] : vector<32x32xf32> to vector<32xf32>
      %308 = vector.shape_cast %307 : vector<32xf32> to vector<1x32xf32>
      %309 = vector.broadcast %308 : vector<1x32xf32> to vector<32x32xf32>
      %310 = arith.divf %306, %309 : vector<32x32xf32>
      %cst_97 = arith.constant dense<0.000000e+00> : vector<32xf32>
      %311 = vector.multi_reduction <add>, %310, %cst_97 [1] : vector<32x32xf32> to vector<32xf32>
      %312 = vector.shape_cast %311 : vector<32xf32> to vector<32x1xf32>
      %313 = vector.broadcast %312 : vector<32x1xf32> to vector<32x32xf32>
      %314 = arith.divf %310, %313 : vector<32x32xf32>
      %cst_98 = arith.constant dense<0.000000e+00> : vector<32xf32>
      %315 = vector.multi_reduction <add>, %314, %cst_98 [0] : vector<32x32xf32> to vector<32xf32>
      %316 = vector.shape_cast %315 : vector<32xf32> to vector<1x32xf32>
      %317 = vector.broadcast %316 : vector<1x32xf32> to vector<32x32xf32>
      %318 = arith.divf %314, %317 : vector<32x32xf32>
      %cst_99 = arith.constant dense<0.000000e+00> : vector<32xf32>
      %319 = vector.multi_reduction <add>, %318, %cst_99 [1] : vector<32x32xf32> to vector<32xf32>
      %320 = vector.shape_cast %319 : vector<32xf32> to vector<32x1xf32>
      %321 = vector.broadcast %320 : vector<32x1xf32> to vector<32x32xf32>
      %322 = arith.divf %318, %321 : vector<32x32xf32>
      %cst_100 = arith.constant dense<0.000000e+00> : vector<32xf32>
      %323 = vector.multi_reduction <add>, %322, %cst_100 [0] : vector<32x32xf32> to vector<32xf32>
      %324 = vector.shape_cast %323 : vector<32xf32> to vector<1x32xf32>
      %325 = vector.broadcast %324 : vector<1x32xf32> to vector<32x32xf32>
      %326 = arith.divf %322, %325 : vector<32x32xf32>
      %cst_101 = arith.constant dense<0.000000e+00> : vector<32xf32>
      %327 = vector.multi_reduction <add>, %326, %cst_101 [1] : vector<32x32xf32> to vector<32xf32>
      %328 = vector.shape_cast %327 : vector<32xf32> to vector<32x1xf32>
      %329 = vector.broadcast %328 : vector<32x1xf32> to vector<32x32xf32>
      %330 = arith.divf %326, %329 : vector<32x32xf32>
      %cst_102 = arith.constant dense<0.000000e+00> : vector<32xf32>
      %331 = vector.multi_reduction <add>, %330, %cst_102 [0] : vector<32x32xf32> to vector<32xf32>
      %332 = vector.shape_cast %331 : vector<32xf32> to vector<1x32xf32>
      %333 = vector.broadcast %332 : vector<1x32xf32> to vector<32x32xf32>
      %334 = arith.divf %330, %333 : vector<32x32xf32>
      %cst_103 = arith.constant dense<0.000000e+00> : vector<32xf32>
      %335 = vector.multi_reduction <add>, %334, %cst_103 [1] : vector<32x32xf32> to vector<32xf32>
      %336 = vector.shape_cast %335 : vector<32xf32> to vector<32x1xf32>
      %337 = vector.broadcast %336 : vector<32x1xf32> to vector<32x32xf32>
      %338 = arith.divf %334, %337 : vector<32x32xf32>
      %cst_104 = arith.constant dense<0.000000e+00> : vector<32xf32>
      %339 = vector.multi_reduction <add>, %338, %cst_104 [0] : vector<32x32xf32> to vector<32xf32>
      %340 = vector.shape_cast %339 : vector<32xf32> to vector<1x32xf32>
      %341 = vector.broadcast %340 : vector<1x32xf32> to vector<32x32xf32>
      %342 = arith.divf %338, %341 : vector<32x32xf32>
      %cst_105 = arith.constant dense<0.000000e+00> : vector<32xf32>
      %343 = vector.multi_reduction <add>, %342, %cst_105 [1] : vector<32x32xf32> to vector<32xf32>
      %344 = vector.shape_cast %343 : vector<32xf32> to vector<32x1xf32>
      %345 = vector.broadcast %344 : vector<32x1xf32> to vector<32x32xf32>
      %346 = arith.divf %342, %345 : vector<32x32xf32>
      %cst_106 = arith.constant dense<0.000000e+00> : vector<32xf32>
      %347 = vector.multi_reduction <add>, %346, %cst_106 [0] : vector<32x32xf32> to vector<32xf32>
      %348 = vector.shape_cast %347 : vector<32xf32> to vector<1x32xf32>
      %349 = vector.broadcast %348 : vector<1x32xf32> to vector<32x32xf32>
      %350 = arith.divf %346, %349 : vector<32x32xf32>
      %cst_107 = arith.constant dense<0.000000e+00> : vector<32xf32>
      %351 = vector.multi_reduction <add>, %350, %cst_107 [1] : vector<32x32xf32> to vector<32xf32>
      %352 = vector.shape_cast %351 : vector<32xf32> to vector<32x1xf32>
      %353 = vector.broadcast %352 : vector<32x1xf32> to vector<32x32xf32>
      %354 = arith.divf %350, %353 : vector<32x32xf32>
      %cst_108 = arith.constant dense<0.000000e+00> : vector<32xf32>
      %355 = vector.multi_reduction <add>, %354, %cst_108 [0] : vector<32x32xf32> to vector<32xf32>
      %356 = vector.shape_cast %355 : vector<32xf32> to vector<1x32xf32>
      %357 = vector.broadcast %356 : vector<1x32xf32> to vector<32x32xf32>
      %358 = arith.divf %354, %357 : vector<32x32xf32>
      %cst_109 = arith.constant dense<0.000000e+00> : vector<32xf32>
      %359 = vector.multi_reduction <add>, %358, %cst_109 [1] : vector<32x32xf32> to vector<32xf32>
      %360 = vector.shape_cast %359 : vector<32xf32> to vector<32x1xf32>
      %361 = vector.broadcast %360 : vector<32x1xf32> to vector<32x32xf32>
      %362 = arith.divf %358, %361 : vector<32x32xf32>
      %cst_110 = arith.constant dense<0.000000e+00> : vector<32xf32>
      %363 = vector.multi_reduction <add>, %362, %cst_110 [0] : vector<32x32xf32> to vector<32xf32>
      %364 = vector.shape_cast %363 : vector<32xf32> to vector<1x32xf32>
      %365 = vector.broadcast %364 : vector<1x32xf32> to vector<32x32xf32>
      %366 = arith.divf %362, %365 : vector<32x32xf32>
      %cst_111 = arith.constant dense<0.000000e+00> : vector<32xf32>
      %367 = vector.multi_reduction <add>, %366, %cst_111 [1] : vector<32x32xf32> to vector<32xf32>
      %368 = vector.shape_cast %367 : vector<32xf32> to vector<32x1xf32>
      %369 = vector.broadcast %368 : vector<32x1xf32> to vector<32x32xf32>
      %370 = arith.divf %366, %369 : vector<32x32xf32>
      %cst_112 = arith.constant dense<0.000000e+00> : vector<32xf32>
      %371 = vector.multi_reduction <add>, %370, %cst_112 [0] : vector<32x32xf32> to vector<32xf32>
      %372 = vector.shape_cast %371 : vector<32xf32> to vector<1x32xf32>
      %373 = vector.broadcast %372 : vector<1x32xf32> to vector<32x32xf32>
      %374 = arith.divf %370, %373 : vector<32x32xf32>
      %cst_113 = arith.constant dense<0.000000e+00> : vector<32xf32>
      %375 = vector.multi_reduction <add>, %374, %cst_113 [1] : vector<32x32xf32> to vector<32xf32>
      %376 = vector.shape_cast %375 : vector<32xf32> to vector<32x1xf32>
      %377 = vector.broadcast %376 : vector<32x1xf32> to vector<32x32xf32>
      %378 = arith.divf %374, %377 : vector<32x32xf32>
      %cst_114 = arith.constant dense<0.000000e+00> : vector<32xf32>
      %379 = vector.multi_reduction <add>, %378, %cst_114 [0] : vector<32x32xf32> to vector<32xf32>
      %380 = vector.shape_cast %379 : vector<32xf32> to vector<1x32xf32>
      %381 = vector.broadcast %380 : vector<1x32xf32> to vector<32x32xf32>
      %382 = arith.divf %378, %381 : vector<32x32xf32>
      %cst_115 = arith.constant dense<0.000000e+00> : vector<32xf32>
      %383 = vector.multi_reduction <add>, %382, %cst_115 [1] : vector<32x32xf32> to vector<32xf32>
      %384 = vector.shape_cast %383 : vector<32xf32> to vector<32x1xf32>
      %385 = vector.broadcast %384 : vector<32x1xf32> to vector<32x32xf32>
      %386 = arith.divf %382, %385 : vector<32x32xf32>
      %cst_116 = arith.constant dense<0.000000e+00> : vector<32xf32>
      %387 = vector.multi_reduction <add>, %386, %cst_116 [0] : vector<32x32xf32> to vector<32xf32>
      %388 = vector.shape_cast %387 : vector<32xf32> to vector<1x32xf32>
      %389 = vector.broadcast %388 : vector<1x32xf32> to vector<32x32xf32>
      %390 = arith.divf %386, %389 : vector<32x32xf32>
      %cst_117 = arith.constant dense<0.000000e+00> : vector<32xf32>
      %391 = vector.multi_reduction <add>, %390, %cst_117 [1] : vector<32x32xf32> to vector<32xf32>
      %392 = vector.shape_cast %391 : vector<32xf32> to vector<32x1xf32>
      %393 = vector.broadcast %392 : vector<32x1xf32> to vector<32x32xf32>
      %394 = arith.divf %390, %393 : vector<32x32xf32>
      %cst_118 = arith.constant dense<0.000000e+00> : vector<32xf32>
      %395 = vector.multi_reduction <add>, %394, %cst_118 [0] : vector<32x32xf32> to vector<32xf32>
      %396 = vector.shape_cast %395 : vector<32xf32> to vector<1x32xf32>
      %397 = vector.broadcast %396 : vector<1x32xf32> to vector<32x32xf32>
      %398 = arith.divf %394, %397 : vector<32x32xf32>
      %cst_119 = arith.constant dense<0.000000e+00> : vector<32xf32>
      %399 = vector.multi_reduction <add>, %398, %cst_119 [1] : vector<32x32xf32> to vector<32xf32>
      %400 = vector.shape_cast %399 : vector<32xf32> to vector<32x1xf32>
      %401 = vector.broadcast %400 : vector<32x1xf32> to vector<32x32xf32>
      %402 = arith.divf %398, %401 : vector<32x32xf32>
      %cst_120 = arith.constant dense<0.000000e+00> : vector<32xf32>
      %403 = vector.multi_reduction <add>, %402, %cst_120 [0] : vector<32x32xf32> to vector<32xf32>
      %404 = vector.shape_cast %403 : vector<32xf32> to vector<1x32xf32>
      %405 = vector.broadcast %404 : vector<1x32xf32> to vector<32x32xf32>
      %406 = arith.divf %402, %405 : vector<32x32xf32>
      %cst_121 = arith.constant dense<0.000000e+00> : vector<32xf32>
      %407 = vector.multi_reduction <add>, %406, %cst_121 [1] : vector<32x32xf32> to vector<32xf32>
      %408 = vector.shape_cast %407 : vector<32xf32> to vector<32x1xf32>
      %409 = vector.broadcast %408 : vector<32x1xf32> to vector<32x32xf32>
      %410 = arith.divf %406, %409 : vector<32x32xf32>
      %cst_122 = arith.constant dense<0.000000e+00> : vector<32xf32>
      %411 = vector.multi_reduction <add>, %410, %cst_122 [0] : vector<32x32xf32> to vector<32xf32>
      %412 = vector.shape_cast %411 : vector<32xf32> to vector<1x32xf32>
      %413 = vector.broadcast %412 : vector<1x32xf32> to vector<32x32xf32>
      %414 = arith.divf %410, %413 : vector<32x32xf32>
      %cst_123 = arith.constant dense<0.000000e+00> : vector<32xf32>
      %415 = vector.multi_reduction <add>, %414, %cst_123 [1] : vector<32x32xf32> to vector<32xf32>
      %416 = vector.shape_cast %415 : vector<32xf32> to vector<32x1xf32>
      %417 = vector.broadcast %416 : vector<32x1xf32> to vector<32x32xf32>
      %418 = arith.divf %414, %417 : vector<32x32xf32>
      %cst_124 = arith.constant dense<0.000000e+00> : vector<32xf32>
      %419 = vector.multi_reduction <add>, %418, %cst_124 [0] : vector<32x32xf32> to vector<32xf32>
      %420 = vector.shape_cast %419 : vector<32xf32> to vector<1x32xf32>
      %421 = vector.broadcast %420 : vector<1x32xf32> to vector<32x32xf32>
      %422 = arith.divf %418, %421 : vector<32x32xf32>
      %cst_125 = arith.constant dense<0.000000e+00> : vector<32xf32>
      %423 = vector.multi_reduction <add>, %422, %cst_125 [1] : vector<32x32xf32> to vector<32xf32>
      %424 = vector.shape_cast %423 : vector<32xf32> to vector<32x1xf32>
      %425 = vector.broadcast %424 : vector<32x1xf32> to vector<32x32xf32>
      %426 = arith.divf %422, %425 : vector<32x32xf32>
      %cst_126 = arith.constant dense<0.000000e+00> : vector<32xf32>
      %427 = vector.multi_reduction <add>, %426, %cst_126 [0] : vector<32x32xf32> to vector<32xf32>
      %428 = vector.shape_cast %427 : vector<32xf32> to vector<1x32xf32>
      %429 = vector.broadcast %428 : vector<1x32xf32> to vector<32x32xf32>
      %430 = arith.divf %426, %429 : vector<32x32xf32>
      %cst_127 = arith.constant dense<0.000000e+00> : vector<32xf32>
      %431 = vector.multi_reduction <add>, %430, %cst_127 [1] : vector<32x32xf32> to vector<32xf32>
      %432 = vector.shape_cast %431 : vector<32xf32> to vector<32x1xf32>
      %433 = vector.broadcast %432 : vector<32x1xf32> to vector<32x32xf32>
      %434 = arith.divf %430, %433 : vector<32x32xf32>
      %cst_128 = arith.constant dense<0.000000e+00> : vector<32xf32>
      %435 = vector.multi_reduction <add>, %434, %cst_128 [0] : vector<32x32xf32> to vector<32xf32>
      %436 = vector.shape_cast %435 : vector<32xf32> to vector<1x32xf32>
      %437 = vector.broadcast %436 : vector<1x32xf32> to vector<32x32xf32>
      %438 = arith.divf %434, %437 : vector<32x32xf32>
      %cst_129 = arith.constant dense<0.000000e+00> : vector<32xf32>
      %439 = vector.multi_reduction <add>, %438, %cst_129 [1] : vector<32x32xf32> to vector<32xf32>
      %440 = vector.shape_cast %439 : vector<32xf32> to vector<32x1xf32>
      %441 = vector.broadcast %440 : vector<32x1xf32> to vector<32x32xf32>
      %442 = arith.divf %438, %441 : vector<32x32xf32>
      %cst_130 = arith.constant dense<0.000000e+00> : vector<32xf32>
      %443 = vector.multi_reduction <add>, %442, %cst_130 [0] : vector<32x32xf32> to vector<32xf32>
      %444 = vector.shape_cast %443 : vector<32xf32> to vector<1x32xf32>
      %445 = vector.broadcast %444 : vector<1x32xf32> to vector<32x32xf32>
      %446 = arith.divf %442, %445 : vector<32x32xf32>
      %cst_131 = arith.constant dense<0.000000e+00> : vector<32xf32>
      %447 = vector.multi_reduction <add>, %446, %cst_131 [1] : vector<32x32xf32> to vector<32xf32>
      %448 = vector.shape_cast %447 : vector<32xf32> to vector<32x1xf32>
      %449 = vector.broadcast %448 : vector<32x1xf32> to vector<32x32xf32>
      %450 = arith.divf %446, %449 : vector<32x32xf32>
      %cst_132 = arith.constant dense<0.000000e+00> : vector<32xf32>
      %451 = vector.multi_reduction <add>, %450, %cst_132 [0] : vector<32x32xf32> to vector<32xf32>
      %452 = vector.shape_cast %451 : vector<32xf32> to vector<1x32xf32>
      %453 = vector.broadcast %452 : vector<1x32xf32> to vector<32x32xf32>
      %454 = arith.divf %450, %453 : vector<32x32xf32>
      %455 = tpu.iota {dimensions = array<i32: 0>} : vector<32x32xi32>
      %456 = tpu.iota {dimensions = array<i32: 1>} : vector<32x32xi32>
      %457 = arith.cmpi sle, %455, %456 : vector<32x32xi32>
      %458 = arith.extui %457 : vector<32x32xi1> to vector<32x32xi32>
      %459 = arith.sitofp %458 : vector<32x32xi32> to vector<32x32xf32>
      %cst_133 = arith.constant dense<0.000000e+00> : vector<32x32xf32>
      %460 = tpu.matmul %454, %459, %cst_133 {dimension_numbers = #tpu.dot_dimension_numbers<[1], [0], [0], [1], [0, 0, 1, 1], [], []>} : vector<32x32xf32>, vector<32x32xf32>, vector<32x32xf32> -> vector<32x32xf32>
      %461 = tpu.transpose %454, [1, 0] : vector<32x32xf32> -> vector<32x32xf32>
      %cst_134 = arith.constant dense<0.000000e+00> : vector<32x32xf32>
      %462 = tpu.matmul %460, %461, %cst_134 {dimension_numbers = #tpu.dot_dimension_numbers<[1], [0], [0], [1], [0, 0, 1, 1], [], []>} : vector<32x32xf32>, vector<32x32xf32>, vector<32x32xf32> -> vector<32x32xf32>
      %c0_135 = arith.constant 0 : index
      %c0_136 = arith.constant 0 : index
      %463 = vector.load %arg2[%c0_135, %c0_136] : memref<32x32xf32, #tpu.memory_space<vmem>>, vector<32x32xf32>
      %464 = arith.mulf %463, %462 : vector<32x32xf32>
      %c0_137 = arith.constant 0 : index
      %c0_138 = arith.constant 0 : index
      %465 = vector.load %arg10[%c0_137, %c0_138] : memref<32x96xf32, #tpu.memory_space<vmem>>, vector<32x32xf32>
      tpu.vector_store %arg10[%c0_137, %c0_138], %464 {strides = array<i32>} : memref<32x96xf32, #tpu.memory_space<vmem>>, vector<32x32xf32>,
      %c0_139 = arith.constant 0 : index
      %c0_140 = arith.constant 0 : index
      %466 = vector.load %arg3[%c0_139, %c0_140] : memref<32x32xf32, #tpu.memory_space<vmem>>, vector<32x32xf32>
      %467 = arith.mulf %466, %462 : vector<32x32xf32>
      %c0_141 = arith.constant 0 : index
      %c32 = arith.constant 32 : index
      %468 = vector.load %arg10[%c0_141, %c32] : memref<32x96xf32, #tpu.memory_space<vmem>>, vector<32x32xf32>
      tpu.vector_store %arg10[%c0_141, %c32], %467 {strides = array<i32>} : memref<32x96xf32, #tpu.memory_space<vmem>>, vector<32x32xf32>,
      %c0_142 = arith.constant 0 : index
      %c0_143 = arith.constant 0 : index
      %469 = vector.load %arg4[%c0_142, %c0_143] : memref<32x32xf32, #tpu.memory_space<vmem>>, vector<32x32xf32>
      %470 = arith.mulf %469, %462 : vector<32x32xf32>
      %c0_144 = arith.constant 0 : index
      %c64 = arith.constant 64 : index
      %471 = vector.load %arg10[%c0_144, %c64] : memref<32x96xf32, #tpu.memory_space<vmem>>, vector<32x32xf32>
      tpu.vector_store %arg10[%c0_144, %c64], %470 {strides = array<i32>} : memref<32x96xf32, #tpu.memory_space<vmem>>, vector<32x32xf32>,
      %c0_145 = arith.constant 0 : index
      %c0_146 = arith.constant 0 : index
      %472 = vector.load %arg5[%c0_145, %c0_146] : memref<32x32xf32, #tpu.memory_space<vmem>>, vector<32x32xf32>
      %473 = arith.mulf %472, %462 : vector<32x32xf32>
      %c0_147 = arith.constant 0 : index
      %c0_148 = arith.constant 0 : index
      %474 = vector.load %arg11[%c0_147, %c0_148] : memref<32x64xf32, #tpu.memory_space<vmem>>, vector<32x32xf32>
      tpu.vector_store %arg11[%c0_147, %c0_148], %473 {strides = array<i32>} : memref<32x64xf32, #tpu.memory_space<vmem>>, vector<32x32xf32>,
      %c0_149 = arith.constant 0 : index
      %c0_150 = arith.constant 0 : index
      %475 = vector.load %arg6[%c0_149, %c0_150] : memref<32x32xf32, #tpu.memory_space<vmem>>, vector<32x32xf32>
      %476 = arith.mulf %475, %462 : vector<32x32xf32>
      %c0_151 = arith.constant 0 : index
      %c32_152 = arith.constant 32 : index
      %477 = vector.load %arg11[%c0_151, %c32_152] : memref<32x64xf32, #tpu.memory_space<vmem>>, vector<32x32xf32>
      tpu.vector_store %arg11[%c0_151, %c32_152], %476 {strides = array<i32>} : memref<32x64xf32, #tpu.memory_space<vmem>>, vector<32x32xf32>,
      %c0_153 = arith.constant 0 : index
      %c0_154 = arith.constant 0 : index
      %478 = vector.load %arg7[%c0_153, %c0_154] : memref<32x32xf32, #tpu.memory_space<vmem>>, vector<32x32xf32>
      %479 = arith.mulf %478, %462 : vector<32x32xf32>
      %c0_155 = arith.constant 0 : index
      %c0_156 = arith.constant 0 : index
      %480 = vector.load %arg12[%c0_155, %c0_156] : memref<32x32xf32, #tpu.memory_space<vmem>>, vector<32x32xf32>
      tpu.vector_store %arg12[%c0_155, %c0_156], %479 {strides = array<i32>} : memref<32x32xf32, #tpu.memory_space<vmem>>, vector<32x32xf32>,
      %cst_157 = arith.constant 0.000000e+00 : f32
      %481 = vector.broadcast %cst_157 : f32 to vector<8x32xf32>
      %c0_158 = arith.constant 0 : index
      %c0_159 = arith.constant 0 : index
      %482 = vector.load %arg13[%c0_158, %c0_159] : memref<8x32xf32, #tpu.memory_space<vmem>>, vector<8x32xf32>
      tpu.vector_store %arg13[%c0_158, %c0_159], %481 {strides = array<i32>} : memref<8x32xf32, #tpu.memory_space<vmem>>, vector<8x32xf32>,
    } else {
    }
    %c0 = arith.constant 0 : index
    %c0_1 = arith.constant 0 : index
    %3 = vector.load %arg10[%c0, %c0_1] : memref<32x96xf32, #tpu.memory_space<vmem>>, vector<32x96xf32>
    %c0_2 = arith.constant 0 : index
    %c0_3 = arith.constant 0 : index
    %4 = vector.load %arg11[%c0_2, %c0_3] : memref<32x64xf32, #tpu.memory_space<vmem>>, vector<32x64xf32>
    %c0_4 = arith.constant 0 : index
    %c0_5 = arith.constant 0 : index
    %5 = vector.load %arg12[%c0_4, %c0_5] : memref<32x32xf32, #tpu.memory_space<vmem>>, vector<32x32xf32>
    %c0_6 = arith.constant 0 : index
    %c0_7 = arith.constant 0 : index
    %c0_8 = arith.constant 0 : index
    %6 = vector.load %arg8[%c0_6, %c0_7, %c0_8] : memref<8x8x32xf32, #tpu.memory_space<vmem>>, vector<8x8x32xf32>
    %7 = vector.shape_cast %6 : vector<8x8x32xf32> to vector<64x32xf32>
    %cst = arith.constant dense<0.000000e+00> : vector<64x96xf32>
    %8 = tpu.matmul %7, %3, %cst {dimension_numbers = #tpu.dot_dimension_numbers<[1], [0], [0], [1], [0, 0, 1, 1], [], []>} : vector<64x32xf32>, vector<32x96xf32>, vector<64x96xf32> -> vector<64x96xf32>
    %9 = vector.shape_cast %8 : vector<64x96xf32> to vector<8x8x96xf32>
    %c0_9 = arith.constant 0 : index
    %c0_10 = arith.constant 0 : index
    %c0_11 = arith.constant 0 : index
    %10 = vector.load %arg14[%c0_9, %c0_10, %c0_11] : memref<8x8x96xf32, #tpu.memory_space<vmem>>, vector<8x8x96xf32>
    tpu.vector_store %arg14[%c0_9, %c0_10, %c0_11], %9 {strides = array<i32>} : memref<8x8x96xf32, #tpu.memory_space<vmem>>, vector<8x8x96xf32>,
    %c0_12 = arith.constant 0 : index
    %c0_13 = arith.constant 0 : index
    %11 = vector.load %arg13[%c0_12, %c0_13] : memref<8x32xf32, #tpu.memory_space<vmem>>, vector<8x32xf32>
    %c0_i32_14 = arith.constant 0 : i32
    %12 = arith.index_cast %c0_i32_14 : i32 to index
    %c0_15 = arith.constant 0 : index
    %c0_16 = arith.constant 0 : index
    %13 = vector.load %arg14[%12, %c0_15, %c0_16] : memref<8x8x96xf32, #tpu.memory_space<vmem>>, vector<1x8x96xf32>
    %14 = vector.shape_cast %13 : vector<1x8x96xf32> to vector<8x96xf32>
    %cst_17 = arith.constant dense<0.000000e+00> : vector<8x64xf32>
    %15 = tpu.matmul %11, %4, %cst_17 {dimension_numbers = #tpu.dot_dimension_numbers<[1], [0], [0], [1], [0, 0, 1, 1], [], []>} : vector<8x32xf32>, vector<32x64xf32>, vector<8x64xf32> -> vector<8x64xf32>
    %16 = vector.extract_strided_slice %14 {offsets = [0, 0], sizes = [8, 32], strides = [1, 1]} : vector<8x96xf32> to vector<8x32xf32>
    %17 = vector.extract_strided_slice %15 {offsets = [0, 0], sizes = [8, 32], strides = [1, 1]} : vector<8x64xf32> to vector<8x32xf32>
    %18 = arith.addf %16, %17 : vector<8x32xf32>
    %19 = arith.negf %18 : vector<8x32xf32>
    %20 = math.exp %19 : vector<8x32xf32>
    %cst_18 = arith.constant 1.000000e+00 : f32
    %21 = vector.broadcast %cst_18 : f32 to vector<8x32xf32>
    %22 = arith.addf %21, %20 : vector<8x32xf32>
    %23 = arith.divf %21, %22 : vector<8x32xf32>
    %24 = vector.extract_strided_slice %14 {offsets = [0, 32], sizes = [8, 32], strides = [1, 1]} : vector<8x96xf32> to vector<8x32xf32>
    %25 = vector.extract_strided_slice %15 {offsets = [0, 32], sizes = [8, 32], strides = [1, 1]} : vector<8x64xf32> to vector<8x32xf32>
    %26 = arith.addf %24, %25 : vector<8x32xf32>
    %27 = arith.negf %26 : vector<8x32xf32>
    %28 = math.exp %27 : vector<8x32xf32>
    %cst_19 = arith.constant 1.000000e+00 : f32
    %29 = vector.broadcast %cst_19 : f32 to vector<8x32xf32>
    %30 = arith.addf %29, %28 : vector<8x32xf32>
    %31 = arith.divf %29, %30 : vector<8x32xf32>
    %32 = vector.extract_strided_slice %14 {offsets = [0, 64], sizes = [8, 32], strides = [1, 1]} : vector<8x96xf32> to vector<8x32xf32>
    %33 = arith.mulf %23, %11 : vector<8x32xf32>
    %cst_20 = arith.constant dense<0.000000e+00> : vector<8x32xf32>
    %34 = tpu.matmul %33, %5, %cst_20 {dimension_numbers = #tpu.dot_dimension_numbers<[1], [0], [0], [1], [0, 0, 1, 1], [], []>} : vector<8x32xf32>, vector<32x32xf32>, vector<8x32xf32> -> vector<8x32xf32>
    %35 = arith.addf %32, %34 : vector<8x32xf32>
    %36 = math.tanh %35 : vector<8x32xf32>
    %37 = arith.mulf %11, %31 : vector<8x32xf32>
    %cst_21 = arith.constant 1.000000e+00 : f32
    %38 = vector.broadcast %cst_21 : f32 to vector<8x32xf32>
    %39 = arith.subf %38, %31 : vector<8x32xf32>
    %40 = arith.mulf %39, %36 : vector<8x32xf32>
    %41 = arith.addf %37, %40 : vector<8x32xf32>
    %42 = arith.index_cast %c0_i32_14 : i32 to index
    %c0_22 = arith.constant 0 : index
    %c0_23 = arith.constant 0 : index
    %43 = vector.load %arg9[%42, %c0_22, %c0_23] : memref<8x8x32xf32, #tpu.memory_space<vmem>>, vector<1x8x32xf32>
    %44 = vector.shape_cast %43 : vector<1x8x32xf32> to vector<8x32xf32>
    %45 = vector.shape_cast %41 : vector<8x32xf32> to vector<1x8x32xf32>
    tpu.vector_store %arg9[%42, %c0_22, %c0_23], %45 {strides = array<i32>} : memref<8x8x32xf32, #tpu.memory_space<vmem>>, vector<1x8x32xf32>,
    %c1_i32 = arith.constant 1 : i32
    %46 = arith.index_cast %c1_i32 : i32 to index
    %c0_24 = arith.constant 0 : index
    %c0_25 = arith.constant 0 : index
    %47 = vector.load %arg14[%46, %c0_24, %c0_25] : memref<8x8x96xf32, #tpu.memory_space<vmem>>, vector<1x8x96xf32>
    %48 = vector.shape_cast %47 : vector<1x8x96xf32> to vector<8x96xf32>
    %cst_26 = arith.constant dense<0.000000e+00> : vector<8x64xf32>
    %49 = tpu.matmul %41, %4, %cst_26 {dimension_numbers = #tpu.dot_dimension_numbers<[1], [0], [0], [1], [0, 0, 1, 1], [], []>} : vector<8x32xf32>, vector<32x64xf32>, vector<8x64xf32> -> vector<8x64xf32>
    %50 = vector.extract_strided_slice %48 {offsets = [0, 0], sizes = [8, 32], strides = [1, 1]} : vector<8x96xf32> to vector<8x32xf32>
    %51 = vector.extract_strided_slice %49 {offsets = [0, 0], sizes = [8, 32], strides = [1, 1]} : vector<8x64xf32> to vector<8x32xf32>
    %52 = arith.addf %50, %51 : vector<8x32xf32>
    %53 = arith.negf %52 : vector<8x32xf32>
    %54 = math.exp %53 : vector<8x32xf32>
    %cst_27 = arith.constant 1.000000e+00 : f32
    %55 = vector.broadcast %cst_27 : f32 to vector<8x32xf32>
    %56 = arith.addf %55, %54 : vector<8x32xf32>
    %57 = arith.divf %55, %56 : vector<8x32xf32>
    %58 = vector.extract_strided_slice %48 {offsets = [0, 32], sizes = [8, 32], strides = [1, 1]} : vector<8x96xf32> to vector<8x32xf32>
    %59 = vector.extract_strided_slice %49 {offsets = [0, 32], sizes = [8, 32], strides = [1, 1]} : vector<8x64xf32> to vector<8x32xf32>
    %60 = arith.addf %58, %59 : vector<8x32xf32>
    %61 = arith.negf %60 : vector<8x32xf32>
    %62 = math.exp %61 : vector<8x32xf32>
    %cst_28 = arith.constant 1.000000e+00 : f32
    %63 = vector.broadcast %cst_28 : f32 to vector<8x32xf32>
    %64 = arith.addf %63, %62 : vector<8x32xf32>
    %65 = arith.divf %63, %64 : vector<8x32xf32>
    %66 = vector.extract_strided_slice %48 {offsets = [0, 64], sizes = [8, 32], strides = [1, 1]} : vector<8x96xf32> to vector<8x32xf32>
    %67 = arith.mulf %57, %41 : vector<8x32xf32>
    %cst_29 = arith.constant dense<0.000000e+00> : vector<8x32xf32>
    %68 = tpu.matmul %67, %5, %cst_29 {dimension_numbers = #tpu.dot_dimension_numbers<[1], [0], [0], [1], [0, 0, 1, 1], [], []>} : vector<8x32xf32>, vector<32x32xf32>, vector<8x32xf32> -> vector<8x32xf32>
    %69 = arith.addf %66, %68 : vector<8x32xf32>
    %70 = math.tanh %69 : vector<8x32xf32>
    %71 = arith.mulf %41, %65 : vector<8x32xf32>
    %cst_30 = arith.constant 1.000000e+00 : f32
    %72 = vector.broadcast %cst_30 : f32 to vector<8x32xf32>
    %73 = arith.subf %72, %65 : vector<8x32xf32>
    %74 = arith.mulf %73, %70 : vector<8x32xf32>
    %75 = arith.addf %71, %74 : vector<8x32xf32>
    %76 = arith.index_cast %c1_i32 : i32 to index
    %c0_31 = arith.constant 0 : index
    %c0_32 = arith.constant 0 : index
    %77 = vector.load %arg9[%76, %c0_31, %c0_32] : memref<8x8x32xf32, #tpu.memory_space<vmem>>, vector<1x8x32xf32>
    %78 = vector.shape_cast %77 : vector<1x8x32xf32> to vector<8x32xf32>
    %79 = vector.shape_cast %75 : vector<8x32xf32> to vector<1x8x32xf32>
    tpu.vector_store %arg9[%76, %c0_31, %c0_32], %79 {strides = array<i32>} : memref<8x8x32xf32, #tpu.memory_space<vmem>>, vector<1x8x32xf32>,
    %c2_i32 = arith.constant 2 : i32
    %80 = arith.index_cast %c2_i32 : i32 to index
    %c0_33 = arith.constant 0 : index
    %c0_34 = arith.constant 0 : index
    %81 = vector.load %arg14[%80, %c0_33, %c0_34] : memref<8x8x96xf32, #tpu.memory_space<vmem>>, vector<1x8x96xf32>
    %82 = vector.shape_cast %81 : vector<1x8x96xf32> to vector<8x96xf32>
    %cst_35 = arith.constant dense<0.000000e+00> : vector<8x64xf32>
    %83 = tpu.matmul %75, %4, %cst_35 {dimension_numbers = #tpu.dot_dimension_numbers<[1], [0], [0], [1], [0, 0, 1, 1], [], []>} : vector<8x32xf32>, vector<32x64xf32>, vector<8x64xf32> -> vector<8x64xf32>
    %84 = vector.extract_strided_slice %82 {offsets = [0, 0], sizes = [8, 32], strides = [1, 1]} : vector<8x96xf32> to vector<8x32xf32>
    %85 = vector.extract_strided_slice %83 {offsets = [0, 0], sizes = [8, 32], strides = [1, 1]} : vector<8x64xf32> to vector<8x32xf32>
    %86 = arith.addf %84, %85 : vector<8x32xf32>
    %87 = arith.negf %86 : vector<8x32xf32>
    %88 = math.exp %87 : vector<8x32xf32>
    %cst_36 = arith.constant 1.000000e+00 : f32
    %89 = vector.broadcast %cst_36 : f32 to vector<8x32xf32>
    %90 = arith.addf %89, %88 : vector<8x32xf32>
    %91 = arith.divf %89, %90 : vector<8x32xf32>
    %92 = vector.extract_strided_slice %82 {offsets = [0, 32], sizes = [8, 32], strides = [1, 1]} : vector<8x96xf32> to vector<8x32xf32>
    %93 = vector.extract_strided_slice %83 {offsets = [0, 32], sizes = [8, 32], strides = [1, 1]} : vector<8x64xf32> to vector<8x32xf32>
    %94 = arith.addf %92, %93 : vector<8x32xf32>
    %95 = arith.negf %94 : vector<8x32xf32>
    %96 = math.exp %95 : vector<8x32xf32>
    %cst_37 = arith.constant 1.000000e+00 : f32
    %97 = vector.broadcast %cst_37 : f32 to vector<8x32xf32>
    %98 = arith.addf %97, %96 : vector<8x32xf32>
    %99 = arith.divf %97, %98 : vector<8x32xf32>
    %100 = vector.extract_strided_slice %82 {offsets = [0, 64], sizes = [8, 32], strides = [1, 1]} : vector<8x96xf32> to vector<8x32xf32>
    %101 = arith.mulf %91, %75 : vector<8x32xf32>
    %cst_38 = arith.constant dense<0.000000e+00> : vector<8x32xf32>
    %102 = tpu.matmul %101, %5, %cst_38 {dimension_numbers = #tpu.dot_dimension_numbers<[1], [0], [0], [1], [0, 0, 1, 1], [], []>} : vector<8x32xf32>, vector<32x32xf32>, vector<8x32xf32> -> vector<8x32xf32>
    %103 = arith.addf %100, %102 : vector<8x32xf32>
    %104 = math.tanh %103 : vector<8x32xf32>
    %105 = arith.mulf %75, %99 : vector<8x32xf32>
    %cst_39 = arith.constant 1.000000e+00 : f32
    %106 = vector.broadcast %cst_39 : f32 to vector<8x32xf32>
    %107 = arith.subf %106, %99 : vector<8x32xf32>
    %108 = arith.mulf %107, %104 : vector<8x32xf32>
    %109 = arith.addf %105, %108 : vector<8x32xf32>
    %110 = arith.index_cast %c2_i32 : i32 to index
    %c0_40 = arith.constant 0 : index
    %c0_41 = arith.constant 0 : index
    %111 = vector.load %arg9[%110, %c0_40, %c0_41] : memref<8x8x32xf32, #tpu.memory_space<vmem>>, vector<1x8x32xf32>
    %112 = vector.shape_cast %111 : vector<1x8x32xf32> to vector<8x32xf32>
    %113 = vector.shape_cast %109 : vector<8x32xf32> to vector<1x8x32xf32>
    tpu.vector_store %arg9[%110, %c0_40, %c0_41], %113 {strides = array<i32>} : memref<8x8x32xf32, #tpu.memory_space<vmem>>, vector<1x8x32xf32>,
    %c3_i32 = arith.constant 3 : i32
    %114 = arith.index_cast %c3_i32 : i32 to index
    %c0_42 = arith.constant 0 : index
    %c0_43 = arith.constant 0 : index
    %115 = vector.load %arg14[%114, %c0_42, %c0_43] : memref<8x8x96xf32, #tpu.memory_space<vmem>>, vector<1x8x96xf32>
    %116 = vector.shape_cast %115 : vector<1x8x96xf32> to vector<8x96xf32>
    %cst_44 = arith.constant dense<0.000000e+00> : vector<8x64xf32>
    %117 = tpu.matmul %109, %4, %cst_44 {dimension_numbers = #tpu.dot_dimension_numbers<[1], [0], [0], [1], [0, 0, 1, 1], [], []>} : vector<8x32xf32>, vector<32x64xf32>, vector<8x64xf32> -> vector<8x64xf32>
    %118 = vector.extract_strided_slice %116 {offsets = [0, 0], sizes = [8, 32], strides = [1, 1]} : vector<8x96xf32> to vector<8x32xf32>
    %119 = vector.extract_strided_slice %117 {offsets = [0, 0], sizes = [8, 32], strides = [1, 1]} : vector<8x64xf32> to vector<8x32xf32>
    %120 = arith.addf %118, %119 : vector<8x32xf32>
    %121 = arith.negf %120 : vector<8x32xf32>
    %122 = math.exp %121 : vector<8x32xf32>
    %cst_45 = arith.constant 1.000000e+00 : f32
    %123 = vector.broadcast %cst_45 : f32 to vector<8x32xf32>
    %124 = arith.addf %123, %122 : vector<8x32xf32>
    %125 = arith.divf %123, %124 : vector<8x32xf32>
    %126 = vector.extract_strided_slice %116 {offsets = [0, 32], sizes = [8, 32], strides = [1, 1]} : vector<8x96xf32> to vector<8x32xf32>
    %127 = vector.extract_strided_slice %117 {offsets = [0, 32], sizes = [8, 32], strides = [1, 1]} : vector<8x64xf32> to vector<8x32xf32>
    %128 = arith.addf %126, %127 : vector<8x32xf32>
    %129 = arith.negf %128 : vector<8x32xf32>
    %130 = math.exp %129 : vector<8x32xf32>
    %cst_46 = arith.constant 1.000000e+00 : f32
    %131 = vector.broadcast %cst_46 : f32 to vector<8x32xf32>
    %132 = arith.addf %131, %130 : vector<8x32xf32>
    %133 = arith.divf %131, %132 : vector<8x32xf32>
    %134 = vector.extract_strided_slice %116 {offsets = [0, 64], sizes = [8, 32], strides = [1, 1]} : vector<8x96xf32> to vector<8x32xf32>
    %135 = arith.mulf %125, %109 : vector<8x32xf32>
    %cst_47 = arith.constant dense<0.000000e+00> : vector<8x32xf32>
    %136 = tpu.matmul %135, %5, %cst_47 {dimension_numbers = #tpu.dot_dimension_numbers<[1], [0], [0], [1], [0, 0, 1, 1], [], []>} : vector<8x32xf32>, vector<32x32xf32>, vector<8x32xf32> -> vector<8x32xf32>
    %137 = arith.addf %134, %136 : vector<8x32xf32>
    %138 = math.tanh %137 : vector<8x32xf32>
    %139 = arith.mulf %109, %133 : vector<8x32xf32>
    %cst_48 = arith.constant 1.000000e+00 : f32
    %140 = vector.broadcast %cst_48 : f32 to vector<8x32xf32>
    %141 = arith.subf %140, %133 : vector<8x32xf32>
    %142 = arith.mulf %141, %138 : vector<8x32xf32>
    %143 = arith.addf %139, %142 : vector<8x32xf32>
    %144 = arith.index_cast %c3_i32 : i32 to index
    %c0_49 = arith.constant 0 : index
    %c0_50 = arith.constant 0 : index
    %145 = vector.load %arg9[%144, %c0_49, %c0_50] : memref<8x8x32xf32, #tpu.memory_space<vmem>>, vector<1x8x32xf32>
    %146 = vector.shape_cast %145 : vector<1x8x32xf32> to vector<8x32xf32>
    %147 = vector.shape_cast %143 : vector<8x32xf32> to vector<1x8x32xf32>
    tpu.vector_store %arg9[%144, %c0_49, %c0_50], %147 {strides = array<i32>} : memref<8x8x32xf32, #tpu.memory_space<vmem>>, vector<1x8x32xf32>,
    %c4_i32 = arith.constant 4 : i32
    %148 = arith.index_cast %c4_i32 : i32 to index
    %c0_51 = arith.constant 0 : index
    %c0_52 = arith.constant 0 : index
    %149 = vector.load %arg14[%148, %c0_51, %c0_52] : memref<8x8x96xf32, #tpu.memory_space<vmem>>, vector<1x8x96xf32>
    %150 = vector.shape_cast %149 : vector<1x8x96xf32> to vector<8x96xf32>
    %cst_53 = arith.constant dense<0.000000e+00> : vector<8x64xf32>
    %151 = tpu.matmul %143, %4, %cst_53 {dimension_numbers = #tpu.dot_dimension_numbers<[1], [0], [0], [1], [0, 0, 1, 1], [], []>} : vector<8x32xf32>, vector<32x64xf32>, vector<8x64xf32> -> vector<8x64xf32>
    %152 = vector.extract_strided_slice %150 {offsets = [0, 0], sizes = [8, 32], strides = [1, 1]} : vector<8x96xf32> to vector<8x32xf32>
    %153 = vector.extract_strided_slice %151 {offsets = [0, 0], sizes = [8, 32], strides = [1, 1]} : vector<8x64xf32> to vector<8x32xf32>
    %154 = arith.addf %152, %153 : vector<8x32xf32>
    %155 = arith.negf %154 : vector<8x32xf32>
    %156 = math.exp %155 : vector<8x32xf32>
    %cst_54 = arith.constant 1.000000e+00 : f32
    %157 = vector.broadcast %cst_54 : f32 to vector<8x32xf32>
    %158 = arith.addf %157, %156 : vector<8x32xf32>
    %159 = arith.divf %157, %158 : vector<8x32xf32>
    %160 = vector.extract_strided_slice %150 {offsets = [0, 32], sizes = [8, 32], strides = [1, 1]} : vector<8x96xf32> to vector<8x32xf32>
    %161 = vector.extract_strided_slice %151 {offsets = [0, 32], sizes = [8, 32], strides = [1, 1]} : vector<8x64xf32> to vector<8x32xf32>
    %162 = arith.addf %160, %161 : vector<8x32xf32>
    %163 = arith.negf %162 : vector<8x32xf32>
    %164 = math.exp %163 : vector<8x32xf32>
    %cst_55 = arith.constant 1.000000e+00 : f32
    %165 = vector.broadcast %cst_55 : f32 to vector<8x32xf32>
    %166 = arith.addf %165, %164 : vector<8x32xf32>
    %167 = arith.divf %165, %166 : vector<8x32xf32>
    %168 = vector.extract_strided_slice %150 {offsets = [0, 64], sizes = [8, 32], strides = [1, 1]} : vector<8x96xf32> to vector<8x32xf32>
    %169 = arith.mulf %159, %143 : vector<8x32xf32>
    %cst_56 = arith.constant dense<0.000000e+00> : vector<8x32xf32>
    %170 = tpu.matmul %169, %5, %cst_56 {dimension_numbers = #tpu.dot_dimension_numbers<[1], [0], [0], [1], [0, 0, 1, 1], [], []>} : vector<8x32xf32>, vector<32x32xf32>, vector<8x32xf32> -> vector<8x32xf32>
    %171 = arith.addf %168, %170 : vector<8x32xf32>
    %172 = math.tanh %171 : vector<8x32xf32>
    %173 = arith.mulf %143, %167 : vector<8x32xf32>
    %cst_57 = arith.constant 1.000000e+00 : f32
    %174 = vector.broadcast %cst_57 : f32 to vector<8x32xf32>
    %175 = arith.subf %174, %167 : vector<8x32xf32>
    %176 = arith.mulf %175, %172 : vector<8x32xf32>
    %177 = arith.addf %173, %176 : vector<8x32xf32>
    %178 = arith.index_cast %c4_i32 : i32 to index
    %c0_58 = arith.constant 0 : index
    %c0_59 = arith.constant 0 : index
    %179 = vector.load %arg9[%178, %c0_58, %c0_59] : memref<8x8x32xf32, #tpu.memory_space<vmem>>, vector<1x8x32xf32>
    %180 = vector.shape_cast %179 : vector<1x8x32xf32> to vector<8x32xf32>
    %181 = vector.shape_cast %177 : vector<8x32xf32> to vector<1x8x32xf32>
    tpu.vector_store %arg9[%178, %c0_58, %c0_59], %181 {strides = array<i32>} : memref<8x8x32xf32, #tpu.memory_space<vmem>>, vector<1x8x32xf32>,
    %c5_i32 = arith.constant 5 : i32
    %182 = arith.index_cast %c5_i32 : i32 to index
    %c0_60 = arith.constant 0 : index
    %c0_61 = arith.constant 0 : index
    %183 = vector.load %arg14[%182, %c0_60, %c0_61] : memref<8x8x96xf32, #tpu.memory_space<vmem>>, vector<1x8x96xf32>
    %184 = vector.shape_cast %183 : vector<1x8x96xf32> to vector<8x96xf32>
    %cst_62 = arith.constant dense<0.000000e+00> : vector<8x64xf32>
    %185 = tpu.matmul %177, %4, %cst_62 {dimension_numbers = #tpu.dot_dimension_numbers<[1], [0], [0], [1], [0, 0, 1, 1], [], []>} : vector<8x32xf32>, vector<32x64xf32>, vector<8x64xf32> -> vector<8x64xf32>
    %186 = vector.extract_strided_slice %184 {offsets = [0, 0], sizes = [8, 32], strides = [1, 1]} : vector<8x96xf32> to vector<8x32xf32>
    %187 = vector.extract_strided_slice %185 {offsets = [0, 0], sizes = [8, 32], strides = [1, 1]} : vector<8x64xf32> to vector<8x32xf32>
    %188 = arith.addf %186, %187 : vector<8x32xf32>
    %189 = arith.negf %188 : vector<8x32xf32>
    %190 = math.exp %189 : vector<8x32xf32>
    %cst_63 = arith.constant 1.000000e+00 : f32
    %191 = vector.broadcast %cst_63 : f32 to vector<8x32xf32>
    %192 = arith.addf %191, %190 : vector<8x32xf32>
    %193 = arith.divf %191, %192 : vector<8x32xf32>
    %194 = vector.extract_strided_slice %184 {offsets = [0, 32], sizes = [8, 32], strides = [1, 1]} : vector<8x96xf32> to vector<8x32xf32>
    %195 = vector.extract_strided_slice %185 {offsets = [0, 32], sizes = [8, 32], strides = [1, 1]} : vector<8x64xf32> to vector<8x32xf32>
    %196 = arith.addf %194, %195 : vector<8x32xf32>
    %197 = arith.negf %196 : vector<8x32xf32>
    %198 = math.exp %197 : vector<8x32xf32>
    %cst_64 = arith.constant 1.000000e+00 : f32
    %199 = vector.broadcast %cst_64 : f32 to vector<8x32xf32>
    %200 = arith.addf %199, %198 : vector<8x32xf32>
    %201 = arith.divf %199, %200 : vector<8x32xf32>
    %202 = vector.extract_strided_slice %184 {offsets = [0, 64], sizes = [8, 32], strides = [1, 1]} : vector<8x96xf32> to vector<8x32xf32>
    %203 = arith.mulf %193, %177 : vector<8x32xf32>
    %cst_65 = arith.constant dense<0.000000e+00> : vector<8x32xf32>
    %204 = tpu.matmul %203, %5, %cst_65 {dimension_numbers = #tpu.dot_dimension_numbers<[1], [0], [0], [1], [0, 0, 1, 1], [], []>} : vector<8x32xf32>, vector<32x32xf32>, vector<8x32xf32> -> vector<8x32xf32>
    %205 = arith.addf %202, %204 : vector<8x32xf32>
    %206 = math.tanh %205 : vector<8x32xf32>
    %207 = arith.mulf %177, %201 : vector<8x32xf32>
    %cst_66 = arith.constant 1.000000e+00 : f32
    %208 = vector.broadcast %cst_66 : f32 to vector<8x32xf32>
    %209 = arith.subf %208, %201 : vector<8x32xf32>
    %210 = arith.mulf %209, %206 : vector<8x32xf32>
    %211 = arith.addf %207, %210 : vector<8x32xf32>
    %212 = arith.index_cast %c5_i32 : i32 to index
    %c0_67 = arith.constant 0 : index
    %c0_68 = arith.constant 0 : index
    %213 = vector.load %arg9[%212, %c0_67, %c0_68] : memref<8x8x32xf32, #tpu.memory_space<vmem>>, vector<1x8x32xf32>
    %214 = vector.shape_cast %213 : vector<1x8x32xf32> to vector<8x32xf32>
    %215 = vector.shape_cast %211 : vector<8x32xf32> to vector<1x8x32xf32>
    tpu.vector_store %arg9[%212, %c0_67, %c0_68], %215 {strides = array<i32>} : memref<8x8x32xf32, #tpu.memory_space<vmem>>, vector<1x8x32xf32>,
    %c6_i32 = arith.constant 6 : i32
    %216 = arith.index_cast %c6_i32 : i32 to index
    %c0_69 = arith.constant 0 : index
    %c0_70 = arith.constant 0 : index
    %217 = vector.load %arg14[%216, %c0_69, %c0_70] : memref<8x8x96xf32, #tpu.memory_space<vmem>>, vector<1x8x96xf32>
    %218 = vector.shape_cast %217 : vector<1x8x96xf32> to vector<8x96xf32>
    %cst_71 = arith.constant dense<0.000000e+00> : vector<8x64xf32>
    %219 = tpu.matmul %211, %4, %cst_71 {dimension_numbers = #tpu.dot_dimension_numbers<[1], [0], [0], [1], [0, 0, 1, 1], [], []>} : vector<8x32xf32>, vector<32x64xf32>, vector<8x64xf32> -> vector<8x64xf32>
    %220 = vector.extract_strided_slice %218 {offsets = [0, 0], sizes = [8, 32], strides = [1, 1]} : vector<8x96xf32> to vector<8x32xf32>
    %221 = vector.extract_strided_slice %219 {offsets = [0, 0], sizes = [8, 32], strides = [1, 1]} : vector<8x64xf32> to vector<8x32xf32>
    %222 = arith.addf %220, %221 : vector<8x32xf32>
    %223 = arith.negf %222 : vector<8x32xf32>
    %224 = math.exp %223 : vector<8x32xf32>
    %cst_72 = arith.constant 1.000000e+00 : f32
    %225 = vector.broadcast %cst_72 : f32 to vector<8x32xf32>
    %226 = arith.addf %225, %224 : vector<8x32xf32>
    %227 = arith.divf %225, %226 : vector<8x32xf32>
    %228 = vector.extract_strided_slice %218 {offsets = [0, 32], sizes = [8, 32], strides = [1, 1]} : vector<8x96xf32> to vector<8x32xf32>
    %229 = vector.extract_strided_slice %219 {offsets = [0, 32], sizes = [8, 32], strides = [1, 1]} : vector<8x64xf32> to vector<8x32xf32>
    %230 = arith.addf %228, %229 : vector<8x32xf32>
    %231 = arith.negf %230 : vector<8x32xf32>
    %232 = math.exp %231 : vector<8x32xf32>
    %cst_73 = arith.constant 1.000000e+00 : f32
    %233 = vector.broadcast %cst_73 : f32 to vector<8x32xf32>
    %234 = arith.addf %233, %232 : vector<8x32xf32>
    %235 = arith.divf %233, %234 : vector<8x32xf32>
    %236 = vector.extract_strided_slice %218 {offsets = [0, 64], sizes = [8, 32], strides = [1, 1]} : vector<8x96xf32> to vector<8x32xf32>
    %237 = arith.mulf %227, %211 : vector<8x32xf32>
    %cst_74 = arith.constant dense<0.000000e+00> : vector<8x32xf32>
    %238 = tpu.matmul %237, %5, %cst_74 {dimension_numbers = #tpu.dot_dimension_numbers<[1], [0], [0], [1], [0, 0, 1, 1], [], []>} : vector<8x32xf32>, vector<32x32xf32>, vector<8x32xf32> -> vector<8x32xf32>
    %239 = arith.addf %236, %238 : vector<8x32xf32>
    %240 = math.tanh %239 : vector<8x32xf32>
    %241 = arith.mulf %211, %235 : vector<8x32xf32>
    %cst_75 = arith.constant 1.000000e+00 : f32
    %242 = vector.broadcast %cst_75 : f32 to vector<8x32xf32>
    %243 = arith.subf %242, %235 : vector<8x32xf32>
    %244 = arith.mulf %243, %240 : vector<8x32xf32>
    %245 = arith.addf %241, %244 : vector<8x32xf32>
    %246 = arith.index_cast %c6_i32 : i32 to index
    %c0_76 = arith.constant 0 : index
    %c0_77 = arith.constant 0 : index
    %247 = vector.load %arg9[%246, %c0_76, %c0_77] : memref<8x8x32xf32, #tpu.memory_space<vmem>>, vector<1x8x32xf32>
    %248 = vector.shape_cast %247 : vector<1x8x32xf32> to vector<8x32xf32>
    %249 = vector.shape_cast %245 : vector<8x32xf32> to vector<1x8x32xf32>
    tpu.vector_store %arg9[%246, %c0_76, %c0_77], %249 {strides = array<i32>} : memref<8x8x32xf32, #tpu.memory_space<vmem>>, vector<1x8x32xf32>,
    %c7_i32 = arith.constant 7 : i32
    %250 = arith.index_cast %c7_i32 : i32 to index
    %c0_78 = arith.constant 0 : index
    %c0_79 = arith.constant 0 : index
    %251 = vector.load %arg14[%250, %c0_78, %c0_79] : memref<8x8x96xf32, #tpu.memory_space<vmem>>, vector<1x8x96xf32>
    %252 = vector.shape_cast %251 : vector<1x8x96xf32> to vector<8x96xf32>
    %cst_80 = arith.constant dense<0.000000e+00> : vector<8x64xf32>
    %253 = tpu.matmul %245, %4, %cst_80 {dimension_numbers = #tpu.dot_dimension_numbers<[1], [0], [0], [1], [0, 0, 1, 1], [], []>} : vector<8x32xf32>, vector<32x64xf32>, vector<8x64xf32> -> vector<8x64xf32>
    %254 = vector.extract_strided_slice %252 {offsets = [0, 0], sizes = [8, 32], strides = [1, 1]} : vector<8x96xf32> to vector<8x32xf32>
    %255 = vector.extract_strided_slice %253 {offsets = [0, 0], sizes = [8, 32], strides = [1, 1]} : vector<8x64xf32> to vector<8x32xf32>
    %256 = arith.addf %254, %255 : vector<8x32xf32>
    %257 = arith.negf %256 : vector<8x32xf32>
    %258 = math.exp %257 : vector<8x32xf32>
    %cst_81 = arith.constant 1.000000e+00 : f32
    %259 = vector.broadcast %cst_81 : f32 to vector<8x32xf32>
    %260 = arith.addf %259, %258 : vector<8x32xf32>
    %261 = arith.divf %259, %260 : vector<8x32xf32>
    %262 = vector.extract_strided_slice %252 {offsets = [0, 32], sizes = [8, 32], strides = [1, 1]} : vector<8x96xf32> to vector<8x32xf32>
    %263 = vector.extract_strided_slice %253 {offsets = [0, 32], sizes = [8, 32], strides = [1, 1]} : vector<8x64xf32> to vector<8x32xf32>
    %264 = arith.addf %262, %263 : vector<8x32xf32>
    %265 = arith.negf %264 : vector<8x32xf32>
    %266 = math.exp %265 : vector<8x32xf32>
    %cst_82 = arith.constant 1.000000e+00 : f32
    %267 = vector.broadcast %cst_82 : f32 to vector<8x32xf32>
    %268 = arith.addf %267, %266 : vector<8x32xf32>
    %269 = arith.divf %267, %268 : vector<8x32xf32>
    %270 = vector.extract_strided_slice %252 {offsets = [0, 64], sizes = [8, 32], strides = [1, 1]} : vector<8x96xf32> to vector<8x32xf32>
    %271 = arith.mulf %261, %245 : vector<8x32xf32>
    %cst_83 = arith.constant dense<0.000000e+00> : vector<8x32xf32>
    %272 = tpu.matmul %271, %5, %cst_83 {dimension_numbers = #tpu.dot_dimension_numbers<[1], [0], [0], [1], [0, 0, 1, 1], [], []>} : vector<8x32xf32>, vector<32x32xf32>, vector<8x32xf32> -> vector<8x32xf32>
    %273 = arith.addf %270, %272 : vector<8x32xf32>
    %274 = math.tanh %273 : vector<8x32xf32>
    %275 = arith.mulf %245, %269 : vector<8x32xf32>
    %cst_84 = arith.constant 1.000000e+00 : f32
    %276 = vector.broadcast %cst_84 : f32 to vector<8x32xf32>
    %277 = arith.subf %276, %269 : vector<8x32xf32>
    %278 = arith.mulf %277, %274 : vector<8x32xf32>
    %279 = arith.addf %275, %278 : vector<8x32xf32>
    %280 = arith.index_cast %c7_i32 : i32 to index
    %c0_85 = arith.constant 0 : index
    %c0_86 = arith.constant 0 : index
    %281 = vector.load %arg9[%280, %c0_85, %c0_86] : memref<8x8x32xf32, #tpu.memory_space<vmem>>, vector<1x8x32xf32>
    %282 = vector.shape_cast %281 : vector<1x8x32xf32> to vector<8x32xf32>
    %283 = vector.shape_cast %279 : vector<8x32xf32> to vector<1x8x32xf32>
    tpu.vector_store %arg9[%280, %c0_85, %c0_86], %283 {strides = array<i32>} : memref<8x8x32xf32, #tpu.memory_space<vmem>>, vector<1x8x32xf32>,
    %c8_i32 = arith.constant 8 : i32
    %c0_87 = arith.constant 0 : index
    %c0_88 = arith.constant 0 : index
    %284 = vector.load %arg13[%c0_87, %c0_88] : memref<8x32xf32, #tpu.memory_space<vmem>>, vector<8x32xf32>
    tpu.vector_store %arg13[%c0_87, %c0_88], %279 {strides = array<i32>} : memref<8x32xf32, #tpu.memory_space<vmem>>, vector<8x32xf32>,
    return
  }
  func.func @transform_0(%arg0: i32) -> (i32, i32) {
    %c0_i32 = arith.constant 0 : i32
    %c0_i32_0 = arith.constant 0 : i32
    %c0_i32_1 = arith.constant 0 : i32
    return %c0_i32, %c0_i32_0 : i32, i32
  }
  func.func @transform_1(%arg0: i32) -> (i32, i32) {
    %c0_i32 = arith.constant 0 : i32
    %c0_i32_0 = arith.constant 0 : i32
    %c0_i32_1 = arith.constant 0 : i32
    return %c0_i32, %c0_i32_0 : i32, i32
  }
  func.func @transform_2(%arg0: i32) -> (i32, i32) {
    %c0_i32 = arith.constant 0 : i32
    %c0_i32_0 = arith.constant 0 : i32
    %c0_i32_1 = arith.constant 0 : i32
    return %c0_i32, %c0_i32_0 : i32, i32
  }
  func.func @transform_3(%arg0: i32) -> (i32, i32) {
    %c0_i32 = arith.constant 0 : i32
    %c0_i32_0 = arith.constant 0 : i32
    %c0_i32_1 = arith.constant 0 : i32
    return %c0_i32, %c0_i32_0 : i32, i32
  }
  func.func @transform_4(%arg0: i32) -> (i32, i32) {
    %c0_i32 = arith.constant 0 : i32
    %c0_i32_0 = arith.constant 0 : i32
    %c0_i32_1 = arith.constant 0 : i32
    return %c0_i32, %c0_i32_0 : i32, i32
  }
  func.func @transform_5(%arg0: i32) -> (i32, i32) {
    %c0_i32 = arith.constant 0 : i32
    %c0_i32_0 = arith.constant 0 : i32
    %c0_i32_1 = arith.constant 0 : i32
    return %c0_i32, %c0_i32_0 : i32, i32
  }
  func.func @transform_6(%arg0: i32) -> (i32, i32) {
    %c0_i32 = arith.constant 0 : i32
    %c0_i32_0 = arith.constant 0 : i32
    %c0_i32_1 = arith.constant 0 : i32
    return %c0_i32, %c0_i32_0 : i32, i32
  }
  func.func @transform_7(%arg0: i32) -> (i32, i32, i32) {
    %c0_i32 = arith.constant 0 : i32
    %c0_i32_0 = arith.constant 0 : i32
    %c0_i32_1 = arith.constant 0 : i32
    return %arg0, %c0_i32, %c0_i32_0 : i32, i32, i32
  }
  func.func @transform_8(%arg0: i32) -> (i32, i32, i32) {
    %c0_i32 = arith.constant 0 : i32
    %c0_i32_0 = arith.constant 0 : i32
    %c0_i32_1 = arith.constant 0 : i32
    return %arg0, %c0_i32, %c0_i32_0 : i32, i32, i32
  }
}

</mosaic_0001>

<bundles_post_ra>
// kernel: permuted_gru_forward.1
= control target key start
LH: loop header
LB: loop body
LE: loop exit
PB: predicated region body
PF: predicated region fallthrough
CT: control target
= control target key end

     0   :  { %13 = vsyncpa [#allocation8], 0  ;;  %s4257_s0 = inlined_call_operand.hbm [shape: f32[32,32], index: 0, kind: input, shape index: {}]   ;;  %s4258_s1 = inlined_call_operand.hbm [shape: f32[32,32], index: 1, kind: input, shape index: {}]   ;;  %s4259_s2 = inlined_call_operand.hbm [shape: f32[32,32], index: 2, kind: input, shape index: {}]   ;;  %s4260_s3 = inlined_call_operand.hbm [shape: f32[32,32], index: 3, kind: input, shape index: {}]   ;;  %s4261_s4 = inlined_call_operand.hbm [shape: f32[32,32], index: 4, kind: input, shape index: {}]   ;;  %s4262_s5 = inlined_call_operand.vmem [shape: f32[32,32], index: 5, kind: input, shape index: {}]   ;;  %s4263_s6 = inlined_call_operand.vmem [shape: f32[32,32], index: 6, kind: input, shape index: {}]   ;;  %s4264_s7 = inlined_call_operand.vmem [shape: f32[8,8,32], index: 7, kind: input, shape index: {}]   ;;  %s4265_s8 = inlined_call_operand.vmem [shape: f32[8,8,32], index: 8, kind: output, shape index: {}]  }
   0x1   :  { %14 = vsyncpa [#allocation10], 0 }
   0x2   :  { %15 = vsyncpa [#allocation13], 0  ;;  %s3609_s27 = smov [#allocation9]   ;;  %s3610_s29 = smov [#allocation12]  }
   0x3   :  { %s33_s28 = sshll.u32 %s3609_s27, 4  ;;  %s57_s30 = sshll.u32 %s3610_s29, 4  ;;  %s34_s28 = int_to_ptr.vmem [resolvable:$true] %s33_s28  ;;  %s58_s30 = int_to_ptr.vmem [resolvable:$true] %s57_s30 }
   0x4   :  { %s3511_s9 = scalar_lea.vmem %s34_s28, 512  ;;  %p3516_p1 = scmp.lt.s32.totalorder %s34_s28, %s34_s28 }
   0x5   :  { %p3512_p0 = scmp.ne.s32.totalorder %s34_s28, %s3511_s9  ;;  %p3517_p2 = scmp.lt.s32.totalorder %s3511_s9, %s3511_s9 }
   0x7   :  { %p3518_p3 = por %p3517_p2, %p3516_p1 }
   0x9   :  { %p3519_p4 = pnand %p3518_p3, %p3512_p0 }
   0xb   :  { %3522 = shalt.err (!%p3519_p4)
}
   0xc   :  { %s3611_s10 = smov 128   ;;  %s3612_s11 = smov 8  }
   0xd   :  { %39 = dma.hbm_to_vmem [thread:$0]  %s4258_s1, 512, %s34_s28, [#allocation10], %s3611_s10, %s3611_s10, %s3612_s11  }
   0xe   :  { %s3531_s14 = scalar_lea.vmem %s58_s30, 512  ;;  %p3536_p6 = scmp.lt.s32.totalorder %s58_s30, %s58_s30 }
   0xf   :  { %p3532_p5 = scmp.ne.s32.totalorder %s58_s30, %s3531_s14  ;;  %p3537_p7 = scmp.lt.s32.totalorder %s3531_s14, %s3531_s14 }
  0x11   :  { %p3538_p8 = por %p3537_p7, %p3536_p6 }
  0x13   :  { %p3539_p9 = pnand %p3538_p8, %p3532_p5 }
  0x15   :  { %3542 = shalt.err (!%p3539_p9)
}
  0x16   :  { %63 = dma.hbm_to_vmem [thread:$0]  %s4260_s3, 512, %s58_s30, [#allocation13], %s3611_s10, %s3611_s10, %s3612_s11  }
  0x17   :  { %s3613_s17 = smov [#allocation7]   ;;  %s3614_s19 = smov [#allocation11]  }
  0x18   :  { %s21_s18 = sshll.u32 %s3613_s17, 4  ;;  %s45_s20 = sshll.u32 %s3614_s19, 4  ;;  %s22_s18 = int_to_ptr.vmem [resolvable:$true] %s21_s18  ;;  %s46_s20 = int_to_ptr.vmem [resolvable:$true] %s45_s20 }
  0x19   :  { %s3551_s1 = scalar_lea.vmem %s22_s18, 512  ;;  %p3556_p11 = scmp.lt.s32.totalorder %s22_s18, %s22_s18 }
  0x1a   :  { %p3552_p10 = scmp.ne.s32.totalorder %s22_s18, %s3551_s1  ;;  %p3557_p12 = scmp.lt.s32.totalorder %s3551_s1, %s3551_s1 }
  0x1c   :  { %p3558_p13 = por %p3557_p12, %p3556_p11 }
  0x1e   :  { %p3559_p0 = pnand %p3558_p13, %p3552_p10 }
  0x20   :  { %3562 = shalt.err (!%p3559_p0)
}
  0x21   :  { %27 = dma.hbm_to_vmem [thread:$0]  %s4257_s0, 512, %s22_s18, [#allocation8], %s3611_s10, %s3611_s10, %s3612_s11  }
  0x22   :  { %s3571_s3 = scalar_lea.vmem %s46_s20, 512  ;;  %p3576_p2 = scmp.lt.s32.totalorder %s46_s20, %s46_s20 }
  0x23   :  { %p3572_p1 = scmp.ne.s32.totalorder %s46_s20, %s3571_s3  ;;  %p3577_p3 = scmp.lt.s32.totalorder %s3571_s3, %s3571_s3 }
  0x25   :  { %p3578_p4 = por %p3577_p3, %p3576_p2 }
  0x27   :  { %p3579_p5 = pnand %p3578_p4, %p3572_p1 }
  0x29   :  { %3582 = shalt.err (!%p3579_p5)
}
  0x2a   :  { %51 = dma.hbm_to_vmem [thread:$0]  %s4259_s2, 512, %s46_s20, [#allocation10], %s3611_s10, %s3611_s10, %s3612_s11  }
  0x2b   :  { %s3615_s25 = smov [#allocation14]  }
  0x2c   :  { %s69_s26 = sshll.u32 %s3615_s25, 4  ;;  %s70_s26 = int_to_ptr.vmem [resolvable:$true] %s69_s26 }
  0x2d   :  { %s3591_s27 = scalar_lea.vmem %s70_s26, 512  ;;  %p3596_p7 = scmp.lt.s32.totalorder %s70_s26, %s70_s26 }
  0x2e   :  { %p3592_p6 = scmp.ne.s32.totalorder %s70_s26, %s3591_s27  ;;  %p3597_p8 = scmp.lt.s32.totalorder %s3591_s27, %s3591_s27 }
  0x30   :  { %p3598_p9 = por %p3597_p8, %p3596_p7 }
  0x32   :  { %p3599_p10 = pnand %p3598_p9, %p3592_p6 }
  0x34   :  { %3602 = shalt.err (!%p3599_p10)
}
  0x35   :  { %75 = dma.hbm_to_vmem [thread:$0]  %s4261_s4, 512, %s70_s26, [#allocation13], %s3611_s10, %s3611_s10, %s3612_s11  }
  0x36   :  { %3603 = dma.done.wait [#allocation8], 512  }
  0x37   :  { %3604 = vsyncadd [#allocation8], 4294966784 }
  0x38   :  { %3605 = dma.done.wait [#allocation10], 1024  }
  0x39   :  { %3606 = vsyncadd [#allocation10], 4294966272 }
  0x3a   :  { %3607 = dma.done.wait [#allocation13], 1024  }
  0x3b   :  { %3608 = vsyncadd [#allocation13], 4294966272  ;;  %vm105_vm0 = vcmask 261120   ;;  %v101_v0 = vld [vmem:[#allocation7] sm:$0xff]  ;;  %v102_v1 = vld [vmem:[#allocation7 + $0x8] sm:$0xff]  ;;  %s3617_s12 = smov 32  }
  0x3c   :  { %v103_v2 = vld [vmem:[#allocation7 + $0x10] sm:$0xff]  ;;  %v104_v3 = vld [vmem:[#allocation7 + $0x18] sm:$0xff]  ;;  %v106_v4 = vsel %vm105_vm0, %v101_v0, -inf  ;;  %v107_v5 = vsel %vm105_vm0, %v102_v1, -inf  ;;  %vm3620_vm5 = vmmov 0   ;;  %vm1148_vm6 = vcmask 523520  }
  0x3d   :  { %v108_v6 = vsel %vm105_vm0, %v103_v2, -inf  ;;  %v109_v7 = vsel %vm105_vm0, %v104_v3, -inf  ;;  %v110_v8 = vmax.f32 %v106_v4, %v107_v5  ;;  %vm1177_vm7 = vcmask 785920  }
  0x3e   :  { %v111_v9 = vmax.f32 %v108_v6, %v109_v7  ;;  %vm1385_vm8 = vcmask 785408  }
  0x40   :  { %v112_v10 = vmax.f32 %v110_v8, %v111_v9 }
  0x42   :  { %113 = vmax.xlane.f32.xlu0 %v112_v10 }
  0xcb   :  { %v114_v11 = vpop.xlane.xlu0 %113 }
  0xcc   :  { %v115_v12 = vrot.slane %v114_v11, 4 }
  0xce   :  { %v116_v13 = vmax.f32 %v114_v11, %v115_v12 }
  0xd0   :  { %v117_v14 = vrot.slane %v116_v13, 2 }
  0xd2   :  { %v118_v15 = vmax.f32 %v116_v13, %v117_v14 }
  0xd4   :  { %v119_v16 = vrot.slane %v118_v15, 1 }
  0xd6   :  { %v120_v17 = vmax.f32 %v118_v15, %v119_v16 }
  0xd8   :  { %3232 = vpush %v120_v17 }
 0x109   :  { %s3233_s2 = spop %3232 }
 0x10a   :  { %v122_v18 = vstv %s3233_s2 }
 0x10b   :  { %v123_v19 = vsub.f32 %v101_v0, %v122_v18  ;;  %v124_v20 = vsub.f32 %v102_v1, %v122_v18  ;;  %v125_v21 = vsub.f32 %v103_v2, %v122_v18  ;;  %v126_v22 = vsub.f32 %v104_v3, %v122_v18 }
 0x10d   :  { %v127_v23 = vmul.f32 100.0, %v123_v19  ;;  %v128_v24 = vmul.f32 100.0, %v124_v20  ;;  %v129_v25 = vmul.f32 100.0, %v125_v21  ;;  %v130_v26 = vmul.f32 100.0, %v126_v22 }
 0x10f   :  { %v131_v27 = vmul.f32 1.442695, %v127_v23  ;;  %v133_v28 = vmul.f32 1.442695, %v128_v24  ;;  %v135_v29 = vmul.f32 1.442695, %v129_v25 }
 0x110   :  { %v137_v30 = vmul.f32 1.442695, %v130_v26 }
 0x111   :  { %3247 = vpow2.f32 %v131_v27 }
 0x112   :  { %3249 = vpow2.f32 %v133_v28 }
 0x113   :  { %3251 = vpow2.f32 %v135_v29 }
 0x114   :  { %3253 = vpow2.f32 %v137_v30 }
 0x11e   :  { %v3248_v31 = vpop.eup %3247 }
 0x11f   :  { %v3250_v32 = vpop.eup %3249  ;;  %v139_v33 = vsel %vm105_vm0, %v3248_v31, 0.0 }
 0x120   :  { %v3252_v34 = vpop.eup %3251  ;;  %v142_v35 = vsel %vm105_vm0, %v3250_v32, 0.0  ;;  %140 = vadd.xlane.f32.xlu0 %v139_v33 }
 0x121   :  { %v3254_v36 = vpop.eup %3253  ;;  %143 = vadd.xlane.f32.xlu1 %v142_v35  ;;  %v145_v38 = vsel %vm105_vm0, %v3252_v34, 0.0 }
 0x122   :  { %v148_v37 = vsel %vm105_vm0, %v3254_v36, 0.0 }
 0x124   :  { %149 = vadd.xlane.f32.xlu0 %v148_v37 }
 0x125   :  { %146 = vadd.xlane.f32.xlu1 %v145_v38 }
 0x1a9   :  { %v141_v39 = vpop.xlane.xlu0 %140 }
 0x1aa   :  { %v144_v40 = vpop.xlane.xlu1 %143  ;;  %3255 = vrcp.f32 %v141_v39 }
 0x1ab   :  { %3257 = vrcp.f32 %v144_v40 }
 0x1ad   :  { %v150_v41 = vpop.xlane.xlu0 %149 }
 0x1ae   :  { %v147_v42 = vpop.xlane.xlu1 %146  ;;  %3259 = vrcp.f32 %v150_v41 }
 0x1af   :  { %3261 = vrcp.f32 %v147_v42 }
 0x1b7   :  { %v3256_v43 = vpop.eup %3255 }
 0x1b8   :  { %v3258_v44 = vpop.eup %3257  ;;  %v152_v45 = vmul.f32 %v3256_v43, %v3248_v31 }
 0x1b9   :  { %v154_v46 = vmul.f32 %v3258_v44, %v3250_v32 }
 0x1ba   :  { %v159_v48 = vsel %vm105_vm0, %v152_v45, 0.0 }
 0x1bb   :  { %v3260_v47 = vpop.eup %3259  ;;  %v160_v49 = vsel %vm105_vm0, %v154_v46, 0.0 }
 0x1bc   :  { %v3262_v50 = vpop.eup %3261  ;;  %v158_v52 = vmul.f32 %v3260_v47, %v3254_v36  ;;  %v161_v53 = vadd.f32 %v160_v49, %v159_v48 }
 0x1bd   :  { %v156_v51 = vmul.f32 %v3262_v50, %v3252_v34 }
 0x1be   :  { %v164_v56 = vsel %vm105_vm0, %v158_v52, 0.0 }
 0x1bf   :  { %v162_v54 = vsel %vm105_vm0, %v156_v51, 0.0 }
 0x1c0   :  { %v163_v55 = vadd.f32 %v162_v54, %v161_v53 }
 0x1c2   :  { %v165_v57 = vadd.f32 %v164_v56, %v163_v55 }
 0x1c4   :  { %v166_v58 = vrot.slane %v165_v57, 4 }
 0x1c6   :  { %v167_v59 = vadd.f32 %v166_v58, %v165_v57 }
 0x1c8   :  { %v168_v60 = vrot.slane %v167_v59, 2 }
 0x1ca   :  { %v169_v61 = vadd.f32 %v168_v60, %v167_v59 }
 0x1cc   :  { %v170_v62 = vrot.slane %v169_v61, 1 }
 0x1ce   :  { %v171_v63 = vadd.f32 %v170_v62, %v169_v61 }
 0x1d0   :  { %3263 = vrcp.f32 %v171_v63 }
 0x1dd   :  { %v3264_v0 = vpop.eup %3263 }
 0x1de   :  { %v174_v1 = vmul.f32 %v3264_v0, %v154_v46  ;;  %v173_v2 = vmul.f32 %v3264_v0, %v152_v45  ;;  %v176_v5 = vmul.f32 %v3264_v0, %v158_v52  ;;  %v175_v6 = vmul.f32 %v3264_v0, %v156_v51 }
 0x1e0   :  { %v180_v3 = vsel %vm105_vm0, %v174_v1, 0.0  ;;  %v177_v4 = vsel %vm105_vm0, %v173_v2, 0.0  ;;  %v186_v7 = vsel %vm105_vm0, %v176_v5, 0.0  ;;  %v183_v8 = vsel %vm105_vm0, %v175_v6, 0.0 }
 0x1e1   :  { %181 = vadd.xlane.f32.xlu0 %v180_v3  ;;  %178 = vadd.xlane.f32.xlu1 %v177_v4 }
 0x1e5   :  { %187 = vadd.xlane.f32.xlu0 %v186_v7  ;;  %184 = vadd.xlane.f32.xlu1 %v183_v8 }
 0x26a   :  { %v182_v9 = vpop.xlane.xlu0 %181  ;;  %v179_v10 = vpop.xlane.xlu1 %178 }
 0x26b   :  { %3265 = vrcp.f32 %v182_v9 }
 0x26c   :  { %3267 = vrcp.f32 %v179_v10 }
 0x26e   :  { %v188_v11 = vpop.xlane.xlu0 %187  ;;  %v185_v12 = vpop.xlane.xlu1 %184 }
 0x26f   :  { %3269 = vrcp.f32 %v188_v11 }
 0x270   :  { %3271 = vrcp.f32 %v185_v12 }
 0x278   :  { %v3266_v13 = vpop.eup %3265 }
 0x279   :  { %v3268_v14 = vpop.eup %3267  ;;  %v192_v15 = vmul.f32 %v3266_v13, %v174_v1 }
 0x27a   :  { %v190_v16 = vmul.f32 %v3268_v14, %v173_v2 }
 0x27b   :  { %v198_v19 = vsel %vm105_vm0, %v192_v15, 0.0 }
 0x27c   :  { %v3270_v17 = vpop.eup %3269  ;;  %v197_v18 = vsel %vm105_vm0, %v190_v16, 0.0 }
 0x27d   :  { %v3272_v20 = vpop.eup %3271  ;;  %v196_v22 = vmul.f32 %v3270_v17, %v176_v5  ;;  %v199_v23 = vadd.f32 %v198_v19, %v197_v18 }
 0x27e   :  { %v194_v21 = vmul.f32 %v3272_v20, %v175_v6 }
 0x27f   :  { %v202_v26 = vsel %vm105_vm0, %v196_v22, 0.0 }
 0x280   :  { %v200_v24 = vsel %vm105_vm0, %v194_v21, 0.0 }
 0x281   :  { %v201_v25 = vadd.f32 %v200_v24, %v199_v23 }
 0x283   :  { %v203_v27 = vadd.f32 %v202_v26, %v201_v25 }
 0x285   :  { %v204_v28 = vrot.slane %v203_v27, 4 }
 0x287   :  { %v205_v29 = vadd.f32 %v204_v28, %v203_v27 }
 0x289   :  { %v206_v30 = vrot.slane %v205_v29, 2 }
 0x28b   :  { %v207_v31 = vadd.f32 %v206_v30, %v205_v29 }
 0x28d   :  { %v208_v32 = vrot.slane %v207_v31, 1 }
 0x28f   :  { %v209_v33 = vadd.f32 %v208_v32, %v207_v31 }
 0x291   :  { %3273 = vrcp.f32 %v209_v33 }
 0x29e   :  { %v3274_v34 = vpop.eup %3273 }
 0x29f   :  { %v212_v35 = vmul.f32 %v3274_v34, %v192_v15  ;;  %v211_v36 = vmul.f32 %v3274_v34, %v190_v16  ;;  %v214_v39 = vmul.f32 %v3274_v34, %v196_v22  ;;  %v213_v40 = vmul.f32 %v3274_v34, %v194_v21 }
 0x2a1   :  { %v218_v37 = vsel %vm105_vm0, %v212_v35, 0.0  ;;  %v215_v38 = vsel %vm105_vm0, %v211_v36, 0.0  ;;  %v224_v41 = vsel %vm105_vm0, %v214_v39, 0.0  ;;  %v221_v42 = vsel %vm105_vm0, %v213_v40, 0.0 }
 0x2a2   :  { %219 = vadd.xlane.f32.xlu0 %v218_v37  ;;  %216 = vadd.xlane.f32.xlu1 %v215_v38 }
 0x2a6   :  { %225 = vadd.xlane.f32.xlu0 %v224_v41  ;;  %222 = vadd.xlane.f32.xlu1 %v221_v42 }
 0x32b   :  { %v220_v43 = vpop.xlane.xlu0 %219  ;;  %v217_v44 = vpop.xlane.xlu1 %216 }
 0x32c   :  { %3275 = vrcp.f32 %v220_v43 }
 0x32d   :  { %3277 = vrcp.f32 %v217_v44 }
 0x32f   :  { %v226_v45 = vpop.xlane.xlu0 %225  ;;  %v223_v46 = vpop.xlane.xlu1 %222 }
 0x330   :  { %3279 = vrcp.f32 %v226_v45 }
 0x331   :  { %3281 = vrcp.f32 %v223_v46 }
 0x339   :  { %v3276_v47 = vpop.eup %3275 }
 0x33a   :  { %v3278_v48 = vpop.eup %3277  ;;  %v230_v49 = vmul.f32 %v3276_v47, %v212_v35 }
 0x33b   :  { %v228_v50 = vmul.f32 %v3278_v48, %v211_v36 }
 0x33c   :  { %v236_v53 = vsel %vm105_vm0, %v230_v49, 0.0 }
 0x33d   :  { %v3280_v51 = vpop.eup %3279  ;;  %v235_v52 = vsel %vm105_vm0, %v228_v50, 0.0 }
 0x33e   :  { %v3282_v54 = vpop.eup %3281  ;;  %v234_v56 = vmul.f32 %v3280_v51, %v214_v39  ;;  %v237_v57 = vadd.f32 %v236_v53, %v235_v52 }
 0x33f   :  { %v232_v55 = vmul.f32 %v3282_v54, %v213_v40 }
 0x340   :  { %v240_v60 = vsel %vm105_vm0, %v234_v56, 0.0 }
 0x341   :  { %v238_v58 = vsel %vm105_vm0, %v232_v55, 0.0 }
 0x342   :  { %v239_v59 = vadd.f32 %v238_v58, %v237_v57 }
 0x344   :  { %v241_v61 = vadd.f32 %v240_v60, %v239_v59 }
 0x346   :  { %v242_v62 = vrot.slane %v241_v61, 4 }
 0x348   :  { %v243_v63 = vadd.f32 %v242_v62, %v241_v61 }
 0x34a   :  { %v244_v0 = vrot.slane %v243_v63, 2 }
 0x34c   :  { %v245_v1 = vadd.f32 %v244_v0, %v243_v63 }
 0x34e   :  { %v246_v2 = vrot.slane %v245_v1, 1 }
 0x350   :  { %v247_v3 = vadd.f32 %v246_v2, %v245_v1 }
 0x352   :  { %3283 = vrcp.f32 %v247_v3 }
 0x35f   :  { %v3284_v4 = vpop.eup %3283 }
 0x360   :  { %v250_v5 = vmul.f32 %v3284_v4, %v230_v49  ;;  %v249_v6 = vmul.f32 %v3284_v4, %v228_v50  ;;  %v252_v9 = vmul.f32 %v3284_v4, %v234_v56  ;;  %v251_v10 = vmul.f32 %v3284_v4, %v232_v55 }
 0x362   :  { %v256_v7 = vsel %vm105_vm0, %v250_v5, 0.0  ;;  %v253_v8 = vsel %vm105_vm0, %v249_v6, 0.0  ;;  %v262_v11 = vsel %vm105_vm0, %v252_v9, 0.0  ;;  %v259_v12 = vsel %vm105_vm0, %v251_v10, 0.0 }
 0x363   :  { %257 = vadd.xlane.f32.xlu0 %v256_v7  ;;  %254 = vadd.xlane.f32.xlu1 %v253_v8 }
 0x367   :  { %263 = vadd.xlane.f32.xlu0 %v262_v11  ;;  %260 = vadd.xlane.f32.xlu1 %v259_v12 }
 0x3ec   :  { %v258_v13 = vpop.xlane.xlu0 %257  ;;  %v255_v14 = vpop.xlane.xlu1 %254 }
 0x3ed   :  { %3285 = vrcp.f32 %v258_v13 }
 0x3ee   :  { %3287 = vrcp.f32 %v255_v14 }
 0x3f0   :  { %v264_v15 = vpop.xlane.xlu0 %263  ;;  %v261_v16 = vpop.xlane.xlu1 %260 }
 0x3f1   :  { %3289 = vrcp.f32 %v264_v15 }
 0x3f2   :  { %3291 = vrcp.f32 %v261_v16 }
 0x3fa   :  { %v3286_v17 = vpop.eup %3285 }
 0x3fb   :  { %v3288_v18 = vpop.eup %3287  ;;  %v268_v19 = vmul.f32 %v3286_v17, %v250_v5 }
 0x3fc   :  { %v266_v20 = vmul.f32 %v3288_v18, %v249_v6 }
 0x3fd   :  { %v274_v23 = vsel %vm105_vm0, %v268_v19, 0.0 }
 0x3fe   :  { %v3290_v21 = vpop.eup %3289  ;;  %v273_v22 = vsel %vm105_vm0, %v266_v20, 0.0 }
 0x3ff   :  { %v3292_v24 = vpop.eup %3291  ;;  %v272_v26 = vmul.f32 %v3290_v21, %v252_v9  ;;  %v275_v27 = vadd.f32 %v274_v23, %v273_v22 }
 0x400   :  { %v270_v25 = vmul.f32 %v3292_v24, %v251_v10 }
 0x401   :  { %v278_v30 = vsel %vm105_vm0, %v272_v26, 0.0 }
 0x402   :  { %v276_v28 = vsel %vm105_vm0, %v270_v25, 0.0 }
 0x403   :  { %v277_v29 = vadd.f32 %v276_v28, %v275_v27 }
 0x405   :  { %v279_v31 = vadd.f32 %v278_v30, %v277_v29 }
 0x407   :  { %v280_v32 = vrot.slane %v279_v31, 4 }
 0x409   :  { %v281_v33 = vadd.f32 %v280_v32, %v279_v31 }
 0x40b   :  { %v282_v34 = vrot.slane %v281_v33, 2 }
 0x40d   :  { %v283_v35 = vadd.f32 %v282_v34, %v281_v33 }
 0x40f   :  { %v284_v36 = vrot.slane %v283_v35, 1 }
 0x411   :  { %v285_v37 = vadd.f32 %v284_v36, %v283_v35 }
 0x413   :  { %3293 = vrcp.f32 %v285_v37 }
 0x420   :  { %v3294_v38 = vpop.eup %3293 }
 0x421   :  { %v288_v39 = vmul.f32 %v3294_v38, %v268_v19  ;;  %v287_v40 = vmul.f32 %v3294_v38, %v266_v20  ;;  %v290_v43 = vmul.f32 %v3294_v38, %v272_v26  ;;  %v289_v44 = vmul.f32 %v3294_v38, %v270_v25 }
 0x423   :  { %v294_v41 = vsel %vm105_vm0, %v288_v39, 0.0  ;;  %v291_v42 = vsel %vm105_vm0, %v287_v40, 0.0  ;;  %v300_v45 = vsel %vm105_vm0, %v290_v43, 0.0  ;;  %v297_v46 = vsel %vm105_vm0, %v289_v44, 0.0 }
 0x424   :  { %295 = vadd.xlane.f32.xlu0 %v294_v41  ;;  %292 = vadd.xlane.f32.xlu1 %v291_v42 }
 0x428   :  { %301 = vadd.xlane.f32.xlu0 %v300_v45  ;;  %298 = vadd.xlane.f32.xlu1 %v297_v46 }
 0x4ad   :  { %v296_v47 = vpop.xlane.xlu0 %295  ;;  %v293_v48 = vpop.xlane.xlu1 %292 }
 0x4ae   :  { %3295 = vrcp.f32 %v296_v47 }
 0x4af   :  { %3297 = vrcp.f32 %v293_v48 }
 0x4b1   :  { %v302_v49 = vpop.xlane.xlu0 %301  ;;  %v299_v50 = vpop.xlane.xlu1 %298 }
 0x4b2   :  { %3299 = vrcp.f32 %v302_v49 }
 0x4b3   :  { %3301 = vrcp.f32 %v299_v50 }
 0x4bb   :  { %v3296_v51 = vpop.eup %3295 }
 0x4bc   :  { %v3298_v52 = vpop.eup %3297  ;;  %v306_v53 = vmul.f32 %v3296_v51, %v288_v39 }
 0x4bd   :  { %v304_v54 = vmul.f32 %v3298_v52, %v287_v40 }
 0x4be   :  { %v312_v57 = vsel %vm105_vm0, %v306_v53, 0.0 }
 0x4bf   :  { %v3300_v55 = vpop.eup %3299  ;;  %v311_v56 = vsel %vm105_vm0, %v304_v54, 0.0 }
 0x4c0   :  { %v3302_v58 = vpop.eup %3301  ;;  %v310_v60 = vmul.f32 %v3300_v55, %v290_v43  ;;  %v313_v61 = vadd.f32 %v312_v57, %v311_v56 }
 0x4c1   :  { %v308_v59 = vmul.f32 %v3302_v58, %v289_v44 }
 0x4c2   :  { %v316_v0 = vsel %vm105_vm0, %v310_v60, 0.0 }
 0x4c3   :  { %v314_v62 = vsel %vm105_vm0, %v308_v59, 0.0 }
 0x4c4   :  { %v315_v63 = vadd.f32 %v314_v62, %v313_v61 }
 0x4c6   :  { %v317_v1 = vadd.f32 %v316_v0, %v315_v63 }
 0x4c8   :  { %v318_v2 = vrot.slane %v317_v1, 4 }
 0x4ca   :  { %v319_v3 = vadd.f32 %v318_v2, %v317_v1 }
 0x4cc   :  { %v320_v4 = vrot.slane %v319_v3, 2 }
 0x4ce   :  { %v321_v5 = vadd.f32 %v320_v4, %v319_v3 }
 0x4d0   :  { %v322_v6 = vrot.slane %v321_v5, 1 }
 0x4d2   :  { %v323_v7 = vadd.f32 %v322_v6, %v321_v5 }
 0x4d4   :  { %3303 = vrcp.f32 %v323_v7 }
 0x4e1   :  { %v3304_v8 = vpop.eup %3303 }
 0x4e2   :  { %v326_v9 = vmul.f32 %v3304_v8, %v306_v53  ;;  %v325_v10 = vmul.f32 %v3304_v8, %v304_v54  ;;  %v328_v13 = vmul.f32 %v3304_v8, %v310_v60  ;;  %v327_v14 = vmul.f32 %v3304_v8, %v308_v59 }
 0x4e4   :  { %v332_v11 = vsel %vm105_vm0, %v326_v9, 0.0  ;;  %v329_v12 = vsel %vm105_vm0, %v325_v10, 0.0  ;;  %v338_v15 = vsel %vm105_vm0, %v328_v13, 0.0  ;;  %v335_v16 = vsel %vm105_vm0, %v327_v14, 0.0 }
 0x4e5   :  { %333 = vadd.xlane.f32.xlu0 %v332_v11  ;;  %330 = vadd.xlane.f32.xlu1 %v329_v12 }
 0x4e9   :  { %339 = vadd.xlane.f32.xlu0 %v338_v15  ;;  %336 = vadd.xlane.f32.xlu1 %v335_v16 }
 0x56e   :  { %v334_v17 = vpop.xlane.xlu0 %333  ;;  %v331_v18 = vpop.xlane.xlu1 %330 }
 0x56f   :  { %3305 = vrcp.f32 %v334_v17 }
 0x570   :  { %3307 = vrcp.f32 %v331_v18 }
 0x572   :  { %v340_v19 = vpop.xlane.xlu0 %339  ;;  %v337_v20 = vpop.xlane.xlu1 %336 }
 0x573   :  { %3309 = vrcp.f32 %v340_v19 }
 0x574   :  { %3311 = vrcp.f32 %v337_v20 }
 0x57c   :  { %v3306_v21 = vpop.eup %3305 }
 0x57d   :  { %v3308_v22 = vpop.eup %3307  ;;  %v344_v23 = vmul.f32 %v3306_v21, %v326_v9 }
 0x57e   :  { %v342_v24 = vmul.f32 %v3308_v22, %v325_v10 }
 0x57f   :  { %v350_v27 = vsel %vm105_vm0, %v344_v23, 0.0 }
 0x580   :  { %v3310_v25 = vpop.eup %3309  ;;  %v349_v26 = vsel %vm105_vm0, %v342_v24, 0.0 }
 0x581   :  { %v3312_v28 = vpop.eup %3311  ;;  %v348_v30 = vmul.f32 %v3310_v25, %v328_v13  ;;  %v351_v31 = vadd.f32 %v350_v27, %v349_v26 }
 0x582   :  { %v346_v29 = vmul.f32 %v3312_v28, %v327_v14 }
 0x583   :  { %v354_v34 = vsel %vm105_vm0, %v348_v30, 0.0 }
 0x584   :  { %v352_v32 = vsel %vm105_vm0, %v346_v29, 0.0 }
 0x585   :  { %v353_v33 = vadd.f32 %v352_v32, %v351_v31 }
 0x587   :  { %v355_v35 = vadd.f32 %v354_v34, %v353_v33 }
 0x589   :  { %v356_v36 = vrot.slane %v355_v35, 4 }
 0x58b   :  { %v357_v37 = vadd.f32 %v356_v36, %v355_v35 }
 0x58d   :  { %v358_v38 = vrot.slane %v357_v37, 2 }
 0x58f   :  { %v359_v39 = vadd.f32 %v358_v38, %v357_v37 }
 0x591   :  { %v360_v40 = vrot.slane %v359_v39, 1 }
 0x593   :  { %v361_v41 = vadd.f32 %v360_v40, %v359_v39 }
 0x595   :  { %3313 = vrcp.f32 %v361_v41 }
 0x5a2   :  { %v3314_v42 = vpop.eup %3313 }
 0x5a3   :  { %v364_v43 = vmul.f32 %v3314_v42, %v344_v23  ;;  %v363_v44 = vmul.f32 %v3314_v42, %v342_v24  ;;  %v366_v47 = vmul.f32 %v3314_v42, %v348_v30  ;;  %v365_v48 = vmul.f32 %v3314_v42, %v346_v29 }
 0x5a5   :  { %v370_v45 = vsel %vm105_vm0, %v364_v43, 0.0  ;;  %v367_v46 = vsel %vm105_vm0, %v363_v44, 0.0  ;;  %v376_v49 = vsel %vm105_vm0, %v366_v47, 0.0  ;;  %v373_v50 = vsel %vm105_vm0, %v365_v48, 0.0 }
 0x5a6   :  { %371 = vadd.xlane.f32.xlu0 %v370_v45  ;;  %368 = vadd.xlane.f32.xlu1 %v367_v46 }
 0x5aa   :  { %377 = vadd.xlane.f32.xlu0 %v376_v49  ;;  %374 = vadd.xlane.f32.xlu1 %v373_v50 }
 0x62f   :  { %v372_v51 = vpop.xlane.xlu0 %371  ;;  %v369_v52 = vpop.xlane.xlu1 %368 }
 0x630   :  { %3315 = vrcp.f32 %v372_v51 }
 0x631   :  { %3317 = vrcp.f32 %v369_v52 }
 0x633   :  { %v378_v53 = vpop.xlane.xlu0 %377  ;;  %v375_v54 = vpop.xlane.xlu1 %374 }
 0x634   :  { %3319 = vrcp.f32 %v378_v53 }
 0x635   :  { %3321 = vrcp.f32 %v375_v54 }
 0x63d   :  { %v3316_v55 = vpop.eup %3315 }
 0x63e   :  { %v3318_v56 = vpop.eup %3317  ;;  %v382_v57 = vmul.f32 %v3316_v55, %v364_v43 }
 0x63f   :  { %v380_v58 = vmul.f32 %v3318_v56, %v363_v44 }
 0x640   :  { %v388_v61 = vsel %vm105_vm0, %v382_v57, 0.0 }
 0x641   :  { %v3320_v59 = vpop.eup %3319  ;;  %v387_v60 = vsel %vm105_vm0, %v380_v58, 0.0 }
 0x642   :  { %v3322_v62 = vpop.eup %3321  ;;  %v386_v0 = vmul.f32 %v3320_v59, %v366_v47  ;;  %v389_v1 = vadd.f32 %v388_v61, %v387_v60 }
 0x643   :  { %v384_v63 = vmul.f32 %v3322_v62, %v365_v48 }
 0x644   :  { %v392_v4 = vsel %vm105_vm0, %v386_v0, 0.0 }
 0x645   :  { %v390_v2 = vsel %vm105_vm0, %v384_v63, 0.0 }
 0x646   :  { %v391_v3 = vadd.f32 %v390_v2, %v389_v1 }
 0x648   :  { %v393_v5 = vadd.f32 %v392_v4, %v391_v3 }
 0x64a   :  { %v394_v6 = vrot.slane %v393_v5, 4 }
 0x64c   :  { %v395_v7 = vadd.f32 %v394_v6, %v393_v5 }
 0x64e   :  { %v396_v8 = vrot.slane %v395_v7, 2 }
 0x650   :  { %v397_v9 = vadd.f32 %v396_v8, %v395_v7 }
 0x652   :  { %v398_v10 = vrot.slane %v397_v9, 1 }
 0x654   :  { %v399_v11 = vadd.f32 %v398_v10, %v397_v9 }
 0x656   :  { %3323 = vrcp.f32 %v399_v11 }
 0x663   :  { %v3324_v12 = vpop.eup %3323 }
 0x664   :  { %v402_v13 = vmul.f32 %v3324_v12, %v382_v57  ;;  %v401_v14 = vmul.f32 %v3324_v12, %v380_v58  ;;  %v404_v17 = vmul.f32 %v3324_v12, %v386_v0  ;;  %v403_v18 = vmul.f32 %v3324_v12, %v384_v63 }
 0x666   :  { %v408_v15 = vsel %vm105_vm0, %v402_v13, 0.0  ;;  %v405_v16 = vsel %vm105_vm0, %v401_v14, 0.0  ;;  %v414_v19 = vsel %vm105_vm0, %v404_v17, 0.0  ;;  %v411_v20 = vsel %vm105_vm0, %v403_v18, 0.0 }
 0x667   :  { %409 = vadd.xlane.f32.xlu0 %v408_v15  ;;  %406 = vadd.xlane.f32.xlu1 %v405_v16 }
 0x66b   :  { %415 = vadd.xlane.f32.xlu0 %v414_v19  ;;  %412 = vadd.xlane.f32.xlu1 %v411_v20 }
 0x6f0   :  { %v410_v21 = vpop.xlane.xlu0 %409  ;;  %v407_v22 = vpop.xlane.xlu1 %406 }
 0x6f1   :  { %3325 = vrcp.f32 %v410_v21 }
 0x6f2   :  { %3327 = vrcp.f32 %v407_v22 }
 0x6f4   :  { %v416_v23 = vpop.xlane.xlu0 %415  ;;  %v413_v24 = vpop.xlane.xlu1 %412 }
 0x6f5   :  { %3329 = vrcp.f32 %v416_v23 }
 0x6f6   :  { %3331 = vrcp.f32 %v413_v24 }
 0x6fe   :  { %v3326_v25 = vpop.eup %3325 }
 0x6ff   :  { %v3328_v26 = vpop.eup %3327  ;;  %v420_v27 = vmul.f32 %v3326_v25, %v402_v13 }
 0x700   :  { %v418_v28 = vmul.f32 %v3328_v26, %v401_v14 }
 0x701   :  { %v426_v31 = vsel %vm105_vm0, %v420_v27, 0.0 }
 0x702   :  { %v3330_v29 = vpop.eup %3329  ;;  %v425_v30 = vsel %vm105_vm0, %v418_v28, 0.0 }
 0x703   :  { %v3332_v32 = vpop.eup %3331  ;;  %v424_v34 = vmul.f32 %v3330_v29, %v404_v17  ;;  %v427_v35 = vadd.f32 %v426_v31, %v425_v30 }
 0x704   :  { %v422_v33 = vmul.f32 %v3332_v32, %v403_v18 }
 0x705   :  { %v430_v38 = vsel %vm105_vm0, %v424_v34, 0.0 }
 0x706   :  { %v428_v36 = vsel %vm105_vm0, %v422_v33, 0.0 }
 0x707   :  { %v429_v37 = vadd.f32 %v428_v36, %v427_v35 }
 0x709   :  { %v431_v39 = vadd.f32 %v430_v38, %v429_v37 }
 0x70b   :  { %v432_v40 = vrot.slane %v431_v39, 4 }
 0x70d   :  { %v433_v41 = vadd.f32 %v432_v40, %v431_v39 }
 0x70f   :  { %v434_v42 = vrot.slane %v433_v41, 2 }
 0x711   :  { %v435_v43 = vadd.f32 %v434_v42, %v433_v41 }
 0x713   :  { %v436_v44 = vrot.slane %v435_v43, 1 }
 0x715   :  { %v437_v45 = vadd.f32 %v436_v44, %v435_v43 }
 0x717   :  { %3333 = vrcp.f32 %v437_v45 }
 0x724   :  { %v3334_v46 = vpop.eup %3333 }
 0x725   :  { %v440_v47 = vmul.f32 %v3334_v46, %v420_v27  ;;  %v439_v48 = vmul.f32 %v3334_v46, %v418_v28  ;;  %v442_v51 = vmul.f32 %v3334_v46, %v424_v34  ;;  %v441_v52 = vmul.f32 %v3334_v46, %v422_v33 }
 0x727   :  { %v446_v49 = vsel %vm105_vm0, %v440_v47, 0.0  ;;  %v443_v50 = vsel %vm105_vm0, %v439_v48, 0.0  ;;  %v452_v53 = vsel %vm105_vm0, %v442_v51, 0.0  ;;  %v449_v54 = vsel %vm105_vm0, %v441_v52, 0.0 }
 0x728   :  { %447 = vadd.xlane.f32.xlu0 %v446_v49  ;;  %444 = vadd.xlane.f32.xlu1 %v443_v50 }
 0x72c   :  { %453 = vadd.xlane.f32.xlu0 %v452_v53  ;;  %450 = vadd.xlane.f32.xlu1 %v449_v54 }
 0x7b1   :  { %v448_v55 = vpop.xlane.xlu0 %447  ;;  %v445_v56 = vpop.xlane.xlu1 %444 }
 0x7b2   :  { %3335 = vrcp.f32 %v448_v55 }
 0x7b3   :  { %3337 = vrcp.f32 %v445_v56 }
 0x7b5   :  { %v454_v57 = vpop.xlane.xlu0 %453  ;;  %v451_v58 = vpop.xlane.xlu1 %450 }
 0x7b6   :  { %3339 = vrcp.f32 %v454_v57 }
 0x7b7   :  { %3341 = vrcp.f32 %v451_v58 }
 0x7bf   :  { %v3336_v59 = vpop.eup %3335 }
 0x7c0   :  { %v3338_v60 = vpop.eup %3337  ;;  %v458_v61 = vmul.f32 %v3336_v59, %v440_v47 }
 0x7c1   :  { %v456_v62 = vmul.f32 %v3338_v60, %v439_v48 }
 0x7c2   :  { %v464_v1 = vsel %vm105_vm0, %v458_v61, 0.0 }
 0x7c3   :  { %v3340_v63 = vpop.eup %3339  ;;  %v463_v0 = vsel %vm105_vm0, %v456_v62, 0.0 }
 0x7c4   :  { %v3342_v2 = vpop.eup %3341  ;;  %v462_v4 = vmul.f32 %v3340_v63, %v442_v51  ;;  %v465_v5 = vadd.f32 %v464_v1, %v463_v0 }
 0x7c5   :  { %v460_v3 = vmul.f32 %v3342_v2, %v441_v52 }
 0x7c6   :  { %v468_v8 = vsel %vm105_vm0, %v462_v4, 0.0 }
 0x7c7   :  { %v466_v6 = vsel %vm105_vm0, %v460_v3, 0.0 }
 0x7c8   :  { %v467_v7 = vadd.f32 %v466_v6, %v465_v5 }
 0x7ca   :  { %v469_v9 = vadd.f32 %v468_v8, %v467_v7 }
 0x7cc   :  { %v470_v10 = vrot.slane %v469_v9, 4 }
 0x7ce   :  { %v471_v11 = vadd.f32 %v470_v10, %v469_v9 }
 0x7d0   :  { %v472_v12 = vrot.slane %v471_v11, 2 }
 0x7d2   :  { %v473_v13 = vadd.f32 %v472_v12, %v471_v11 }
 0x7d4   :  { %v474_v14 = vrot.slane %v473_v13, 1 }
 0x7d6   :  { %v475_v15 = vadd.f32 %v474_v14, %v473_v13 }
 0x7d8   :  { %3343 = vrcp.f32 %v475_v15 }
 0x7e5   :  { %v3344_v16 = vpop.eup %3343 }
 0x7e6   :  { %v478_v17 = vmul.f32 %v3344_v16, %v458_v61  ;;  %v477_v18 = vmul.f32 %v3344_v16, %v456_v62  ;;  %v480_v21 = vmul.f32 %v3344_v16, %v462_v4  ;;  %v479_v22 = vmul.f32 %v3344_v16, %v460_v3 }
 0x7e8   :  { %v484_v19 = vsel %vm105_vm0, %v478_v17, 0.0  ;;  %v481_v20 = vsel %vm105_vm0, %v477_v18, 0.0  ;;  %v490_v23 = vsel %vm105_vm0, %v480_v21, 0.0  ;;  %v487_v24 = vsel %vm105_vm0, %v479_v22, 0.0 }
 0x7e9   :  { %485 = vadd.xlane.f32.xlu0 %v484_v19  ;;  %482 = vadd.xlane.f32.xlu1 %v481_v20 }
 0x7ed   :  { %491 = vadd.xlane.f32.xlu0 %v490_v23  ;;  %488 = vadd.xlane.f32.xlu1 %v487_v24 }
 0x872   :  { %v486_v25 = vpop.xlane.xlu0 %485  ;;  %v483_v26 = vpop.xlane.xlu1 %482 }
 0x873   :  { %3345 = vrcp.f32 %v486_v25 }
 0x874   :  { %3347 = vrcp.f32 %v483_v26 }
 0x876   :  { %v492_v27 = vpop.xlane.xlu0 %491  ;;  %v489_v28 = vpop.xlane.xlu1 %488 }
 0x877   :  { %3349 = vrcp.f32 %v492_v27 }
 0x878   :  { %3351 = vrcp.f32 %v489_v28 }
 0x880   :  { %v3346_v29 = vpop.eup %3345 }
 0x881   :  { %v3348_v30 = vpop.eup %3347  ;;  %v496_v31 = vmul.f32 %v3346_v29, %v478_v17 }
 0x882   :  { %v494_v32 = vmul.f32 %v3348_v30, %v477_v18 }
 0x883   :  { %v502_v35 = vsel %vm105_vm0, %v496_v31, 0.0 }
 0x884   :  { %v3350_v33 = vpop.eup %3349  ;;  %v501_v34 = vsel %vm105_vm0, %v494_v32, 0.0 }
 0x885   :  { %v3352_v36 = vpop.eup %3351  ;;  %v500_v38 = vmul.f32 %v3350_v33, %v480_v21  ;;  %v503_v39 = vadd.f32 %v502_v35, %v501_v34 }
 0x886   :  { %v498_v37 = vmul.f32 %v3352_v36, %v479_v22 }
 0x887   :  { %v506_v42 = vsel %vm105_vm0, %v500_v38, 0.0 }
 0x888   :  { %v504_v40 = vsel %vm105_vm0, %v498_v37, 0.0 }
 0x889   :  { %v505_v41 = vadd.f32 %v504_v40, %v503_v39 }
 0x88b   :  { %v507_v43 = vadd.f32 %v506_v42, %v505_v41 }
 0x88d   :  { %v508_v44 = vrot.slane %v507_v43, 4 }
 0x88f   :  { %v509_v45 = vadd.f32 %v508_v44, %v507_v43 }
 0x891   :  { %v510_v46 = vrot.slane %v509_v45, 2 }
 0x893   :  { %v511_v47 = vadd.f32 %v510_v46, %v509_v45 }
 0x895   :  { %v512_v48 = vrot.slane %v511_v47, 1 }
 0x897   :  { %v513_v49 = vadd.f32 %v512_v48, %v511_v47 }
 0x899   :  { %3353 = vrcp.f32 %v513_v49 }
 0x8a6   :  { %v3354_v50 = vpop.eup %3353 }
 0x8a7   :  { %v516_v51 = vmul.f32 %v3354_v50, %v496_v31  ;;  %v515_v52 = vmul.f32 %v3354_v50, %v494_v32  ;;  %v518_v55 = vmul.f32 %v3354_v50, %v500_v38  ;;  %v517_v56 = vmul.f32 %v3354_v50, %v498_v37 }
 0x8a9   :  { %v522_v53 = vsel %vm105_vm0, %v516_v51, 0.0  ;;  %v519_v54 = vsel %vm105_vm0, %v515_v52, 0.0  ;;  %v528_v57 = vsel %vm105_vm0, %v518_v55, 0.0  ;;  %v525_v58 = vsel %vm105_vm0, %v517_v56, 0.0 }
 0x8aa   :  { %523 = vadd.xlane.f32.xlu0 %v522_v53  ;;  %520 = vadd.xlane.f32.xlu1 %v519_v54 }
 0x8ae   :  { %529 = vadd.xlane.f32.xlu0 %v528_v57  ;;  %526 = vadd.xlane.f32.xlu1 %v525_v58 }
 0x933   :  { %v524_v59 = vpop.xlane.xlu0 %523  ;;  %v521_v60 = vpop.xlane.xlu1 %520 }
 0x934   :  { %3355 = vrcp.f32 %v524_v59 }
 0x935   :  { %3357 = vrcp.f32 %v521_v60 }
 0x937   :  { %v530_v61 = vpop.xlane.xlu0 %529  ;;  %v527_v62 = vpop.xlane.xlu1 %526 }
 0x938   :  { %3359 = vrcp.f32 %v530_v61 }
 0x939   :  { %3361 = vrcp.f32 %v527_v62 }
 0x941   :  { %v3356_v63 = vpop.eup %3355 }
 0x942   :  { %v3358_v0 = vpop.eup %3357  ;;  %v534_v1 = vmul.f32 %v3356_v63, %v516_v51 }
 0x943   :  { %v532_v2 = vmul.f32 %v3358_v0, %v515_v52 }
 0x944   :  { %v540_v5 = vsel %vm105_vm0, %v534_v1, 0.0 }
 0x945   :  { %v3360_v3 = vpop.eup %3359  ;;  %v539_v4 = vsel %vm105_vm0, %v532_v2, 0.0 }
 0x946   :  { %v3362_v6 = vpop.eup %3361  ;;  %v538_v8 = vmul.f32 %v3360_v3, %v518_v55  ;;  %v541_v9 = vadd.f32 %v540_v5, %v539_v4 }
 0x947   :  { %v536_v7 = vmul.f32 %v3362_v6, %v517_v56 }
 0x948   :  { %v544_v12 = vsel %vm105_vm0, %v538_v8, 0.0 }
 0x949   :  { %v542_v10 = vsel %vm105_vm0, %v536_v7, 0.0 }
 0x94a   :  { %v543_v11 = vadd.f32 %v542_v10, %v541_v9 }
 0x94c   :  { %v545_v13 = vadd.f32 %v544_v12, %v543_v11 }
 0x94e   :  { %v546_v14 = vrot.slane %v545_v13, 4 }
 0x950   :  { %v547_v15 = vadd.f32 %v546_v14, %v545_v13 }
 0x952   :  { %v548_v16 = vrot.slane %v547_v15, 2 }
 0x954   :  { %v549_v17 = vadd.f32 %v548_v16, %v547_v15 }
 0x956   :  { %v550_v18 = vrot.slane %v549_v17, 1 }
 0x958   :  { %v551_v19 = vadd.f32 %v550_v18, %v549_v17 }
 0x95a   :  { %3363 = vrcp.f32 %v551_v19 }
 0x967   :  { %v3364_v20 = vpop.eup %3363 }
 0x968   :  { %v554_v21 = vmul.f32 %v3364_v20, %v534_v1  ;;  %v553_v22 = vmul.f32 %v3364_v20, %v532_v2  ;;  %v556_v25 = vmul.f32 %v3364_v20, %v538_v8  ;;  %v555_v26 = vmul.f32 %v3364_v20, %v536_v7 }
 0x96a   :  { %v560_v23 = vsel %vm105_vm0, %v554_v21, 0.0  ;;  %v557_v24 = vsel %vm105_vm0, %v553_v22, 0.0  ;;  %v566_v27 = vsel %vm105_vm0, %v556_v25, 0.0  ;;  %v563_v28 = vsel %vm105_vm0, %v555_v26, 0.0 }
 0x96b   :  { %561 = vadd.xlane.f32.xlu0 %v560_v23  ;;  %558 = vadd.xlane.f32.xlu1 %v557_v24 }
 0x96f   :  { %567 = vadd.xlane.f32.xlu0 %v566_v27  ;;  %564 = vadd.xlane.f32.xlu1 %v563_v28 }
 0x9f4   :  { %v562_v29 = vpop.xlane.xlu0 %561  ;;  %v559_v30 = vpop.xlane.xlu1 %558 }
 0x9f5   :  { %3365 = vrcp.f32 %v562_v29 }
 0x9f6   :  { %3367 = vrcp.f32 %v559_v30 }
 0x9f8   :  { %v568_v31 = vpop.xlane.xlu0 %567  ;;  %v565_v32 = vpop.xlane.xlu1 %564 }
 0x9f9   :  { %3369 = vrcp.f32 %v568_v31 }
 0x9fa   :  { %3371 = vrcp.f32 %v565_v32 }
 0xa02   :  { %v3366_v33 = vpop.eup %3365 }
 0xa03   :  { %v3368_v34 = vpop.eup %3367  ;;  %v572_v35 = vmul.f32 %v3366_v33, %v554_v21 }
 0xa04   :  { %v570_v36 = vmul.f32 %v3368_v34, %v553_v22 }
 0xa05   :  { %v578_v39 = vsel %vm105_vm0, %v572_v35, 0.0 }
 0xa06   :  { %v3370_v37 = vpop.eup %3369  ;;  %v577_v38 = vsel %vm105_vm0, %v570_v36, 0.0 }
 0xa07   :  { %v3372_v40 = vpop.eup %3371  ;;  %v576_v42 = vmul.f32 %v3370_v37, %v556_v25  ;;  %v579_v43 = vadd.f32 %v578_v39, %v577_v38 }
 0xa08   :  { %v574_v41 = vmul.f32 %v3372_v40, %v555_v26 }
 0xa09   :  { %v582_v46 = vsel %vm105_vm0, %v576_v42, 0.0 }
 0xa0a   :  { %v580_v44 = vsel %vm105_vm0, %v574_v41, 0.0 }
 0xa0b   :  { %v581_v45 = vadd.f32 %v580_v44, %v579_v43 }
 0xa0d   :  { %v583_v47 = vadd.f32 %v582_v46, %v581_v45 }
 0xa0f   :  { %v584_v48 = vrot.slane %v583_v47, 4 }
 0xa11   :  { %v585_v49 = vadd.f32 %v584_v48, %v583_v47 }
 0xa13   :  { %v586_v50 = vrot.slane %v585_v49, 2 }
 0xa15   :  { %v587_v51 = vadd.f32 %v586_v50, %v585_v49 }
 0xa17   :  { %v588_v52 = vrot.slane %v587_v51, 1 }
 0xa19   :  { %v589_v53 = vadd.f32 %v588_v52, %v587_v51 }
 0xa1b   :  { %3373 = vrcp.f32 %v589_v53 }
 0xa28   :  { %v3374_v54 = vpop.eup %3373 }
 0xa29   :  { %v592_v55 = vmul.f32 %v3374_v54, %v572_v35  ;;  %v591_v56 = vmul.f32 %v3374_v54, %v570_v36  ;;  %v594_v59 = vmul.f32 %v3374_v54, %v576_v42  ;;  %v593_v60 = vmul.f32 %v3374_v54, %v574_v41 }
 0xa2b   :  { %v598_v57 = vsel %vm105_vm0, %v592_v55, 0.0  ;;  %v595_v58 = vsel %vm105_vm0, %v591_v56, 0.0  ;;  %v604_v61 = vsel %vm105_vm0, %v594_v59, 0.0  ;;  %v601_v62 = vsel %vm105_vm0, %v593_v60, 0.0 }
 0xa2c   :  { %599 = vadd.xlane.f32.xlu0 %v598_v57  ;;  %596 = vadd.xlane.f32.xlu1 %v595_v58 }
 0xa30   :  { %605 = vadd.xlane.f32.xlu0 %v604_v61  ;;  %602 = vadd.xlane.f32.xlu1 %v601_v62 }
 0xab5   :  { %v600_v63 = vpop.xlane.xlu0 %599  ;;  %v597_v0 = vpop.xlane.xlu1 %596 }
 0xab6   :  { %3375 = vrcp.f32 %v600_v63 }
 0xab7   :  { %3377 = vrcp.f32 %v597_v0 }
 0xab9   :  { %v606_v1 = vpop.xlane.xlu0 %605  ;;  %v603_v2 = vpop.xlane.xlu1 %602 }
 0xaba   :  { %3379 = vrcp.f32 %v606_v1 }
 0xabb   :  { %3381 = vrcp.f32 %v603_v2 }
 0xac3   :  { %v3376_v3 = vpop.eup %3375 }
 0xac4   :  { %v3378_v4 = vpop.eup %3377  ;;  %v610_v5 = vmul.f32 %v3376_v3, %v592_v55 }
 0xac5   :  { %v608_v6 = vmul.f32 %v3378_v4, %v591_v56 }
 0xac6   :  { %v616_v9 = vsel %vm105_vm0, %v610_v5, 0.0 }
 0xac7   :  { %v3380_v7 = vpop.eup %3379  ;;  %v615_v8 = vsel %vm105_vm0, %v608_v6, 0.0 }
 0xac8   :  { %v3382_v10 = vpop.eup %3381  ;;  %v614_v12 = vmul.f32 %v3380_v7, %v594_v59  ;;  %v617_v13 = vadd.f32 %v616_v9, %v615_v8 }
 0xac9   :  { %v612_v11 = vmul.f32 %v3382_v10, %v593_v60 }
 0xaca   :  { %v620_v16 = vsel %vm105_vm0, %v614_v12, 0.0 }
 0xacb   :  { %v618_v14 = vsel %vm105_vm0, %v612_v11, 0.0 }
 0xacc   :  { %v619_v15 = vadd.f32 %v618_v14, %v617_v13 }
 0xace   :  { %v621_v17 = vadd.f32 %v620_v16, %v619_v15 }
 0xad0   :  { %v622_v18 = vrot.slane %v621_v17, 4 }
 0xad2   :  { %v623_v19 = vadd.f32 %v622_v18, %v621_v17 }
 0xad4   :  { %v624_v20 = vrot.slane %v623_v19, 2 }
 0xad6   :  { %v625_v21 = vadd.f32 %v624_v20, %v623_v19 }
 0xad8   :  { %v626_v22 = vrot.slane %v625_v21, 1 }
 0xada   :  { %v627_v23 = vadd.f32 %v626_v22, %v625_v21 }
 0xadc   :  { %3383 = vrcp.f32 %v627_v23 }
 0xae9   :  { %v3384_v24 = vpop.eup %3383 }
 0xaea   :  { %v630_v25 = vmul.f32 %v3384_v24, %v610_v5  ;;  %v629_v26 = vmul.f32 %v3384_v24, %v608_v6  ;;  %v632_v29 = vmul.f32 %v3384_v24, %v614_v12  ;;  %v631_v30 = vmul.f32 %v3384_v24, %v612_v11 }
 0xaec   :  { %v636_v27 = vsel %vm105_vm0, %v630_v25, 0.0  ;;  %v633_v28 = vsel %vm105_vm0, %v629_v26, 0.0  ;;  %v642_v31 = vsel %vm105_vm0, %v632_v29, 0.0  ;;  %v639_v32 = vsel %vm105_vm0, %v631_v30, 0.0 }
 0xaed   :  { %637 = vadd.xlane.f32.xlu0 %v636_v27  ;;  %634 = vadd.xlane.f32.xlu1 %v633_v28 }
 0xaf1   :  { %643 = vadd.xlane.f32.xlu0 %v642_v31  ;;  %640 = vadd.xlane.f32.xlu1 %v639_v32 }
 0xb76   :  { %v638_v33 = vpop.xlane.xlu0 %637  ;;  %v635_v34 = vpop.xlane.xlu1 %634 }
 0xb77   :  { %3385 = vrcp.f32 %v638_v33 }
 0xb78   :  { %3387 = vrcp.f32 %v635_v34 }
 0xb7a   :  { %v644_v35 = vpop.xlane.xlu0 %643  ;;  %v641_v36 = vpop.xlane.xlu1 %640 }
 0xb7b   :  { %3389 = vrcp.f32 %v644_v35 }
 0xb7c   :  { %3391 = vrcp.f32 %v641_v36 }
 0xb84   :  { %v3386_v37 = vpop.eup %3385 }
 0xb85   :  { %v3388_v38 = vpop.eup %3387  ;;  %v648_v39 = vmul.f32 %v3386_v37, %v630_v25 }
 0xb86   :  { %v646_v40 = vmul.f32 %v3388_v38, %v629_v26 }
 0xb87   :  { %v654_v43 = vsel %vm105_vm0, %v648_v39, 0.0 }
 0xb88   :  { %v3390_v41 = vpop.eup %3389  ;;  %v653_v42 = vsel %vm105_vm0, %v646_v40, 0.0 }
 0xb89   :  { %v3392_v44 = vpop.eup %3391  ;;  %v652_v46 = vmul.f32 %v3390_v41, %v632_v29  ;;  %v655_v47 = vadd.f32 %v654_v43, %v653_v42 }
 0xb8a   :  { %v650_v45 = vmul.f32 %v3392_v44, %v631_v30 }
 0xb8b   :  { %v658_v50 = vsel %vm105_vm0, %v652_v46, 0.0 }
 0xb8c   :  { %v656_v48 = vsel %vm105_vm0, %v650_v45, 0.0 }
 0xb8d   :  { %v657_v49 = vadd.f32 %v656_v48, %v655_v47 }
 0xb8f   :  { %v659_v51 = vadd.f32 %v658_v50, %v657_v49 }
 0xb91   :  { %v660_v52 = vrot.slane %v659_v51, 4 }
 0xb93   :  { %v661_v53 = vadd.f32 %v660_v52, %v659_v51 }
 0xb95   :  { %v662_v54 = vrot.slane %v661_v53, 2 }
 0xb97   :  { %v663_v55 = vadd.f32 %v662_v54, %v661_v53 }
 0xb99   :  { %v664_v56 = vrot.slane %v663_v55, 1 }
 0xb9b   :  { %v665_v57 = vadd.f32 %v664_v56, %v663_v55 }
 0xb9d   :  { %3393 = vrcp.f32 %v665_v57 }
 0xbaa   :  { %v3394_v58 = vpop.eup %3393 }
 0xbab   :  { %v668_v59 = vmul.f32 %v3394_v58, %v648_v39  ;;  %v667_v60 = vmul.f32 %v3394_v58, %v646_v40  ;;  %v670_v63 = vmul.f32 %v3394_v58, %v652_v46  ;;  %v669_v0 = vmul.f32 %v3394_v58, %v650_v45 }
 0xbad   :  { %v674_v61 = vsel %vm105_vm0, %v668_v59, 0.0  ;;  %v671_v62 = vsel %vm105_vm0, %v667_v60, 0.0  ;;  %v680_v1 = vsel %vm105_vm0, %v670_v63, 0.0  ;;  %v677_v2 = vsel %vm105_vm0, %v669_v0, 0.0 }
 0xbae   :  { %675 = vadd.xlane.f32.xlu0 %v674_v61  ;;  %672 = vadd.xlane.f32.xlu1 %v671_v62 }
 0xbb2   :  { %681 = vadd.xlane.f32.xlu0 %v680_v1  ;;  %678 = vadd.xlane.f32.xlu1 %v677_v2 }
 0xc37   :  { %v676_v3 = vpop.xlane.xlu0 %675  ;;  %v673_v4 = vpop.xlane.xlu1 %672 }
 0xc38   :  { %3395 = vrcp.f32 %v676_v3 }
 0xc39   :  { %3397 = vrcp.f32 %v673_v4 }
 0xc3b   :  { %v682_v5 = vpop.xlane.xlu0 %681  ;;  %v679_v6 = vpop.xlane.xlu1 %678 }
 0xc3c   :  { %3399 = vrcp.f32 %v682_v5 }
 0xc3d   :  { %3401 = vrcp.f32 %v679_v6 }
 0xc45   :  { %v3396_v7 = vpop.eup %3395 }
 0xc46   :  { %v3398_v8 = vpop.eup %3397  ;;  %v686_v9 = vmul.f32 %v3396_v7, %v668_v59 }
 0xc47   :  { %v684_v10 = vmul.f32 %v3398_v8, %v667_v60 }
 0xc48   :  { %v692_v13 = vsel %vm105_vm0, %v686_v9, 0.0 }
 0xc49   :  { %v3400_v11 = vpop.eup %3399  ;;  %v691_v12 = vsel %vm105_vm0, %v684_v10, 0.0 }
 0xc4a   :  { %v3402_v14 = vpop.eup %3401  ;;  %v690_v16 = vmul.f32 %v3400_v11, %v670_v63  ;;  %v693_v17 = vadd.f32 %v692_v13, %v691_v12 }
 0xc4b   :  { %v688_v15 = vmul.f32 %v3402_v14, %v669_v0 }
 0xc4c   :  { %v696_v20 = vsel %vm105_vm0, %v690_v16, 0.0 }
 0xc4d   :  { %v694_v18 = vsel %vm105_vm0, %v688_v15, 0.0 }
 0xc4e   :  { %v695_v19 = vadd.f32 %v694_v18, %v693_v17 }
 0xc50   :  { %v697_v21 = vadd.f32 %v696_v20, %v695_v19 }
 0xc52   :  { %v698_v22 = vrot.slane %v697_v21, 4 }
 0xc54   :  { %v699_v23 = vadd.f32 %v698_v22, %v697_v21 }
 0xc56   :  { %v700_v24 = vrot.slane %v699_v23, 2 }
 0xc58   :  { %v701_v25 = vadd.f32 %v700_v24, %v699_v23 }
 0xc5a   :  { %v702_v26 = vrot.slane %v701_v25, 1 }
 0xc5c   :  { %v703_v27 = vadd.f32 %v702_v26, %v701_v25 }
 0xc5e   :  { %3403 = vrcp.f32 %v703_v27 }
 0xc6b   :  { %v3404_v28 = vpop.eup %3403 }
 0xc6c   :  { %v706_v29 = vmul.f32 %v3404_v28, %v686_v9  ;;  %v705_v30 = vmul.f32 %v3404_v28, %v684_v10  ;;  %v708_v33 = vmul.f32 %v3404_v28, %v690_v16  ;;  %v707_v34 = vmul.f32 %v3404_v28, %v688_v15 }
 0xc6e   :  { %v712_v31 = vsel %vm105_vm0, %v706_v29, 0.0  ;;  %v709_v32 = vsel %vm105_vm0, %v705_v30, 0.0  ;;  %v718_v35 = vsel %vm105_vm0, %v708_v33, 0.0  ;;  %v715_v36 = vsel %vm105_vm0, %v707_v34, 0.0 }
 0xc6f   :  { %713 = vadd.xlane.f32.xlu0 %v712_v31  ;;  %710 = vadd.xlane.f32.xlu1 %v709_v32 }
 0xc73   :  { %719 = vadd.xlane.f32.xlu0 %v718_v35  ;;  %716 = vadd.xlane.f32.xlu1 %v715_v36 }
 0xcf8   :  { %v714_v37 = vpop.xlane.xlu0 %713  ;;  %v711_v38 = vpop.xlane.xlu1 %710 }
 0xcf9   :  { %3405 = vrcp.f32 %v714_v37 }
 0xcfa   :  { %3407 = vrcp.f32 %v711_v38 }
 0xcfc   :  { %v720_v39 = vpop.xlane.xlu0 %719  ;;  %v717_v40 = vpop.xlane.xlu1 %716 }
 0xcfd   :  { %3409 = vrcp.f32 %v720_v39 }
 0xcfe   :  { %3411 = vrcp.f32 %v717_v40 }
 0xd06   :  { %v3406_v41 = vpop.eup %3405 }
 0xd07   :  { %v3408_v42 = vpop.eup %3407  ;;  %v724_v43 = vmul.f32 %v3406_v41, %v706_v29 }
 0xd08   :  { %v722_v44 = vmul.f32 %v3408_v42, %v705_v30 }
 0xd09   :  { %v730_v47 = vsel %vm105_vm0, %v724_v43, 0.0 }
 0xd0a   :  { %v3410_v45 = vpop.eup %3409  ;;  %v729_v46 = vsel %vm105_vm0, %v722_v44, 0.0 }
 0xd0b   :  { %v3412_v48 = vpop.eup %3411  ;;  %v728_v50 = vmul.f32 %v3410_v45, %v708_v33  ;;  %v731_v51 = vadd.f32 %v730_v47, %v729_v46 }
 0xd0c   :  { %v726_v49 = vmul.f32 %v3412_v48, %v707_v34 }
 0xd0d   :  { %v734_v54 = vsel %vm105_vm0, %v728_v50, 0.0 }
 0xd0e   :  { %v732_v52 = vsel %vm105_vm0, %v726_v49, 0.0 }
 0xd0f   :  { %v733_v53 = vadd.f32 %v732_v52, %v731_v51 }
 0xd11   :  { %v735_v55 = vadd.f32 %v734_v54, %v733_v53 }
 0xd13   :  { %v736_v56 = vrot.slane %v735_v55, 4 }
 0xd15   :  { %v737_v57 = vadd.f32 %v736_v56, %v735_v55 }
 0xd17   :  { %v738_v58 = vrot.slane %v737_v57, 2 }
 0xd19   :  { %v739_v59 = vadd.f32 %v738_v58, %v737_v57 }
 0xd1b   :  { %v740_v60 = vrot.slane %v739_v59, 1 }
 0xd1d   :  { %v741_v61 = vadd.f32 %v740_v60, %v739_v59 }
 0xd1f   :  { %3413 = vrcp.f32 %v741_v61 }
 0xd2c   :  { %v3414_v62 = vpop.eup %3413 }
 0xd2d   :  { %v744_v63 = vmul.f32 %v3414_v62, %v724_v43  ;;  %v743_v0 = vmul.f32 %v3414_v62, %v722_v44  ;;  %v746_v3 = vmul.f32 %v3414_v62, %v728_v50  ;;  %v745_v4 = vmul.f32 %v3414_v62, %v726_v49 }
 0xd2f   :  { %v750_v1 = vsel %vm105_vm0, %v744_v63, 0.0  ;;  %v747_v2 = vsel %vm105_vm0, %v743_v0, 0.0  ;;  %v756_v5 = vsel %vm105_vm0, %v746_v3, 0.0  ;;  %v753_v6 = vsel %vm105_vm0, %v745_v4, 0.0 }
 0xd30   :  { %751 = vadd.xlane.f32.xlu0 %v750_v1  ;;  %748 = vadd.xlane.f32.xlu1 %v747_v2 }
 0xd34   :  { %757 = vadd.xlane.f32.xlu0 %v756_v5  ;;  %754 = vadd.xlane.f32.xlu1 %v753_v6 }
 0xdb9   :  { %v752_v7 = vpop.xlane.xlu0 %751  ;;  %v749_v8 = vpop.xlane.xlu1 %748 }
 0xdba   :  { %3415 = vrcp.f32 %v752_v7 }
 0xdbb   :  { %3417 = vrcp.f32 %v749_v8 }
 0xdbd   :  { %v758_v9 = vpop.xlane.xlu0 %757  ;;  %v755_v10 = vpop.xlane.xlu1 %754 }
 0xdbe   :  { %3419 = vrcp.f32 %v758_v9 }
 0xdbf   :  { %3421 = vrcp.f32 %v755_v10 }
 0xdc7   :  { %v3416_v11 = vpop.eup %3415 }
 0xdc8   :  { %v3418_v12 = vpop.eup %3417  ;;  %v762_v13 = vmul.f32 %v3416_v11, %v744_v63 }
 0xdc9   :  { %v760_v14 = vmul.f32 %v3418_v12, %v743_v0 }
 0xdca   :  { %v768_v17 = vsel %vm105_vm0, %v762_v13, 0.0 }
 0xdcb   :  { %v3420_v15 = vpop.eup %3419  ;;  %v767_v16 = vsel %vm105_vm0, %v760_v14, 0.0 }
 0xdcc   :  { %v3422_v18 = vpop.eup %3421  ;;  %v766_v20 = vmul.f32 %v3420_v15, %v746_v3  ;;  %v769_v21 = vadd.f32 %v768_v17, %v767_v16 }
 0xdcd   :  { %v764_v19 = vmul.f32 %v3422_v18, %v745_v4 }
 0xdce   :  { %v772_v24 = vsel %vm105_vm0, %v766_v20, 0.0 }
 0xdcf   :  { %v770_v22 = vsel %vm105_vm0, %v764_v19, 0.0 }
 0xdd0   :  { %v771_v23 = vadd.f32 %v770_v22, %v769_v21 }
 0xdd2   :  { %v773_v25 = vadd.f32 %v772_v24, %v771_v23 }
 0xdd4   :  { %v774_v26 = vrot.slane %v773_v25, 4 }
 0xdd6   :  { %v775_v27 = vadd.f32 %v774_v26, %v773_v25 }
 0xdd8   :  { %v776_v28 = vrot.slane %v775_v27, 2 }
 0xdda   :  { %v777_v29 = vadd.f32 %v776_v28, %v775_v27 }
 0xddc   :  { %v778_v30 = vrot.slane %v777_v29, 1 }
 0xdde   :  { %v779_v31 = vadd.f32 %v778_v30, %v777_v29 }
 0xde0   :  { %3423 = vrcp.f32 %v779_v31 }
 0xded   :  { %v3424_v32 = vpop.eup %3423 }
 0xdee   :  { %v782_v33 = vmul.f32 %v3424_v32, %v762_v13  ;;  %v781_v34 = vmul.f32 %v3424_v32, %v760_v14  ;;  %v784_v37 = vmul.f32 %v3424_v32, %v766_v20  ;;  %v783_v38 = vmul.f32 %v3424_v32, %v764_v19 }
 0xdf0   :  { %v788_v35 = vsel %vm105_vm0, %v782_v33, 0.0  ;;  %v785_v36 = vsel %vm105_vm0, %v781_v34, 0.0  ;;  %v794_v39 = vsel %vm105_vm0, %v784_v37, 0.0  ;;  %v791_v40 = vsel %vm105_vm0, %v783_v38, 0.0 }
 0xdf1   :  { %789 = vadd.xlane.f32.xlu0 %v788_v35  ;;  %786 = vadd.xlane.f32.xlu1 %v785_v36 }
 0xdf5   :  { %795 = vadd.xlane.f32.xlu0 %v794_v39  ;;  %792 = vadd.xlane.f32.xlu1 %v791_v40 }
 0xe7a   :  { %v790_v41 = vpop.xlane.xlu0 %789  ;;  %v787_v42 = vpop.xlane.xlu1 %786 }
 0xe7b   :  { %3425 = vrcp.f32 %v790_v41 }
 0xe7c   :  { %3427 = vrcp.f32 %v787_v42 }
 0xe7e   :  { %v796_v43 = vpop.xlane.xlu0 %795  ;;  %v793_v44 = vpop.xlane.xlu1 %792 }
 0xe7f   :  { %3429 = vrcp.f32 %v796_v43 }
 0xe80   :  { %3431 = vrcp.f32 %v793_v44 }
 0xe88   :  { %v3426_v45 = vpop.eup %3425 }
 0xe89   :  { %v3428_v46 = vpop.eup %3427  ;;  %v800_v47 = vmul.f32 %v3426_v45, %v782_v33  ;;  %v899_v45 = vlaneseq }
 0xe8a   :  { %v798_v48 = vmul.f32 %v3428_v46, %v781_v34 }
 0xe8b   :  { %v806_v51 = vsel %vm105_vm0, %v800_v47, 0.0  ;;  %v900_v46 = vshrl.u32 %v899_v45, 7 }
 0xe8c   :  { %v3430_v49 = vpop.eup %3429  ;;  %v805_v50 = vsel %vm105_vm0, %v798_v48, 0.0 }
 0xe8d   :  { %v3432_v52 = vpop.eup %3431  ;;  %v804_v54 = vmul.f32 %v3430_v49, %v784_v37  ;;  %v807_v55 = vadd.f32 %v806_v51, %v805_v50  ;;  %v902_v49 = vadd.s32 16, %v900_v46  ;;  %v901_v50 = vadd.s32 8, %v900_v46 }
 0xe8e   :  { %v802_v53 = vmul.f32 %v3432_v52, %v783_v38  ;;  %v3616_v51 = vmov 1.0  }
 0xe8f   :  { %v810_v58 = vsel %vm105_vm0, %v804_v54, 0.0 }
 0xe90   :  { %v808_v56 = vsel %vm105_vm0, %v802_v53, 0.0 }
 0xe91   :  { %v809_v57 = vadd.f32 %v808_v56, %v807_v55 }
 0xe93   :  { %v811_v59 = vadd.f32 %v810_v58, %v809_v57 }
 0xe95   :  { %v812_v60 = vrot.slane %v811_v59, 4 }
 0xe97   :  { %v813_v61 = vadd.f32 %v812_v60, %v811_v59 }
 0xe99   :  { %v814_v62 = vrot.slane %v813_v61, 2 }
 0xe9b   :  { %v815_v63 = vadd.f32 %v814_v62, %v813_v61 }
 0xe9d   :  { %v816_v0 = vrot.slane %v815_v63, 1 }
 0xe9f   :  { %v817_v1 = vadd.f32 %v816_v0, %v815_v63 }
 0xea1   :  { %3433 = vrcp.f32 %v817_v1 }
 0xeae   :  { %v3434_v2 = vpop.eup %3433 }
 0xeaf   :  { %v820_v3 = vmul.f32 %v3434_v2, %v800_v47  ;;  %v819_v4 = vmul.f32 %v3434_v2, %v798_v48  ;;  %v822_v7 = vmul.f32 %v3434_v2, %v804_v54  ;;  %v821_v8 = vmul.f32 %v3434_v2, %v802_v53 }
 0xeb0   :  { %v905_v47 = vand.u32 127, %v899_v45  ;;  %v903_v48 = vadd.s32 24, %v900_v46  ;;  %v1184_v45 = vld [vmem:[#allocation14 + $0x10] sm:$0xff] }
 0xeb1   :  { %v826_v5 = vsel %vm105_vm0, %v820_v3, 0.0  ;;  %v823_v6 = vsel %vm105_vm0, %v819_v4, 0.0  ;;  %v832_v9 = vsel %vm105_vm0, %v822_v7, 0.0  ;;  %v829_v10 = vsel %vm105_vm0, %v821_v8, 0.0 }
 0xeb2   :  { %827 = vadd.xlane.f32.xlu0 %v826_v5  ;;  %824 = vadd.xlane.f32.xlu1 %v823_v6  ;;  %vm909_vm1 = vcmp.le.s32.totalorder %v903_v48, %v905_v47  ;;  %vm908_vm2 = vcmp.le.s32.totalorder %v902_v49, %v905_v47  ;;  %vm907_vm3 = vcmp.le.s32.totalorder %v901_v50, %v905_v47 }
 0xeb3   :  { %3008 = vmatprep.subr.msk.mxu0 %vm909_vm1, %v3616_v51  ;;  %vm906_vm4 = vcmp.le.s32.totalorder %v900_v46, %v905_v47  ;;  %v1224_v46 = vld [vmem:[%s4263_s6 + $0x10] sm:$0xff] }
 0xeb4   :  { %3009 = vmatpush3.msk.msra.mxu0 %vm909_vm1, %v3616_v51 }
 0xeb5   :  { %3010 = vmatprep.subr.msk.mxu0 %vm908_vm2, %v3616_v51 }
 0xeb6   :  { %833 = vadd.xlane.f32.xlu0 %v832_v9  ;;  %830 = vadd.xlane.f32.xlu1 %v829_v10 }
 0xeb7   :  { %3011 = vmatpush3.msk.msra.mxu0 %vm908_vm2, %v3616_v51 }
 0xeb8   :  { %3012 = vmatprep.subr.msk.mxu0 %vm907_vm3, %v3616_v51 }
 0xeb9   :  { %3013 = vmatpush3.msk.msra.mxu0 %vm907_vm3, %v3616_v51 }
 0xeba   :  { %3014 = vmatprep.subr.msk.mxu0 %vm906_vm4, %v3616_v51 }
 0xebb   :  { %3015 = vmatpush3.msk.msra.mxu0 %vm906_vm4, %v3616_v51 }
 0xf3b   :  { %v828_v11 = vpop.xlane.xlu0 %827  ;;  %v825_v12 = vpop.xlane.xlu1 %824 }
 0xf3c   :  { %3435 = vrcp.f32 %v828_v11 }
 0xf3d   :  { %3437 = vrcp.f32 %v825_v12 }
 0xf3f   :  { %v834_v13 = vpop.xlane.xlu0 %833  ;;  %v831_v14 = vpop.xlane.xlu1 %830 }
 0xf40   :  { %3439 = vrcp.f32 %v834_v13 }
 0xf41   :  { %3441 = vrcp.f32 %v831_v14 }
 0xf49   :  { %v3436_v15 = vpop.eup %3435 }
 0xf4a   :  { %v3438_v16 = vpop.eup %3437  ;;  %v838_v17 = vmul.f32 %v3436_v15, %v820_v3 }
 0xf4b   :  { %v836_v18 = vmul.f32 %v3438_v16, %v819_v4 }
 0xf4c   :  { %v844_v21 = vsel %vm105_vm0, %v838_v17, 0.0 }
 0xf4d   :  { %v3440_v19 = vpop.eup %3439  ;;  %v843_v20 = vsel %vm105_vm0, %v836_v18, 0.0 }
 0xf4e   :  { %v3442_v22 = vpop.eup %3441  ;;  %v842_v24 = vmul.f32 %v3440_v19, %v822_v7  ;;  %v845_v25 = vadd.f32 %v844_v21, %v843_v20 }
 0xf4f   :  { %v840_v23 = vmul.f32 %v3442_v22, %v821_v8  ;;  %v1113_v22 = vld [vmem:[#allocation9 + $0x8] sm:$0xff] }
 0xf50   :  { %v848_v28 = vsel %vm105_vm0, %v842_v24, 0.0 }
 0xf51   :  { %v846_v26 = vsel %vm105_vm0, %v840_v23, 0.0 }
 0xf52   :  { %v847_v27 = vadd.f32 %v846_v26, %v845_v25  ;;  %v1125_v25 = vld [vmem:[#allocation11 + $0x8] sm:$0xff] }
 0xf54   :  { %v849_v29 = vadd.f32 %v848_v28, %v847_v27  ;;  %v1112_v27 = vld [vmem:[#allocation9] sm:$0xff] }
 0xf55   :  { %v1182_v28 = vld [vmem:[#allocation14] sm:$0xff] }
 0xf56   :  { %v850_v30 = vrot.slane %v849_v29, 4 }
 0xf58   :  { %v851_v31 = vadd.f32 %v850_v30, %v849_v29  ;;  %v1222_v29 = vld [vmem:[%s4263_s6] sm:$0xff] }
 0xf5a   :  { %v852_v32 = vrot.slane %v851_v31, 2 }
 0xf5c   :  { %v853_v33 = vadd.f32 %v852_v32, %v851_v31 }
 0xf5e   :  { %v854_v34 = vrot.slane %v853_v33, 1 }
 0xf60   :  { %v855_v35 = vadd.f32 %v854_v34, %v853_v33  ;;  %v1115_v34 = vld [vmem:[#allocation9 + $0x18] sm:$0xff] }
 0xf62   :  { %3443 = vrcp.f32 %v855_v35 }
 0xf6f   :  { %v3444_v36 = vpop.eup %3443 }
 0xf70   :  { %v858_v37 = vmul.f32 %v3444_v36, %v838_v17  ;;  %v857_v38 = vmul.f32 %v3444_v36, %v836_v18  ;;  %v860_v41 = vmul.f32 %v3444_v36, %v842_v24  ;;  %v859_v42 = vmul.f32 %v3444_v36, %v840_v23  ;;  %v1183_v23 = vld [vmem:[#allocation14 + $0x8] sm:$0xff]  ;;  %v1223_v24 = vld [vmem:[%s4263_s6 + $0x8] sm:$0xff]  ;;  %v1185_v36 = vld [vmem:[#allocation14 + $0x18] sm:$0xff] }
 0xf72   :  { %v864_v39 = vsel %vm105_vm0, %v858_v37, 0.0  ;;  %v861_v40 = vsel %vm105_vm0, %v857_v38, 0.0  ;;  %v870_v43 = vsel %vm105_vm0, %v860_v41, 0.0  ;;  %v867_v44 = vsel %vm105_vm0, %v859_v42, 0.0 }
 0xf73   :  { %865 = vadd.xlane.f32.xlu0 %v864_v39  ;;  %862 = vadd.xlane.f32.xlu1 %v861_v40 }
 0xf77   :  { %871 = vadd.xlane.f32.xlu0 %v870_v43  ;;  %868 = vadd.xlane.f32.xlu1 %v867_v44  ;;  %v1114_v44 = vld [vmem:[#allocation9 + $0x10] sm:$0xff] }
 0xffc   :  { %v866_v52 = vpop.xlane.xlu0 %865  ;;  %v863_v53 = vpop.xlane.xlu1 %862 }
 0xffd   :  { %3445 = vrcp.f32 %v866_v52 }
 0xffe   :  { %3447 = vrcp.f32 %v863_v53  ;;  %v1154_v53 = vld [vmem:[#allocation12 + $0x8] sm:$0xff] }
0x1000   :  { %v872_v54 = vpop.xlane.xlu0 %871  ;;  %v869_v55 = vpop.xlane.xlu1 %868 }
0x1001   :  { %3449 = vrcp.f32 %v872_v54 }
0x1002   :  { %3451 = vrcp.f32 %v869_v55 }
0x100a   :  { %v3446_v56 = vpop.eup %3445 }
0x100b   :  { %v3448_v57 = vpop.eup %3447  ;;  %v876_v58 = vmul.f32 %v3446_v56, %v858_v37  ;;  %v1225_v37 = vld [vmem:[%s4263_s6 + $0x18] sm:$0xff]  ;;  %s3618_s6 = smov 64  }
0x100c   :  { %v874_v59 = vmul.f32 %v3448_v57, %v857_v38  ;;  %v1156_v38 = vld [vmem:[#allocation12 + $0x18] sm:$0xff]  ;;  %v1126_v57 = vld [vmem:[#allocation11 + $0x10] sm:$0xff] }
0x100d   :  { %v882_v62 = vsel %vm105_vm0, %v876_v58, 0.0 }
0x100e   :  { %v3450_v60 = vpop.eup %3449  ;;  %v881_v61 = vsel %vm105_vm0, %v874_v59, 0.0 }
0x100f   :  { %v3452_v63 = vpop.eup %3451  ;;  %v880_v0 = vmul.f32 %v3450_v60, %v860_v41  ;;  %v883_v2 = vadd.f32 %v882_v62, %v881_v61  ;;  %v1153_v60 = vld [vmem:[#allocation12] sm:$0xff]  ;;  %v1155_v61 = vld [vmem:[#allocation12 + $0x10] sm:$0xff] }
0x1010   :  { %v878_v1 = vmul.f32 %v3452_v63, %v859_v42  ;;  %v1127_v42 = vld [vmem:[#allocation11 + $0x18] sm:$0xff] }
0x1011   :  { %v886_v5 = vsel %vm105_vm0, %v880_v0, 0.0 }
0x1012   :  { %v884_v3 = vsel %vm105_vm0, %v878_v1, 0.0 }
0x1013   :  { %v885_v4 = vadd.f32 %v884_v3, %v883_v2  ;;  %v1247_v2 = vld [vmem:[%s4264_s7] sm:$0xff] }
0x1015   :  { %v887_v6 = vadd.f32 %v886_v5, %v885_v4  ;;  %v1194_v5 = vld [vmem:[%s4262_s5] sm:$0xff] }
0x1017   :  { %v888_v7 = vrot.slane %v887_v6, 4 }
0x1019   :  { %v889_v8 = vadd.f32 %v888_v7, %v887_v6  ;;  %v3619_v6 = vmov 0.0   ;;  %v1197_v7 = vld [vmem:[%s4262_s5 + $0x18] sm:$0xff] }
0x101a   :  { %1234 = vst.msk [vmem:[#allocation5] sm:$0xff] %vm105_vm0, %v3619_v6 }
0x101b   :  { %v890_v9 = vrot.slane %v889_v8, 2 }
0x101d   :  { %v891_v10 = vadd.f32 %v890_v9, %v889_v8 }
0x101f   :  { %v892_v11 = vrot.slane %v891_v10, 1 }
0x1021   :  { %v893_v12 = vadd.f32 %v892_v11, %v891_v10  ;;  %v1195_v10 = vld [vmem:[%s4262_s5 + $0x8] sm:$0xff] }
0x1023   :  { %3453 = vrcp.f32 %v893_v12 }
0x1030   :  { %v3454_v13 = vpop.eup %3453 }
0x1031   :  { %v895_v14 = vmul.f32 %v3454_v13, %v874_v59  ;;  %v898_v15 = vmul.f32 %v3454_v13, %v880_v0  ;;  %v896_v16 = vmul.f32 %v3454_v13, %v876_v58  ;;  %v897_v17 = vmul.f32 %v3454_v13, %v878_v1  ;;  %v1196_v0 = vld [vmem:[%s4262_s5 + $0x10] sm:$0xff]  ;;  %v1124_v1 = vld [vmem:[#allocation11] sm:$0xff] }
0x1033   :  { %3016 = vmatprep.mubr.msk.f32.mxu0 %vm105_vm0, %v895_v14  ;;  %3022 = vmatprep.subr.msk.mxu1 %vm105_vm0, %v898_v15 }
0x1034   :  { %3017 = vmatmul.mubr.msk.f32.vlgmr.msra.gmra.mxu0 %vm105_vm0, %v896_v16  ;;  %3023 = vmatpush3.xpose.msk.msra.mxu1 %vm105_vm0, %v898_v15 }
0x1035   :  { %3019 = vmatprep.mubr.msk.f32.mxu0 %vm105_vm0, %v897_v17  ;;  %3024 = vmatprep.subr.msk.mxu1 %vm105_vm0, %v897_v17 }
0x1038   :  { %3020 = vmatmul.mubr.msk.f32.gmra.mxu0 %vm105_vm0, %v898_v15  ;;  %3025 = vmatpush3.xpose.msk.msra.mxu1 %vm105_vm0, %v897_v17 }
0x1039   :  { %3026 = vmatprep.subr.msk.mxu1 %vm105_vm0, %v896_v16  ;;  %3044 = vmatprep.mubr.msk.f32.mxu0 %vm105_vm0, %v1247_v2 }
0x103c   :  { %3027 = vmatpush3.xpose.msk.msra.mxu1 %vm105_vm0, %v896_v16 }
0x103d   :  { %3028 = vmatprep.subr.msk.mxu1 %vm105_vm0, %v895_v14 }
0x1040   :  { %3029 = vmatpush3.xpose.msk.msra.mxu1 %vm105_vm0, %v895_v14 }
0x1041   :  { %3056 = vmatprep.subr.mxu1 %v3619_v6 }
0x10f4   :  { %v3018_v18 = vpop.f32.mrf.mxu0 }
0x10f6   :  { %v996_v19 = vpop.f32.mrf.mxu0 }
0x10f7   :  { %3030 = vmatprep.mubr.msk.f32.mxu1 %vm105_vm0, %v996_v19 }
0x10f8   :  { %v3021_v20 = vpop.f32.mrf.mxu0  ;;  %3031 = vmatmul.mubr.msk.f32.vlgmr.msra.gmra.mxu1 %vm105_vm0, %v3018_v18 }
0x10fa   :  { %v1006_v21 = vpop.f32.mrf.mxu0 }
0x10fb   :  { %3033 = vmatprep.mubr.msk.f32.mxu1 %vm105_vm0, %v1006_v21 }
0x10fc   :  { %3034 = vmatmul.mubr.msk.f32.gmra.mxu1 %vm105_vm0, %v3021_v20 }
0x10fd   :  { %3064 = vmatprep.mubr.msk.f32.mxu1 %vm3620_vm5, %v3619_v6 }
0x11b8   :  { %v3880_v26 = vpop.f32.mrf.mxu1 }
0x11b9   :  { %v1117_v30 = vmul.f32 %v3880_v26, %v1113_v22  ;;  %v1187_v31 = vmul.f32 %v3880_v26, %v1183_v23  ;;  %v1227_v32 = vmul.f32 %v3880_v26, %v1223_v24  ;;  %v1129_v33 = vmul.f32 %v3880_v26, %v1125_v25 }
0x11ba   :  { %v3889_v35 = vpop.f32.mrf.mxu1  ;;  %v1158_v58 = vmul.f32 %v3880_v26, %v1154_v53  ;;  %v1199_v11 = vmul.f32 %v3880_v26, %v1195_v10 }
0x11bb   :  { %1231 = vst.msk [vmem:[#allocation4 + $0x8] sm:$0xff] %vm105_vm0, %v1227_v32  ;;  %1121 = vst.msk [vmem:[#allocation2 + $0x8] sm:$0xff] %vm105_vm0, %v1117_v30  ;;  %v1116_v39 = vmul.f32 %v1112_v27, %v3889_v35  ;;  %v1186_v40 = vmul.f32 %v1182_v28, %v3889_v35  ;;  %v1226_v41 = vmul.f32 %v1222_v29, %v3889_v35  ;;  %1138 = vrot.lane.b32.xlu1 %v1129_v33, %s3617_s12  ;;  %v1248_v28 = vld [vmem:[%s4264_s7 + $0x8] sm:$0xff] }
0x11bc   :  { %1191 = vst.msk [vmem:[#allocation3 + $0x8] sm:$0xff] %vm105_vm0, %v1187_v31  ;;  %v3035_v43 = vpop.f32.mrf.mxu1  ;;  %v1157_v62 = vmul.f32 %v1153_v60, %v3889_v35  ;;  %v1128_v4 = vmul.f32 %v1124_v1, %v3889_v35  ;;  %v1198_v8 = vmul.f32 %v1194_v5, %v3889_v35  ;;  %v3989_v35 = vld [vmem:[#allocation5] sm:$0xff] }
0x11bd   :  { %1230 = vst.msk [vmem:[#allocation4] sm:$0xff] %vm105_vm0, %v1226_v41  ;;  %1120 = vst.msk [vmem:[#allocation2] sm:$0xff] %vm105_vm0, %v1116_v39  ;;  %v1119_v47 = vmul.f32 %v3035_v43, %v1115_v34  ;;  %v1189_v48 = vmul.f32 %v3035_v43, %v1185_v36  ;;  %v1229_v49 = vmul.f32 %v3035_v43, %v1225_v37  ;;  %v1250_v39 = vld [vmem:[%s4264_s7 + $0x18] sm:$0xff]  ;;  %v1252_v41 = vld [vmem:[%s4264_s7 + $0x28] sm:$0xff] }
0x11be   :  { %1190 = vst.msk [vmem:[#allocation3] sm:$0xff] %vm105_vm0, %v1186_v40  ;;  %v1160_v50 = vmul.f32 %v3035_v43, %v1156_v38  ;;  %v1103_v51 = vpop.f32.mrf.mxu1  ;;  %v1131_v52 = vmul.f32 %v3035_v43, %v1127_v42  ;;  %v1201_v9 = vmul.f32 %v3035_v43, %v1197_v7  ;;  %v1249_v38 = vld [vmem:[%s4264_s7 + $0x10] sm:$0xff]  ;;  %v1251_v40 = vld [vmem:[%s4264_s7 + $0x20] sm:$0xff]  ;;  %v1254_v43 = vld [vmem:[%s4264_s7 + $0x38] sm:$0xff] }
0x11bf   :  { %1233 = vst.msk [vmem:[#allocation4 + $0x18] sm:$0xff] %vm105_vm0, %v1229_v49  ;;  %1123 = vst.msk [vmem:[#allocation2 + $0x18] sm:$0xff] %vm105_vm0, %v1119_v47  ;;  %v1118_v54 = vmul.f32 %v1114_v44, %v1103_v51  ;;  %v1188_v55 = vmul.f32 %v1184_v45, %v1103_v51  ;;  %v1228_v56 = vmul.f32 %v1224_v46, %v1103_v51  ;;  %v1253_v42 = vld [vmem:[%s4264_s7 + $0x30] sm:$0xff]  ;;  %s3621_s7 = smov 96  }
0x11c0   :  { %1193 = vst.msk [vmem:[#allocation3 + $0x18] sm:$0xff] %vm105_vm0, %v1189_v48  ;;  %1171 = vrot.lane.b32.xlu0 %v1160_v50, %s3618_s6  ;;  %1142 = vrot.lane.b32.xlu1 %v1131_v52, %s3617_s12  ;;  %v1130_v59 = vmul.f32 %v1126_v57, %v1103_v51  ;;  %v1159_v63 = vmul.f32 %v1155_v61, %v1103_v51 }
0x11c1   :  { %1232 = vst.msk [vmem:[#allocation4 + $0x10] sm:$0xff] %vm105_vm0, %v1228_v56  ;;  %1122 = vst.msk [vmem:[#allocation2 + $0x10] sm:$0xff] %vm105_vm0, %v1118_v54  ;;  %v1200_v3 = vmul.f32 %v1196_v0, %v1103_v51 }
0x11c2   :  { %1192 = vst.msk [vmem:[#allocation3 + $0x10] sm:$0xff] %vm105_vm0, %v1188_v55  ;;  %v3985_v34 = vld [vmem:[#allocation4 + $0x8] sm:$0xff] }
0x11c4   :  { %1167 = vrot.lane.b32.xlu0 %v1158_v58, %s3618_s6  ;;  %1140 = vrot.lane.b32.xlu1 %v1130_v59, %s3617_s12  ;;  %v3995_v37 = vld [vmem:[#allocation4] sm:$0xff] }
0x11c6   :  { %v3969_v30 = vld [vmem:[#allocation4 + $0x18] sm:$0xff] }
0x11c8   :  { %1165 = vrot.lane.b32.xlu0 %v1157_v62, %s3618_s6  ;;  %1169 = vrot.lane.b32.xlu1 %v1159_v63, %s3618_s6  ;;  %v3977_v32 = vld [vmem:[#allocation4 + $0x10] sm:$0xff] }
0x11cc   :  { %1210 = vrot.lane.b32.xlu0 %v1200_v3, %s3617_s12  ;;  %1136 = vrot.lane.b32.xlu1 %v1128_v4, %s3617_s12 }
0x11d0   :  { %1206 = vrot.lane.b32.xlu0 %v1198_v8, %s3617_s12  ;;  %1212 = vrot.lane.b32.xlu1 %v1201_v9, %s3617_s12 }
0x11d4   :  { %1208 = vrot.lane.b32.xlu1 %v1199_v11, %s3617_s12 }
0x122d   :  { %v1139_v12 = vpop.permute.xlu1 %1138 }
0x122e   :  { %1150 = vst.msk [vmem:[#allocation2 + $0x8] sm:$0xff] %vm1148_vm6, %v1139_v12 }
0x1232   :  { %v1172_v13 = vpop.permute.xlu0 %1171  ;;  %v1143_v14 = vpop.permute.xlu1 %1142 }
0x1233   :  { %1152 = vst.msk [vmem:[#allocation2 + $0x18] sm:$0xff] %vm1148_vm6, %v1143_v14 }
0x1234   :  { %1181 = vst.msk [vmem:[#allocation2 + $0x18] sm:$0xff] %vm1177_vm7, %v1172_v13 }
0x1236   :  { %v1168_v15 = vpop.permute.xlu0 %1167  ;;  %v1141_v16 = vpop.permute.xlu1 %1140 }
0x1237   :  { %1179 = vst.msk [vmem:[#allocation2 + $0x8] sm:$0xff] %vm1177_vm7, %v1168_v15 }
0x1238   :  { %1151 = vst.msk [vmem:[#allocation2 + $0x10] sm:$0xff] %vm1148_vm6, %v1141_v16 }
0x123a   :  { %v1166_v17 = vpop.permute.xlu0 %1165  ;;  %v1170_v18 = vpop.permute.xlu1 %1169 }
0x123b   :  { %1180 = vst.msk [vmem:[#allocation2 + $0x10] sm:$0xff] %vm1177_vm7, %v1170_v18  ;;  %v1238_v19 = vld [vmem:[#allocation2 + $0x18] sm:$0xff] }
0x123c   :  { %3036 = vmatprep.subr.mxu0 %v1238_v19 }
0x123d   :  { %3037 = vmatpush3.msra.mxu0 %v1238_v19 }
0x123e   :  { %v1211_v20 = vpop.permute.xlu0 %1210  ;;  %v1137_v21 = vpop.permute.xlu1 %1136  ;;  %v1236_v25 = vld [vmem:[#allocation2 + $0x8] sm:$0xff] }
0x123f   :  { %1220 = vst.msk [vmem:[#allocation3 + $0x10] sm:$0xff] %vm1148_vm6, %v1211_v20  ;;  %1149 = vst.msk [vmem:[#allocation2] sm:$0xff] %vm1148_vm6, %v1137_v21 }
0x1240   :  { %1178 = vst.msk [vmem:[#allocation2] sm:$0xff] %vm1177_vm7, %v1166_v17 }
0x1242   :  { %v1207_v22 = vpop.permute.xlu0 %1206  ;;  %v1213_v23 = vpop.permute.xlu1 %1212  ;;  %v1237_v24 = vld [vmem:[#allocation2 + $0x10] sm:$0xff] }
0x1243   :  { %1218 = vst.msk [vmem:[#allocation3] sm:$0xff] %vm1148_vm6, %v1207_v22  ;;  %1221 = vst.msk [vmem:[#allocation3 + $0x18] sm:$0xff] %vm1148_vm6, %v1213_v23  ;;  %3038 = vmatprep.subr.mxu0 %v1237_v24 }
0x1244   :  { %3039 = vmatpush3.msra.mxu0 %v1237_v24 }
0x1245   :  { %3040 = vmatprep.subr.mxu0 %v1236_v25 }
0x1246   :  { %v1209_v26 = vpop.permute.xlu1 %1208  ;;  %3041 = vmatpush3.msra.mxu0 %v1236_v25  ;;  %v3975_v31 = vld [vmem:[#allocation3 + $0x10] sm:$0xff] }
0x1247   :  { %1219 = vst.msk [vmem:[#allocation3 + $0x8] sm:$0xff] %vm1148_vm6, %v1209_v26  ;;  %v1235_v27 = vld [vmem:[#allocation2] sm:$0xff] }
0x1248   :  { %3042 = vmatprep.subr.mxu0 %v1235_v27 }
0x1249   :  { %3043 = vmatpush3.msra.mxu0 %v1235_v27 }
0x124a   :  { %3045 = vmatmul.mubr.msk.f32.vlgmr.msra.gmra.mxu0 %vm105_vm0, %v1248_v28  ;;  %3067 = vmatprep.subr.mxu0 %v3619_v6  ;;  %v3967_v29 = vld [vmem:[#allocation3 + $0x18] sm:$0xff]  ;;  %v3993_v36 = vld [vmem:[#allocation3] sm:$0xff] }
0x124b   :  { %3057 = vmatpush3.msra.mxu1 %v3967_v29  ;;  %3068 = vmatpush3.msra.mxu0 %v3969_v30 }
0x124c   :  { %3058 = vmatprep.subr.mxu1 %v3619_v6  ;;  %3069 = vmatprep.subr.mxu0 %v3619_v6 }
0x124d   :  { %3059 = vmatpush3.msra.mxu1 %v3975_v31  ;;  %3070 = vmatpush3.msra.mxu0 %v3977_v32 }
0x124e   :  { %3060 = vmatprep.subr.mxu1 %v3619_v6  ;;  %3071 = vmatprep.subr.mxu0 %v3619_v6  ;;  %v3983_v33 = vld [vmem:[#allocation3 + $0x8] sm:$0xff] }
0x124f   :  { %3061 = vmatpush3.msra.mxu1 %v3983_v33  ;;  %3072 = vmatpush3.msra.mxu0 %v3985_v34 }
0x1250   :  { %3062 = vmatprep.subr.mxu1 %v3619_v6  ;;  %3073 = vmatprep.subr.mxu0 %v3619_v6 }
0x1251   :  { %3063 = vmatpush3.msra.mxu1 %v3993_v36  ;;  %3074 = vmatpush3.msra.mxu0 %v3995_v37 }
0x1252   :  { %3078 = vmatprep.subr.mxu1 %v3619_v6  ;;  %3065 = vmatmul.mubr.msk.f32.vlgmr.msra.gmra.mxu1 %vm105_vm0, %v3989_v35 }
0x1253   :  { %3079 = vmatpush3.msra.mxu1 %v3967_v29  ;;  %3089 = vmatprep.subr.mxu0 %v3619_v6 }
0x1254   :  { %3080 = vmatprep.subr.mxu1 %v3619_v6  ;;  %3086 = vmatprep.mubr.msk.f32.mxu1 %vm3620_vm5, %v3619_v6 }
0x1255   :  { %3081 = vmatpush3.msra.mxu1 %v3975_v31  ;;  %3047 = vmatprep.mubr.msk.f32.mxu0 %vm105_vm0, %v1249_v38 }
0x1256   :  { %3082 = vmatprep.subr.mxu1 %v3619_v6  ;;  %3048 = vmatmul.mubr.msk.f32.gmra.mxu0 %vm105_vm0, %v1250_v39 }
0x1257   :  { %3083 = vmatpush3.msra.mxu1 %v3983_v33  ;;  %3050 = vmatprep.mubr.msk.f32.mxu0 %vm105_vm0, %v1251_v40 }
0x1258   :  { %3084 = vmatprep.subr.mxu1 %v3619_v6 }
0x1259   :  { %3085 = vmatpush3.msra.mxu1 %v3993_v36 }
0x125a   :  { %3100 = vmatprep.subr.mxu1 %v3619_v6  ;;  %3051 = vmatmul.mubr.msk.f32.gmra.mxu0 %vm105_vm0, %v1252_v41 }
0x125b   :  { %3053 = vmatprep.mubr.msk.f32.mxu0 %vm105_vm0, %v1253_v42 }
0x125e   :  { %3054 = vmatmul.mubr.msk.f32.gmra.mxu0 %vm105_vm0, %v1254_v43 }
0x125f   :  { %3075 = vmatprep.mubr.msk.f32.mxu0 %vm3620_vm5, %v3619_v6 }
0x130a   :  { %v3046_v44 = vpop.f32.mrf.mxu0 }
0x130b   :  { %1387 = vst.msk [vmem:[#allocation6 + $0x8] sm:$0xff] %vm1385_vm8, %v3046_v44 }
0x130c   :  { %v1346_v45 = vpop.f32.mrf.mxu0 }
0x130d   :  { %1386 = vst.msk [vmem:[#allocation6] sm:$0xff] %vm1385_vm8, %v1346_v45 }
0x1312   :  { %v1465_v46 = vpop.f32.mrf.mxu1  ;;  %v1574_v10 = vld [vmem:[#allocation6 + $0x8] sm:$0xff] }
0x1314   :  { %v1395_v47 = vld [vmem:[#allocation6] sm:$0xff]  ;;  %v3066_v48 = vpop.f32.mrf.mxu1 }
0x1315   :  { %v1469_v49 = vadd.f32 %v1465_v46, %v1395_v47 }
0x1316   :  { %v3049_v55 = vpop.f32.mrf.mxu0 }
0x1317   :  { %v2870_v50 = vmul.f32 -1.442695, %v1469_v49  ;;  %1389 = vst.msk [vmem:[#allocation6 + $0x18] sm:$0xff] %vm1385_vm8, %v3049_v55 }
0x1318   :  { %v1356_v56 = vpop.f32.mrf.mxu0 }
0x1319   :  { %3455 = vpow2.f32 %v2870_v50  ;;  %1388 = vst.msk [vmem:[#allocation6 + $0x10] sm:$0xff] %vm1385_vm8, %v1356_v56 }
0x131a   :  { %v3052_v57 = vpop.f32.mrf.mxu0 }
0x131b   :  { %1391 = vst.msk [vmem:[#allocation6 + $0x28] sm:$0xff] %vm1385_vm8, %v3052_v57 }
0x131c   :  { %v1366_v58 = vpop.f32.mrf.mxu0 }
0x131d   :  { %1390 = vst.msk [vmem:[#allocation6 + $0x20] sm:$0xff] %vm1385_vm8, %v1366_v58 }
0x131e   :  { %v3055_v59 = vpop.f32.mrf.mxu0 }
0x131f   :  { %1393 = vst.msk [vmem:[#allocation6 + $0x38] sm:$0xff] %vm1385_vm8, %v3055_v59 }
0x1320   :  { %v1376_v60 = vpop.f32.mrf.mxu0  ;;  %v1754_v39 = vld [vmem:[#allocation6 + $0x10] sm:$0xff] }
0x1321   :  { %1392 = vst.msk [vmem:[#allocation6 + $0x30] sm:$0xff] %vm1385_vm8, %v1376_v60  ;;  %v1934_v60 = vld [vmem:[#allocation6 + $0x18] sm:$0xff] }
0x1326   :  { %v3456_v51 = vpop.eup %3455 }
0x1327   :  { %v1473_v52 = vadd.f32 1.0, %v3456_v51 }
0x1329   :  { %3457 = vrcp.f32 %v1473_v52 }
0x1336   :  { %v3458_v53 = vpop.eup %3457 }
0x1337   :  { %v1476_v54 = vmul.f32 %v3458_v53, %v3989_v35  ;;  %v1561_v2 = vsub.f32 1.0, %v3458_v53 }
0x1339   :  { %3076 = vmatmul.mubr.msk.f32.vlgmr.msra.gmra.mxu0 %vm105_vm0, %v1476_v54 }
0x133a   :  { %3090 = vmatpush3.msra.mxu0 %v3969_v30  ;;  %3097 = vmatprep.mubr.msk.f32.mxu0 %vm3620_vm5, %v3619_v6 }
0x133b   :  { %3091 = vmatprep.subr.mxu0 %v3619_v6 }
0x133c   :  { %3092 = vmatpush3.msra.mxu0 %v3977_v32 }
0x133d   :  { %3093 = vmatprep.subr.mxu0 %v3619_v6 }
0x133e   :  { %3094 = vmatpush3.msra.mxu0 %v3985_v34 }
0x133f   :  { %3095 = vmatprep.subr.mxu0 %v3619_v6 }
0x1340   :  { %3096 = vmatpush3.msra.mxu0 %v3995_v37 }
0x1341   :  { %3111 = vmatprep.subr.mxu0 %v3619_v6 }
0x13f9   :  { %v1546_v61 = vpop.f32.mrf.mxu0 }
0x13fa   :  { %1551 = vrot.lane.b32.xlu1 %v1546_v61, %s3618_s6 }
0x13fb   :  { %v3077_v62 = vpop.f32.mrf.mxu0 }
0x13fe   :  { %1557 = vrot.lane.b32.xlu1 %v3458_v53, %s3621_s7 }
0x146c   :  { %v1552_v63 = vpop.permute.xlu1 %1551 }
0x146d   :  { %v1554_v0 = vadd.f32 %v1552_v63, %v1395_v47 }
0x146f   :  { %3459 = vtanh.f32 %v1554_v0 }
0x1470   :  { %v1558_v5 = vpop.permute.xlu1 %1557 }
0x1471   :  { %v1560_v7 = vmul.f32 %v1558_v5, %v3989_v35 }
0x147c   :  { %v3460_v1 = vpop.eup %3459 }
0x147d   :  { %1563 = vrot.lane.b32.xlu0 %v3460_v1, %s3621_s7 }
0x14ef   :  { %v1564_v3 = vpop.permute.xlu0 %1563 }
0x14f0   :  { %v1566_v4 = vmul.f32 %v1564_v3, %v1561_v2 }
0x14f2   :  { %1568 = vrot.lane.b32.xlu0 %v1566_v4, %s3621_s7 }
0x1564   :  { %v1569_v8 = vpop.permute.xlu0 %1568 }
0x1565   :  { %v1571_v9 = vadd.f32 %v1569_v8, %v1560_v7 }
0x1567   :  { %1572 = vst.msk [vmem:[%s4265_s8] sm:$0xff] %vm105_vm0, %v1571_v9  ;;  %3087 = vmatmul.mubr.msk.f32.vlgmr.msra.gmra.mxu1 %vm105_vm0, %v1571_v9 }
0x1568   :  { %3101 = vmatpush3.msra.mxu1 %v3967_v29  ;;  %3108 = vmatprep.mubr.msk.f32.mxu1 %vm3620_vm5, %v3619_v6 }
0x1569   :  { %3102 = vmatprep.subr.mxu1 %v3619_v6 }
0x156a   :  { %3103 = vmatpush3.msra.mxu1 %v3975_v31 }
0x156b   :  { %3104 = vmatprep.subr.mxu1 %v3619_v6 }
0x156c   :  { %3105 = vmatpush3.msra.mxu1 %v3983_v33 }
0x156d   :  { %3106 = vmatprep.subr.mxu1 %v3619_v6 }
0x156e   :  { %3107 = vmatpush3.msra.mxu1 %v3993_v36 }
0x156f   :  { %3122 = vmatprep.subr.mxu1 %v3619_v6 }
0x1627   :  { %v1644_v11 = vpop.f32.mrf.mxu1 }
0x1628   :  { %v1648_v12 = vadd.f32 %v1644_v11, %v1574_v10 }
0x1629   :  { %v3088_v13 = vpop.f32.mrf.mxu1 }
0x162a   :  { %v2873_v14 = vmul.f32 -1.442695, %v1648_v12 }
0x162c   :  { %3461 = vpow2.f32 %v2873_v14 }
0x1639   :  { %v3462_v15 = vpop.eup %3461 }
0x163a   :  { %v1652_v16 = vadd.f32 1.0, %v3462_v15 }
0x163c   :  { %3463 = vrcp.f32 %v1652_v16 }
0x1649   :  { %v3464_v17 = vpop.eup %3463 }
0x164a   :  { %v1655_v18 = vmul.f32 %v3464_v17, %v1571_v9  ;;  %v1740_v24 = vsub.f32 1.0, %v3464_v17 }
0x164c   :  { %3098 = vmatmul.mubr.msk.f32.vlgmr.msra.gmra.mxu0 %vm105_vm0, %v1655_v18  ;;  %v2114_v18 = vld [vmem:[#allocation6 + $0x20] sm:$0xff] }
0x164d   :  { %3112 = vmatpush3.msra.mxu0 %v3969_v30  ;;  %3119 = vmatprep.mubr.msk.f32.mxu0 %vm3620_vm5, %v3619_v6 }
0x164e   :  { %3113 = vmatprep.subr.mxu0 %v3619_v6 }
0x164f   :  { %3114 = vmatpush3.msra.mxu0 %v3977_v32 }
0x1650   :  { %3115 = vmatprep.subr.mxu0 %v3619_v6 }
0x1651   :  { %3116 = vmatpush3.msra.mxu0 %v3985_v34 }
0x1652   :  { %3117 = vmatprep.subr.mxu0 %v3619_v6 }
0x1653   :  { %3118 = vmatpush3.msra.mxu0 %v3995_v37 }
0x1654   :  { %3133 = vmatprep.subr.mxu0 %v3619_v6 }
0x170c   :  { %v1725_v19 = vpop.f32.mrf.mxu0 }
0x170d   :  { %1730 = vrot.lane.b32.xlu1 %v1725_v19, %s3618_s6 }
0x170e   :  { %v3099_v20 = vpop.f32.mrf.mxu0 }
0x1711   :  { %1736 = vrot.lane.b32.xlu1 %v3464_v17, %s3621_s7 }
0x177f   :  { %v1731_v21 = vpop.permute.xlu1 %1730 }
0x1780   :  { %v1733_v22 = vadd.f32 %v1731_v21, %v1574_v10 }
0x1782   :  { %3465 = vtanh.f32 %v1733_v22 }
0x1783   :  { %v1737_v27 = vpop.permute.xlu1 %1736 }
0x1784   :  { %v1739_v28 = vmul.f32 %v1737_v27, %v1571_v9 }
0x178f   :  { %v3466_v23 = vpop.eup %3465 }
0x1790   :  { %1742 = vrot.lane.b32.xlu0 %v3466_v23, %s3621_s7 }
0x1802   :  { %v1743_v25 = vpop.permute.xlu0 %1742 }
0x1803   :  { %v1745_v26 = vmul.f32 %v1743_v25, %v1740_v24 }
0x1805   :  { %1747 = vrot.lane.b32.xlu0 %v1745_v26, %s3621_s7 }
0x1877   :  { %v1748_v35 = vpop.permute.xlu0 %1747 }
0x1878   :  { %v1750_v38 = vadd.f32 %v1748_v35, %v1739_v28 }
0x187a   :  { %2875 = vst.msk [vmem:[%s4265_s8 + $0x8] sm:$0xff] %vm105_vm0, %v1750_v38  ;;  %3109 = vmatmul.mubr.msk.f32.vlgmr.msra.gmra.mxu1 %vm105_vm0, %v1750_v38 }
0x187b   :  { %3123 = vmatpush3.msra.mxu1 %v3967_v29  ;;  %3130 = vmatprep.mubr.msk.f32.mxu1 %vm3620_vm5, %v3619_v6 }
0x187c   :  { %3124 = vmatprep.subr.mxu1 %v3619_v6 }
0x187d   :  { %3125 = vmatpush3.msra.mxu1 %v3975_v31 }
0x187e   :  { %3126 = vmatprep.subr.mxu1 %v3619_v6 }
0x187f   :  { %3127 = vmatpush3.msra.mxu1 %v3983_v33 }
0x1880   :  { %3128 = vmatprep.subr.mxu1 %v3619_v6 }
0x1881   :  { %3129 = vmatpush3.msra.mxu1 %v3993_v36 }
0x1882   :  { %3144 = vmatprep.subr.mxu1 %v3619_v6 }
0x193a   :  { %v1824_v40 = vpop.f32.mrf.mxu1 }
0x193b   :  { %v1828_v41 = vadd.f32 %v1824_v40, %v1754_v39 }
0x193c   :  { %v3110_v42 = vpop.f32.mrf.mxu1 }
0x193d   :  { %v2877_v43 = vmul.f32 -1.442695, %v1828_v41 }
0x193f   :  { %3467 = vpow2.f32 %v2877_v43 }
0x194c   :  { %v3468_v44 = vpop.eup %3467 }
0x194d   :  { %v1832_v45 = vadd.f32 1.0, %v3468_v44 }
0x194f   :  { %3469 = vrcp.f32 %v1832_v45 }
0x195c   :  { %v3470_v46 = vpop.eup %3469 }
0x195d   :  { %v1835_v47 = vmul.f32 %v3470_v46, %v1750_v38  ;;  %v1920_v53 = vsub.f32 1.0, %v3470_v46 }
0x195f   :  { %3120 = vmatmul.mubr.msk.f32.vlgmr.msra.gmra.mxu0 %vm105_vm0, %v1835_v47  ;;  %v2294_v47 = vld [vmem:[#allocation6 + $0x28] sm:$0xff] }
0x1960   :  { %3134 = vmatpush3.msra.mxu0 %v3969_v30  ;;  %3141 = vmatprep.mubr.msk.f32.mxu0 %vm3620_vm5, %v3619_v6 }
0x1961   :  { %3135 = vmatprep.subr.mxu0 %v3619_v6 }
0x1962   :  { %3136 = vmatpush3.msra.mxu0 %v3977_v32 }
0x1963   :  { %3137 = vmatprep.subr.mxu0 %v3619_v6 }
0x1964   :  { %3138 = vmatpush3.msra.mxu0 %v3985_v34 }
0x1965   :  { %3139 = vmatprep.subr.mxu0 %v3619_v6 }
0x1966   :  { %3140 = vmatpush3.msra.mxu0 %v3995_v37 }
0x1967   :  { %3155 = vmatprep.subr.mxu0 %v3619_v6 }
0x1a1f   :  { %v1905_v48 = vpop.f32.mrf.mxu0 }
0x1a20   :  { %1910 = vrot.lane.b32.xlu1 %v1905_v48, %s3618_s6 }
0x1a21   :  { %v3121_v49 = vpop.f32.mrf.mxu0 }
0x1a24   :  { %1916 = vrot.lane.b32.xlu1 %v3470_v46, %s3621_s7 }
0x1a92   :  { %v1911_v50 = vpop.permute.xlu1 %1910 }
0x1a93   :  { %v1913_v51 = vadd.f32 %v1911_v50, %v1754_v39 }
0x1a95   :  { %3471 = vtanh.f32 %v1913_v51 }
0x1a96   :  { %v1917_v56 = vpop.permute.xlu1 %1916 }
0x1a97   :  { %v1919_v57 = vmul.f32 %v1917_v56, %v1750_v38 }
0x1aa2   :  { %v3472_v52 = vpop.eup %3471 }
0x1aa3   :  { %1922 = vrot.lane.b32.xlu0 %v3472_v52, %s3621_s7 }
0x1b15   :  { %v1923_v54 = vpop.permute.xlu0 %1922 }
0x1b16   :  { %v1925_v55 = vmul.f32 %v1923_v54, %v1920_v53 }
0x1b18   :  { %1927 = vrot.lane.b32.xlu0 %v1925_v55, %s3621_s7 }
0x1b8a   :  { %v1928_v58 = vpop.permute.xlu0 %1927 }
0x1b8b   :  { %v1930_v59 = vadd.f32 %v1928_v58, %v1919_v57 }
0x1b8d   :  { %2879 = vst.msk [vmem:[%s4265_s8 + $0x10] sm:$0xff] %vm105_vm0, %v1930_v59  ;;  %3131 = vmatmul.mubr.msk.f32.vlgmr.msra.gmra.mxu1 %vm105_vm0, %v1930_v59 }
0x1b8e   :  { %3145 = vmatpush3.msra.mxu1 %v3967_v29  ;;  %3152 = vmatprep.mubr.msk.f32.mxu1 %vm3620_vm5, %v3619_v6 }
0x1b8f   :  { %3146 = vmatprep.subr.mxu1 %v3619_v6 }
0x1b90   :  { %3147 = vmatpush3.msra.mxu1 %v3975_v31 }
0x1b91   :  { %3148 = vmatprep.subr.mxu1 %v3619_v6 }
0x1b92   :  { %3149 = vmatpush3.msra.mxu1 %v3983_v33 }
0x1b93   :  { %3150 = vmatprep.subr.mxu1 %v3619_v6 }
0x1b94   :  { %3151 = vmatpush3.msra.mxu1 %v3993_v36 }
0x1b95   :  { %3166 = vmatprep.subr.mxu1 %v3619_v6 }
0x1c4d   :  { %v2004_v61 = vpop.f32.mrf.mxu1 }
0x1c4e   :  { %v2008_v62 = vadd.f32 %v2004_v61, %v1934_v60 }
0x1c4f   :  { %v3132_v63 = vpop.f32.mrf.mxu1 }
0x1c50   :  { %v2881_v0 = vmul.f32 -1.442695, %v2008_v62 }
0x1c52   :  { %3473 = vpow2.f32 %v2881_v0 }
0x1c5f   :  { %v3474_v1 = vpop.eup %3473 }
0x1c60   :  { %v2012_v2 = vadd.f32 1.0, %v3474_v1 }
0x1c62   :  { %3475 = vrcp.f32 %v2012_v2 }
0x1c6f   :  { %v3476_v3 = vpop.eup %3475 }
0x1c70   :  { %v2015_v4 = vmul.f32 %v3476_v3, %v1930_v59  ;;  %v2100_v11 = vsub.f32 1.0, %v3476_v3 }
0x1c72   :  { %3142 = vmatmul.mubr.msk.f32.vlgmr.msra.gmra.mxu0 %vm105_vm0, %v2015_v4  ;;  %v2474_v4 = vld [vmem:[#allocation6 + $0x30] sm:$0xff] }
0x1c73   :  { %3156 = vmatpush3.msra.mxu0 %v3969_v30  ;;  %3163 = vmatprep.mubr.msk.f32.mxu0 %vm3620_vm5, %v3619_v6 }
0x1c74   :  { %3157 = vmatprep.subr.mxu0 %v3619_v6 }
0x1c75   :  { %3158 = vmatpush3.msra.mxu0 %v3977_v32 }
0x1c76   :  { %3159 = vmatprep.subr.mxu0 %v3619_v6 }
0x1c77   :  { %3160 = vmatpush3.msra.mxu0 %v3985_v34 }
0x1c78   :  { %3161 = vmatprep.subr.mxu0 %v3619_v6 }
0x1c79   :  { %3162 = vmatpush3.msra.mxu0 %v3995_v37 }
0x1c7a   :  { %3177 = vmatprep.subr.mxu0 %v3619_v6 }
0x1d32   :  { %v2085_v5 = vpop.f32.mrf.mxu0 }
0x1d33   :  { %2090 = vrot.lane.b32.xlu1 %v2085_v5, %s3618_s6 }
0x1d34   :  { %v3143_v7 = vpop.f32.mrf.mxu0 }
0x1d37   :  { %2096 = vrot.lane.b32.xlu1 %v3476_v3, %s3621_s7 }
0x1da5   :  { %v2091_v8 = vpop.permute.xlu1 %2090 }
0x1da6   :  { %v2093_v9 = vadd.f32 %v2091_v8, %v1934_v60 }
0x1da8   :  { %3477 = vtanh.f32 %v2093_v9 }
0x1da9   :  { %v2097_v14 = vpop.permute.xlu1 %2096 }
0x1daa   :  { %v2099_v15 = vmul.f32 %v2097_v14, %v1930_v59 }
0x1db5   :  { %v3478_v10 = vpop.eup %3477 }
0x1db6   :  { %2102 = vrot.lane.b32.xlu0 %v3478_v10, %s3621_s7 }
0x1e28   :  { %v2103_v12 = vpop.permute.xlu0 %2102 }
0x1e29   :  { %v2105_v13 = vmul.f32 %v2103_v12, %v2100_v11 }
0x1e2b   :  { %2107 = vrot.lane.b32.xlu0 %v2105_v13, %s3621_s7 }
0x1e9d   :  { %v2108_v16 = vpop.permute.xlu0 %2107 }
0x1e9e   :  { %v2110_v17 = vadd.f32 %v2108_v16, %v2099_v15 }
0x1ea0   :  { %2883 = vst.msk [vmem:[%s4265_s8 + $0x18] sm:$0xff] %vm105_vm0, %v2110_v17  ;;  %3153 = vmatmul.mubr.msk.f32.vlgmr.msra.gmra.mxu1 %vm105_vm0, %v2110_v17 }
0x1ea1   :  { %3167 = vmatpush3.msra.mxu1 %v3967_v29  ;;  %3174 = vmatprep.mubr.msk.f32.mxu1 %vm3620_vm5, %v3619_v6 }
0x1ea2   :  { %3168 = vmatprep.subr.mxu1 %v3619_v6 }
0x1ea3   :  { %3169 = vmatpush3.msra.mxu1 %v3975_v31 }
0x1ea4   :  { %3170 = vmatprep.subr.mxu1 %v3619_v6 }
0x1ea5   :  { %3171 = vmatpush3.msra.mxu1 %v3983_v33 }
0x1ea6   :  { %3172 = vmatprep.subr.mxu1 %v3619_v6 }
0x1ea7   :  { %3173 = vmatpush3.msra.mxu1 %v3993_v36 }
0x1ea8   :  { %3188 = vmatprep.subr.mxu1 %v3619_v6 }
0x1f60   :  { %v2184_v19 = vpop.f32.mrf.mxu1 }
0x1f61   :  { %v2188_v20 = vadd.f32 %v2184_v19, %v2114_v18 }
0x1f62   :  { %v3154_v21 = vpop.f32.mrf.mxu1 }
0x1f63   :  { %v2885_v22 = vmul.f32 -1.442695, %v2188_v20 }
0x1f65   :  { %3479 = vpow2.f32 %v2885_v22 }
0x1f72   :  { %v3480_v23 = vpop.eup %3479 }
0x1f73   :  { %v2192_v24 = vadd.f32 1.0, %v3480_v23 }
0x1f75   :  { %3481 = vrcp.f32 %v2192_v24 }
0x1f82   :  { %v3482_v25 = vpop.eup %3481 }
0x1f83   :  { %v2195_v26 = vmul.f32 %v3482_v25, %v2110_v17  ;;  %v2280_v40 = vsub.f32 1.0, %v3482_v25 }
0x1f85   :  { %3164 = vmatmul.mubr.msk.f32.vlgmr.msra.gmra.mxu0 %vm105_vm0, %v2195_v26 }
0x1f86   :  { %3178 = vmatpush3.msra.mxu0 %v3969_v30  ;;  %3185 = vmatprep.mubr.msk.f32.mxu0 %vm3620_vm5, %v3619_v6 }
0x1f87   :  { %3179 = vmatprep.subr.mxu0 %v3619_v6 }
0x1f88   :  { %3180 = vmatpush3.msra.mxu0 %v3977_v32 }
0x1f89   :  { %3181 = vmatprep.subr.mxu0 %v3619_v6 }
0x1f8a   :  { %3182 = vmatpush3.msra.mxu0 %v3985_v34 }
0x1f8b   :  { %3183 = vmatprep.subr.mxu0 %v3619_v6 }
0x1f8c   :  { %3184 = vmatpush3.msra.mxu0 %v3995_v37 }
0x1f8d   :  { %3199 = vmatprep.subr.mxu0 %v3619_v6 }
0x2045   :  { %v2265_v27 = vpop.f32.mrf.mxu0 }
0x2046   :  { %2270 = vrot.lane.b32.xlu1 %v2265_v27, %s3618_s6 }
0x2047   :  { %v3165_v28 = vpop.f32.mrf.mxu0 }
0x204a   :  { %2276 = vrot.lane.b32.xlu1 %v3482_v25, %s3621_s7 }
0x20b8   :  { %v2271_v35 = vpop.permute.xlu1 %2270 }
0x20b9   :  { %v2273_v38 = vadd.f32 %v2271_v35, %v2114_v18 }
0x20bb   :  { %3483 = vtanh.f32 %v2273_v38 }
0x20bc   :  { %v2277_v43 = vpop.permute.xlu1 %2276 }
0x20bd   :  { %v2279_v44 = vmul.f32 %v2277_v43, %v2110_v17  ;;  %v2654_v17 = vld [vmem:[#allocation6 + $0x38] sm:$0xff] }
0x20c8   :  { %v3484_v39 = vpop.eup %3483 }
0x20c9   :  { %2282 = vrot.lane.b32.xlu0 %v3484_v39, %s3621_s7 }
0x213b   :  { %v2283_v41 = vpop.permute.xlu0 %2282 }
0x213c   :  { %v2285_v42 = vmul.f32 %v2283_v41, %v2280_v40 }
0x213e   :  { %2287 = vrot.lane.b32.xlu0 %v2285_v42, %s3621_s7 }
0x21b0   :  { %v2288_v45 = vpop.permute.xlu0 %2287 }
0x21b1   :  { %v2290_v46 = vadd.f32 %v2288_v45, %v2279_v44 }
0x21b3   :  { %2887 = vst.msk [vmem:[%s4265_s8 + $0x20] sm:$0xff] %vm105_vm0, %v2290_v46  ;;  %3175 = vmatmul.mubr.msk.f32.vlgmr.msra.gmra.mxu1 %vm105_vm0, %v2290_v46 }
0x21b4   :  { %3189 = vmatpush3.msra.mxu1 %v3967_v29  ;;  %3196 = vmatprep.mubr.msk.f32.mxu1 %vm3620_vm5, %v3619_v6 }
0x21b5   :  { %3190 = vmatprep.subr.mxu1 %v3619_v6 }
0x21b6   :  { %3191 = vmatpush3.msra.mxu1 %v3975_v31 }
0x21b7   :  { %3192 = vmatprep.subr.mxu1 %v3619_v6 }
0x21b8   :  { %3193 = vmatpush3.msra.mxu1 %v3983_v33 }
0x21b9   :  { %3194 = vmatprep.subr.mxu1 %v3619_v6 }
0x21ba   :  { %3195 = vmatpush3.msra.mxu1 %v3993_v36 }
0x21bb   :  { %3210 = vmatprep.subr.mxu1 %v3619_v6 }
0x2273   :  { %v2364_v48 = vpop.f32.mrf.mxu1 }
0x2274   :  { %v2368_v49 = vadd.f32 %v2364_v48, %v2294_v47 }
0x2275   :  { %v3176_v50 = vpop.f32.mrf.mxu1 }
0x2276   :  { %v2889_v51 = vmul.f32 -1.442695, %v2368_v49 }
0x2278   :  { %3485 = vpow2.f32 %v2889_v51 }
0x2285   :  { %v3486_v52 = vpop.eup %3485 }
0x2286   :  { %v2372_v53 = vadd.f32 1.0, %v3486_v52 }
0x2288   :  { %3487 = vrcp.f32 %v2372_v53 }
0x2295   :  { %v3488_v54 = vpop.eup %3487 }
0x2296   :  { %v2375_v55 = vmul.f32 %v3488_v54, %v2290_v46  ;;  %v2460_v61 = vsub.f32 1.0, %v3488_v54 }
0x2298   :  { %3186 = vmatmul.mubr.msk.f32.vlgmr.msra.gmra.mxu0 %vm105_vm0, %v2375_v55 }
0x2299   :  { %3200 = vmatpush3.msra.mxu0 %v3969_v30  ;;  %3207 = vmatprep.mubr.msk.f32.mxu0 %vm3620_vm5, %v3619_v6 }
0x229a   :  { %3201 = vmatprep.subr.mxu0 %v3619_v6 }
0x229b   :  { %3202 = vmatpush3.msra.mxu0 %v3977_v32 }
0x229c   :  { %3203 = vmatprep.subr.mxu0 %v3619_v6 }
0x229d   :  { %3204 = vmatpush3.msra.mxu0 %v3985_v34 }
0x229e   :  { %3205 = vmatprep.subr.mxu0 %v3619_v6 }
0x229f   :  { %3206 = vmatpush3.msra.mxu0 %v3995_v37 }
0x22a0   :  { %3221 = vmatprep.subr.mxu0 %v3619_v6 }
0x2358   :  { %v2445_v56 = vpop.f32.mrf.mxu0 }
0x2359   :  { %2450 = vrot.lane.b32.xlu1 %v2445_v56, %s3618_s6 }
0x235a   :  { %v3187_v57 = vpop.f32.mrf.mxu0 }
0x235d   :  { %2456 = vrot.lane.b32.xlu1 %v3488_v54, %s3621_s7 }
0x23cb   :  { %v2451_v58 = vpop.permute.xlu1 %2450 }
0x23cc   :  { %v2453_v59 = vadd.f32 %v2451_v58, %v2294_v47 }
0x23ce   :  { %3489 = vtanh.f32 %v2453_v59 }
0x23cf   :  { %v2457_v0 = vpop.permute.xlu1 %2456 }
0x23d0   :  { %v2459_v1 = vmul.f32 %v2457_v0, %v2290_v46 }
0x23db   :  { %v3490_v60 = vpop.eup %3489 }
0x23dc   :  { %2462 = vrot.lane.b32.xlu0 %v3490_v60, %s3621_s7 }
0x244e   :  { %v2463_v62 = vpop.permute.xlu0 %2462 }
0x244f   :  { %v2465_v63 = vmul.f32 %v2463_v62, %v2460_v61 }
0x2451   :  { %2467 = vrot.lane.b32.xlu0 %v2465_v63, %s3621_s7 }
0x24c3   :  { %v2468_v2 = vpop.permute.xlu0 %2467 }
0x24c4   :  { %v2470_v3 = vadd.f32 %v2468_v2, %v2459_v1 }
0x24c6   :  { %2891 = vst.msk [vmem:[%s4265_s8 + $0x28] sm:$0xff] %vm105_vm0, %v2470_v3  ;;  %3197 = vmatmul.mubr.msk.f32.vlgmr.msra.gmra.mxu1 %vm105_vm0, %v2470_v3 }
0x24c7   :  { %3211 = vmatpush3.msra.mxu1 %v3967_v29  ;;  %3218 = vmatprep.mubr.msk.f32.mxu1 %vm3620_vm5, %v3619_v6 }
0x24c8   :  { %3212 = vmatprep.subr.mxu1 %v3619_v6 }
0x24c9   :  { %3213 = vmatpush3.msra.mxu1 %v3975_v31 }
0x24ca   :  { %3214 = vmatprep.subr.mxu1 %v3619_v6 }
0x24cb   :  { %3215 = vmatpush3.msra.mxu1 %v3983_v33 }
0x24cc   :  { %3216 = vmatprep.subr.mxu1 %v3619_v6 }
0x24cd   :  { %3217 = vmatpush3.msra.mxu1 %v3993_v36 }
0x2586   :  { %v2544_v5 = vpop.f32.mrf.mxu1 }
0x2587   :  { %v2548_v7 = vadd.f32 %v2544_v5, %v2474_v4 }
0x2588   :  { %v3198_v8 = vpop.f32.mrf.mxu1 }
0x2589   :  { %v2893_v29 = vmul.f32 -1.442695, %v2548_v7 }
0x258b   :  { %3491 = vpow2.f32 %v2893_v29 }
0x2598   :  { %v3492_v9 = vpop.eup %3491 }
0x2599   :  { %v2552_v10 = vadd.f32 1.0, %v3492_v9 }
0x259b   :  { %3493 = vrcp.f32 %v2552_v10 }
0x25a8   :  { %v3494_v11 = vpop.eup %3493 }
0x25a9   :  { %v2555_v12 = vmul.f32 %v3494_v11, %v2470_v3 }
0x25ab   :  { %3208 = vmatmul.mubr.msk.f32.vlgmr.msra.gmra.mxu0 %vm105_vm0, %v2555_v12 }
0x25ac   :  { %3222 = vmatpush3.msra.mxu0 %v3969_v30  ;;  %3229 = vmatprep.mubr.msk.f32.mxu0 %vm3620_vm5, %v3619_v6 }
0x25ad   :  { %3223 = vmatprep.subr.mxu0 %v3619_v6 }
0x25ae   :  { %3224 = vmatpush3.msra.mxu0 %v3977_v32  ;;  %v2640_v32 = vsub.f32 1.0, %v3494_v11 }
0x25af   :  { %3225 = vmatprep.subr.mxu0 %v3619_v6 }
0x25b0   :  { %3226 = vmatpush3.msra.mxu0 %v3985_v34 }
0x25b1   :  { %3227 = vmatprep.subr.mxu0 %v3619_v6 }
0x25b2   :  { %3228 = vmatpush3.msra.mxu0 %v3995_v37 }
0x266b   :  { %v2625_v31 = vpop.f32.mrf.mxu0 }
0x266c   :  { %2630 = vrot.lane.b32.xlu1 %v2625_v31, %s3618_s6 }
0x266d   :  { %v3209_v33 = vpop.f32.mrf.mxu0 }
0x2670   :  { %2636 = vrot.lane.b32.xlu1 %v3494_v11, %s3621_s7 }
0x26de   :  { %v2631_v30 = vpop.permute.xlu1 %2630 }
0x26df   :  { %v2633_v36 = vadd.f32 %v2631_v30, %v2474_v4 }
0x26e1   :  { %3495 = vtanh.f32 %v2633_v36 }
0x26e2   :  { %v2637_v6 = vpop.permute.xlu1 %2636 }
0x26e3   :  { %v2639_v34 = vmul.f32 %v2637_v6, %v2470_v3 }
0x26ee   :  { %v3496_v13 = vpop.eup %3495 }
0x26ef   :  { %2642 = vrot.lane.b32.xlu0 %v3496_v13, %s3621_s7 }
0x2761   :  { %v2643_v14 = vpop.permute.xlu0 %2642 }
0x2762   :  { %v2645_v15 = vmul.f32 %v2643_v14, %v2640_v32 }
0x2764   :  { %2647 = vrot.lane.b32.xlu0 %v2645_v15, %s3621_s7 }
0x27d6   :  { %v2648_v37 = vpop.permute.xlu0 %2647 }
0x27d7   :  { %v2650_v16 = vadd.f32 %v2648_v37, %v2639_v34 }
0x27d9   :  { %2895 = vst.msk [vmem:[%s4265_s8 + $0x30] sm:$0xff] %vm105_vm0, %v2650_v16  ;;  %3219 = vmatmul.mubr.msk.f32.vlgmr.msra.gmra.mxu1 %vm105_vm0, %v2650_v16 }
0x2899   :  { %v2724_v18 = vpop.f32.mrf.mxu1 }
0x289a   :  { %v2728_v19 = vadd.f32 %v2724_v18, %v2654_v17 }
0x289b   :  { %v3220_v20 = vpop.f32.mrf.mxu1 }
0x289c   :  { %v2897_v21 = vmul.f32 -1.442695, %v2728_v19 }
0x289e   :  { %3497 = vpow2.f32 %v2897_v21 }
0x28ab   :  { %v3498_v22 = vpop.eup %3497 }
0x28ac   :  { %v2732_v23 = vadd.f32 1.0, %v3498_v22 }
0x28ae   :  { %3499 = vrcp.f32 %v2732_v23 }
0x28bb   :  { %v3500_v24 = vpop.eup %3499 }
0x28bc   :  { %v2735_v25 = vmul.f32 %v3500_v24, %v2650_v16  ;;  %v2820_v39 = vsub.f32 1.0, %v3500_v24 }
0x28be   :  { %3230 = vmatmul.mubr.msk.f32.vlgmr.msra.gmra.mxu0 %vm105_vm0, %v2735_v25 }
0x297e   :  { %v2805_v26 = vpop.f32.mrf.mxu0 }
0x297f   :  { %2810 = vrot.lane.b32.xlu1 %v2805_v26, %s3618_s6 }
0x2980   :  { %v3231_v27 = vpop.f32.mrf.mxu0 }
0x2983   :  { %2816 = vrot.lane.b32.xlu1 %v3500_v24, %s3621_s7 }
0x29f1   :  { %v2811_v28 = vpop.permute.xlu1 %2810 }
0x29f2   :  { %v2813_v35 = vadd.f32 %v2811_v28, %v2654_v17 }
0x29f4   :  { %3501 = vtanh.f32 %v2813_v35 }
0x29f5   :  { %v2817_v42 = vpop.permute.xlu1 %2816 }
0x29f6   :  { %v2819_v43 = vmul.f32 %v2817_v42, %v2650_v16 }
0x2a01   :  { %v3502_v38 = vpop.eup %3501 }
0x2a02   :  { %2822 = vrot.lane.b32.xlu0 %v3502_v38, %s3621_s7 }
0x2a74   :  { %v2823_v40 = vpop.permute.xlu0 %2822 }
0x2a75   :  { %v2825_v41 = vmul.f32 %v2823_v40, %v2820_v39 }
0x2a77   :  { %2827 = vrot.lane.b32.xlu0 %v2825_v41, %s3621_s7 }
0x2ae9   :  { %v2828_v44 = vpop.permute.xlu0 %2827 }
0x2aea   :  { %v2830_v45 = vadd.f32 %v2828_v44, %v2819_v43 }
0x2aec   :  { %2899 = vst.msk [vmem:[%s4265_s8 + $0x38] sm:$0xff] %vm105_vm0, %v2830_v45  ;;  %2833 = vst.msk [vmem:[#allocation5] sm:$0xff] %vm105_vm0, %v2830_v45 }
0x2aed   :  { %2838 = vsyncpa [#allocation8], 1 }
0x2aee   :  { %2839 = vsyncpa [#allocation10], 1 }
0x2aef   :  { %2840 = vsyncpa [#allocation13], 1 }

</bundles_post_ra>
